<compile_context>
chip_gen: v7x
topology: tpu7x:2x2x1
jax: 0.10.0
libtpu: 0.0.40
codegen_flags: <defaults>
</compile_context>

<pallas_src>
import jax
import jax.numpy as jnp
from jax import lax
from jax.experimental import pallas as pl
from jax.experimental.pallas import tpu as pltpu


# ---------------------------------------------------------------------------
# Fused forward kernel (one grid step == B_TILE images)
# ---------------------------------------------------------------------------

def _make_net_kernel(b_tile):
    T = b_tile
    f32 = jnp.float32
    bf16 = jnp.bfloat16

    def kernel(xc_ref,
               w1_ref, w2_ref, b2_ref, w3_ref, b3_ref,
               w4_ref, b4_ref, w5_ref, b5_ref,
               o_ref,
               p2_ref, c2_ref, p3_ref, c3_ref, f_ref):
        # --- once per grid step: zero ONLY the padding borders of the reused
        # single-image conv2/conv3 input slabs (interiors + p2's interior
        # padding columns are fully rewritten for every image). ---
        p2_ref[0:17, :] = jnp.zeros((17, 128), bf16)
        p2_ref[241:256, :] = jnp.zeros((15, 128), bf16)
        p3_ref[...] = jnp.zeros(p3_ref.shape, bf16)

        # Small loop-invariant loads, hoisted out of the per-image loop.
        w1v = w1_ref[...]            # (16,128) bf16: rows 0..8 taps, row 9 bias
        b2v = b2_ref[...]            # (1,128) f32
        b3v = b3_ref[...]            # (1,128) f32

        def per_image(t, carry):
            # ---------- conv1 + bias + ReLU + 2x2 maxpool (fused, MXU) ------
            # xc rows for image t are grouped by pool-window sub-position s
            # (4 groups of 224 rows, row = ph*16 + pw; rows with pw>=14 are
            # all-zero junk that lands exactly on p2 padding columns).  Tap
            # column 9 is a ones column, so the bias rides the matmul and
            # commutes with the max / ReLU.
            for r0 in (0, 112):
                m = None
                for s in range(4):
                    a = s * 224 + r0
                    lhs = xc_ref[t, a:a + 112, :]                  # (112,16) bf16
                    v = jnp.dot(lhs, w1v, preferred_element_type=f32)
                    m = v if m is None else jnp.maximum(m, v)
                p2_ref[17 + r0:17 + r0 + 112, :] = (
                    jnp.maximum(m, 0.0).astype(bf16))

            # ---------- conv2: 9 shifted bf16 MXU matmuls, 2 row chunks -----
            # (register-resident f32 accumulator per chunk; p2 is bf16 so the
            # taps need no per-use cast.)
            for r0, L in ((0, 112), (112, 110)):
                acc = None
                for k in range(9):
                    off = (k // 3) * 16 + (k % 3)
                    xs = p2_ref[off + r0:off + r0 + L, :]          # bf16
                    v = jnp.dot(xs, w2_ref[k], preferred_element_type=f32)
                    acc = v if acc is None else acc + v
                c2_ref[r0:r0 + L, :] = acc

            # ---------- pool2 + bias + ReLU -> padded conv3 input (bf16) ----
            for qh in range(7):
                top = 2 * qh * 16
                bot = top + 16
                p00 = c2_ref[pl.ds(top, 7, stride=2), :]
                p01 = c2_ref[pl.ds(top + 1, 7, stride=2), :]
                p10 = c2_ref[pl.ds(bot, 7, stride=2), :]
                p11 = c2_ref[pl.ds(bot + 1, 7, stride=2), :]
                row = jnp.maximum(
                    jnp.maximum(jnp.maximum(p00, p01),
                                jnp.maximum(p10, p11)) + b2v, 0.0)
                r1 = (qh + 1) * 9 + 1
                p3_ref[r1:r1 + 7, :] = row.astype(bf16)

            # ---------- conv3: 9 shifted bf16 MXU matmuls -------------------
            acc = None
            for k in range(9):
                off = (k // 3) * 9 + (k % 3)
                xs = p3_ref[off:off + 61, :]
                v = jnp.dot(xs, w3_ref[k], preferred_element_type=f32)
                acc = v if acc is None else acc + v
            c3_ref[0:61, :] = acc

            # ---------- pool3 + bias + ReLU -> FC input rows ----------------
            # f row t*16 + (h*3 + w) holds the 64 pooled channels (lanes).
            fbase = pl.multiple_of(t * 16, 8)
            for qh in range(3):
                top = 2 * qh * 9
                bot = top + 9
                p00 = c3_ref[pl.ds(top, 3, stride=2), :]
                p01 = c3_ref[pl.ds(top + 1, 3, stride=2), :]
                p10 = c3_ref[pl.ds(bot, 3, stride=2), :]
                p11 = c3_ref[pl.ds(bot + 1, 3, stride=2), :]
                row = jnp.maximum(
                    jnp.maximum(jnp.maximum(p00, p01),
                                jnp.maximum(p10, p11)) + b3v, 0.0)
                f_ref[pl.ds(fbase + qh * 3, 3), :] = row
            return carry

        lax.fori_loop(0, T, per_image, 0)

        # ---------- fc1 (+ReLU) and fc2, batched over the T images ----------
        # torch's view(-1,576) flattens NCHW as c*9 + (h*3+w); w4 is
        # pre-permuted to (r, c, out) so sum_r (T,128)@(128,256) reproduces it.
        # TODO(synk): Dropout(p=0.25) layers are identity (eval mode only).
        acc = None
        for r in range(9):
            fr = f_ref[pl.ds(r, T, stride=16), :].astype(bf16)      # (T,128)
            v = jnp.dot(fr, w4_ref[r], preferred_element_type=f32)  # (T,256)
            acc = v if acc is None else acc + v
        h = jnp.maximum(acc + b4_ref[...], 0.0).astype(bf16)        # (T,256)
        o_ref[...] = (jnp.dot(h, w5_ref[...], preferred_element_type=f32)
                      + b5_ref[...])                                # (T,128)

    return kernel


# ---------------------------------------------------------------------------
# Wrapper
# ---------------------------------------------------------------------------

def _full_spec(shape):
    rank = len(shape)
    return pl.BlockSpec(shape, lambda b, _r=rank: (0,) * _r)


def net_forward(x_nchw, kp, b_tile=8):
    """Forward pass matching PyTorch Net.forward (eval mode). x: (B, 1, 28, 28).

    For large batches on v7x, pick b_tile so that ceil(B/b_tile) >= 2 so the
    "parallel" batch axis splits across both TensorCores.
    """
    B = x_nchw.shape[0]
    T = b_tile
    n_blocks = pl.cdiv(B, T)
    Bp = n_blocks * T

    # Tiny XLA-side prep: pool-grouped, bias-augmented conv1 im2col (bf16,
    # lane-dense 16 taps).  Row layout per image: [sub-position s (4)] x
    # [ph*16 + pw (224, pw>=14 rows all-zero)]; tap 9 is a ones column.
    x = x_nchw.reshape(B, 28, 28).astype(jnp.float32)
    if Bp != B:
        x = jnp.pad(x, ((0, Bp - B), (0, 0), (0, 0)))
    xpad = jnp.pad(x, ((0, 0), (1, 1), (1, 1)))                      # (Bp,30,30)
    taps = [xpad[:, dh:dh + 28, dw:dw + 28]
            for dh in range(3) for dw in range(3)]
    pat = jnp.stack(taps, axis=-1)                                   # (Bp,28,28,9)
    pat = jnp.concatenate(
        [pat, jnp.ones((Bp, 28, 28, 1), jnp.float32)], axis=-1)      # ones col
    pat = pat.reshape(Bp, 14, 2, 14, 2, 10)
    pat = jnp.transpose(pat, (0, 2, 4, 1, 3, 5)).reshape(Bp, 4, 14, 14, 10)
    pat = jnp.pad(pat, ((0, 0), (0, 0), (0, 0), (0, 2), (0, 6)))     # pw->16, k->16
    xcol = pat.reshape(Bp, 896, 16).astype(jnp.bfloat16)

    out = pl.pallas_call(
        _make_net_kernel(T),
        out_shape=jax.ShapeDtypeStruct((Bp, 128), jnp.float32),
        grid_spec=pltpu.PrefetchScalarGridSpec(
            num_scalar_prefetch=0,
            grid=(n_blocks,),
            in_specs=[
                pl.BlockSpec((T, 896, 16), lambda b: (b, 0, 0)),  # im2col input
                _full_spec((16, 128)),        # w1 (+bias row)
                _full_spec((9, 128, 128)),    # w2
                _full_spec((1, 128)),         # b2
                _full_spec((9, 128, 128)),    # w3
                _full_spec((1, 128)),         # b3
                _full_spec((9, 128, 256)),    # w4
                _full_spec((1, 256)),         # b4
                _full_spec((256, 128)),       # w5
                _full_spec((1, 128)),         # b5
            ],
            out_specs=pl.BlockSpec((T, 128), lambda b: (b, 0)),
            scratch_shapes=[
                pltpu.VMEM((256, 128), jnp.bfloat16),    # p2: padded conv2 input
                pltpu.VMEM((224, 128), jnp.float32),     # c2: conv2 pre-act slab
                pltpu.VMEM((88, 128), jnp.bfloat16),     # p3: padded conv3 input
                pltpu.VMEM((64, 128), jnp.float32),      # c3: conv3 pre-act slab
                pltpu.VMEM((T * 16, 128), jnp.float32),  # f : pooled conv3 rows
            ],
        ),
        compiler_params=pltpu.CompilerParams(
            dimension_semantics=("parallel",),           # batch tiles across TCs
        ),
    )(xcol, kp["w1"], kp["w2"], kp["b2"], kp["w3"], kp["b3"],
      kp["w4"], kp["b4"], kp["w5"], kp["b5"])

    return out[:B, :26]


# ---------------------------------------------------------------------------
# Parameters (PyTorch layouts) + one-time packing into kernel layouts
# ---------------------------------------------------------------------------

def init_params(key):
    ks = jax.random.split(key, 10)

    def w(k, shape, fan_in):
        return jax.random.normal(k, shape, jnp.float32) * (1.0 / jnp.sqrt(fan_in))

    return {
        "conv1_w": w(ks[0], (16, 1, 3, 3), 9),
        "conv1_b": w(ks[1], (16,), 9),
        "conv2_w": w(ks[2], (32, 16, 3, 3), 16 * 9),
        "conv2_b": w(ks[3], (32,), 16 * 9),
        "conv3_w": w(ks[4], (64, 32, 3, 3), 32 * 9),
        "conv3_b": w(ks[5], (64,), 32 * 9),
        "fc1_w":   w(ks[6], (256, 64 * 3 * 3), 64 * 3 * 3),   # PyTorch (out, in)
        "fc1_b":   w(ks[7], (256,), 64 * 3 * 3),
        "fc2_w":   w(ks[8], (26, 256), 256),
        "fc2_b":   w(ks[9], (26,), 256),
    }


def prepare_params(p):
    """One-time pre-transpose / zero-pad (to 128 lanes) / bf16 cast of weights."""
    def pad_lane(a, n=128):
        return jnp.pad(a, [(0, 0)] * (a.ndim - 1) + [(0, n - a.shape[-1])])

    # conv1: taps + bias folded into one (16,128) bf16 RHS:
    #   rows 0..8 = tap k=dh*3+dw, row 9 = bias, rows 10..15 zero; lanes = cout.
    w1 = jnp.transpose(p["conv1_w"][:, 0, :, :], (1, 2, 0)).reshape(9, 16)
    w1 = jnp.concatenate([w1, p["conv1_b"].reshape(1, 16)], axis=0)
    w1 = jnp.pad(w1, ((0, 6), (0, 112))).astype(jnp.bfloat16)

    # convN: (Cout,Cin,3,3) -> (9, 128, 128) bf16, [k, cin, cout].
    def conv_pack(w):
        cout, cin = w.shape[0], w.shape[1]
        wk = jnp.transpose(w, (2, 3, 1, 0)).reshape(9, cin, cout)
        wk = jnp.pad(wk, ((0, 0), (0, 128 - cin), (0, 128 - cout)))
        return wk.astype(jnp.bfloat16)

    w2 = conv_pack(p["conv2_w"])
    b2 = pad_lane(p["conv2_b"].reshape(1, 32)).astype(jnp.float32)
    w3 = conv_pack(p["conv3_w"])
    b3 = pad_lane(p["conv3_b"].reshape(1, 64)).astype(jnp.float32)

    # fc1: (256, 576) with input index c*9 + (h*3+w) -> (9, 128, 256) bf16.
    w4 = jnp.transpose(p["fc1_w"].reshape(256, 64, 9), (2, 1, 0))   # (r, c, out)
    w4 = jnp.pad(w4, ((0, 0), (0, 64), (0, 0))).astype(jnp.bfloat16)
    b4 = p["fc1_b"].reshape(1, 256).astype(jnp.float32)

    # fc2: (26, 256) -> (256, 128) bf16 (zero-padded output columns).
    w5 = jnp.pad(p["fc2_w"].T, ((0, 0), (0, 128 - 26))).astype(jnp.bfloat16)
    b5 = pad_lane(p["fc2_b"].reshape(1, 26)).astype(jnp.float32)

    return dict(w1=w1, w2=w2, b2=b2, w3=w3, b3=b3, w4=w4, b4=b4, w5=w5, b5=b5)


# ---------------------------------------------------------------------------
# Pure-JAX f32 reference (for a loose-tolerance correctness check)
# ---------------------------------------------------------------------------

def net_reference(x_nchw, p):
    x = x_nchw.astype(jnp.float32)

    def conv(h, w, b):
        y = lax.conv_general_dilated(
            h, w, window_strides=(1, 1), padding=((1, 1), (1, 1)),
            dimension_numbers=("NCHW", "OIHW", "NCHW"))
        return y + b.reshape(1, -1, 1, 1)

    def pool(h):
        return lax.reduce_window(h, -jnp.inf, lax.max,
                                 (1, 1, 2, 2), (1, 1, 2, 2), "VALID")

    h = pool(jax.nn.relu(conv(x, p["conv1_w"], p["conv1_b"])))
    h = pool(jax.nn.relu(conv(h, p["conv2_w"], p["conv2_b"])))
    h = pool(jax.nn.relu(conv(h, p["conv3_w"], p["conv3_b"])))
    h = h.reshape(h.shape[0], -1)
    h = jax.nn.relu(h @ p["fc1_w"].T + p["fc1_b"])
    return h @ p["fc2_w"].T + p["fc2_b"]


if __name__ == "__main__":
    key = jax.random.PRNGKey(0)
    k_param, k_in = jax.random.split(key)
    params = init_params(k_param)
    prepared = prepare_params(params)

    # Input consistent with the module: 1 channel, 28x28 (-> 3x3 after 3 pools).
    x = jax.random.normal(k_in, (2, 1, 28, 28), jnp.float32)

    fwd = jax.jit(net_forward)
    out = jax.block_until_ready(fwd(x, prepared))
    assert out.shape == (2, 26) and out.dtype == jnp.float32

    # Loose tolerance: kernel uses bf16 weights/activations with f32 accumulation.
    ref = jax.jit(net_reference)(x, params)
    err = float(jnp.max(jnp.abs(out - ref)))
    assert err < 0.35, f"max abs err vs f32 reference: {err}"
    print("KERNEL_OK")
</pallas_src>

<mosaic_0001>
module attributes {stable_mosaic.version = 11 : i64} {
  func.func @kernel(%arg0: i32, %arg1: memref<8x896x16xbf16, #tpu.memory_space<vmem>>, %arg2: memref<16x128xbf16, #tpu.memory_space<vmem>>, %arg3: memref<9x128x128xbf16, #tpu.memory_space<vmem>>, %arg4: memref<1x128xf32, #tpu.memory_space<vmem>>, %arg5: memref<9x128x128xbf16, #tpu.memory_space<vmem>>, %arg6: memref<1x128xf32, #tpu.memory_space<vmem>>, %arg7: memref<9x128x256xbf16, #tpu.memory_space<vmem>>, %arg8: memref<1x256xf32, #tpu.memory_space<vmem>>, %arg9: memref<256x128xbf16, #tpu.memory_space<vmem>>, %arg10: memref<1x128xf32, #tpu.memory_space<vmem>>, %arg11: memref<8x128xf32, #tpu.memory_space<vmem>>, %arg12: memref<256x128xbf16, #tpu.memory_space<vmem>>, %arg13: memref<224x128xf32, #tpu.memory_space<vmem>>, %arg14: memref<88x128xbf16, #tpu.memory_space<vmem>>, %arg15: memref<64x128xf32, #tpu.memory_space<vmem>>, %arg16: memref<128x128xf32, #tpu.memory_space<vmem>>) attributes {dimension_semantics = [#tpu.dimension_semantics<parallel>], iteration_bounds = array<i64: 1>, scalar_prefetch = 0 : i64, scratch_operands = 5 : i64, tpu.core_type = #tpu.core_type<tc>, window_params = [{transform_indices = @transform_0, window_bounds = array<i64: 8, 896, 16>}, {pipeline_mode = #tpu.pipeline_mode<synchronous>, transform_indices = @transform_1, window_bounds = array<i64: 16, 128>}, {pipeline_mode = #tpu.pipeline_mode<synchronous>, transform_indices = @transform_2, window_bounds = array<i64: 9, 128, 128>}, {pipeline_mode = #tpu.pipeline_mode<synchronous>, transform_indices = @transform_3, window_bounds = array<i64: 1, 128>}, {pipeline_mode = #tpu.pipeline_mode<synchronous>, transform_indices = @transform_4, window_bounds = array<i64: 9, 128, 128>}, {pipeline_mode = #tpu.pipeline_mode<synchronous>, transform_indices = @transform_5, window_bounds = array<i64: 1, 128>}, {pipeline_mode = #tpu.pipeline_mode<synchronous>, transform_indices = @transform_6, window_bounds = array<i64: 9, 128, 256>}, {pipeline_mode = #tpu.pipeline_mode<synchronous>, transform_indices = @transform_7, window_bounds = array<i64: 1, 256>}, {pipeline_mode = #tpu.pipeline_mode<synchronous>, transform_indices = @transform_8, window_bounds = array<i64: 256, 128>}, {pipeline_mode = #tpu.pipeline_mode<synchronous>, transform_indices = @transform_9, window_bounds = array<i64: 1, 128>}, {transform_indices = @transform_10, window_bounds = array<i64: 8, 128>}]} {
    %cst = arith.constant 0.000000e+00 : bf16
    %0 = vector.broadcast %cst : bf16 to vector<17x128xbf16>
    %c0 = arith.constant 0 : index
    %c0_0 = arith.constant 0 : index
    %1 = vector.load %arg12[%c0, %c0_0] : memref<256x128xbf16, #tpu.memory_space<vmem>>, vector<17x128xbf16>
    tpu.vector_store %arg12[%c0, %c0_0], %0 {strides = array<i32>} : memref<256x128xbf16, #tpu.memory_space<vmem>>, vector<17x128xbf16>,
    %cst_1 = arith.constant 0.000000e+00 : bf16
    %2 = vector.broadcast %cst_1 : bf16 to vector<15x128xbf16>
    %c241 = arith.constant 241 : index
    %c0_2 = arith.constant 0 : index
    %3 = vector.load %arg12[%c241, %c0_2] : memref<256x128xbf16, #tpu.memory_space<vmem>>, vector<15x128xbf16>
    tpu.vector_store %arg12[%c241, %c0_2], %2 {strides = array<i32>} : memref<256x128xbf16, #tpu.memory_space<vmem>>, vector<15x128xbf16>,
    %cst_3 = arith.constant 0.000000e+00 : bf16
    %4 = vector.broadcast %cst_3 : bf16 to vector<88x128xbf16>
    %c0_4 = arith.constant 0 : index
    %c0_5 = arith.constant 0 : index
    %5 = vector.load %arg14[%c0_4, %c0_5] : memref<88x128xbf16, #tpu.memory_space<vmem>>, vector<88x128xbf16>
    tpu.vector_store %arg14[%c0_4, %c0_5], %4 {strides = array<i32>} : memref<88x128xbf16, #tpu.memory_space<vmem>>, vector<88x128xbf16>,
    %c0_6 = arith.constant 0 : index
    %c0_7 = arith.constant 0 : index
    %6 = vector.load %arg2[%c0_6, %c0_7] : memref<16x128xbf16, #tpu.memory_space<vmem>>, vector<16x128xbf16>
    %c0_8 = arith.constant 0 : index
    %c0_9 = arith.constant 0 : index
    %7 = vector.load %arg4[%c0_8, %c0_9] : memref<1x128xf32, #tpu.memory_space<vmem>>, vector<1x128xf32>
    %c0_10 = arith.constant 0 : index
    %c0_11 = arith.constant 0 : index
    %8 = vector.load %arg6[%c0_10, %c0_11] : memref<1x128xf32, #tpu.memory_space<vmem>>, vector<1x128xf32>
    %c0_i32 = arith.constant 0 : i32
    %c8_i32 = arith.constant 8 : i32
    %9 = arith.addi %c0_i32, %c8_i32 : i32
    %c1_i32 = arith.constant 1 : i32
    scf.for %arg17 = %c0_i32 to %9 step %c1_i32  : i32 {
      %75 = arith.index_cast %arg17 : i32 to index
      %c0_69 = arith.constant 0 : index
      %c0_70 = arith.constant 0 : index
      %76 = vector.load %arg1[%75, %c0_69, %c0_70] : memref<8x896x16xbf16, #tpu.memory_space<vmem>>, vector<1x112x16xbf16>
      %77 = vector.shape_cast %76 : vector<1x112x16xbf16> to vector<112x16xbf16>
      %cst_71 = arith.constant dense<0.000000e+00> : vector<112x128xf32>
      %78 = tpu.matmul %77, %6, %cst_71 {dimension_numbers = #tpu.dot_dimension_numbers<[1], [0], [0], [1], [0, 0, 1, 1], [], []>} : vector<112x16xbf16>, vector<16x128xbf16>, vector<112x128xf32> -> vector<112x128xf32>
      %79 = arith.index_cast %arg17 : i32 to index
      %c224 = arith.constant 224 : index
      %c0_72 = arith.constant 0 : index
      %80 = vector.load %arg1[%79, %c224, %c0_72] : memref<8x896x16xbf16, #tpu.memory_space<vmem>>, vector<1x112x16xbf16>
      %81 = vector.shape_cast %80 : vector<1x112x16xbf16> to vector<112x16xbf16>
      %cst_73 = arith.constant dense<0.000000e+00> : vector<112x128xf32>
      %82 = tpu.matmul %81, %6, %cst_73 {dimension_numbers = #tpu.dot_dimension_numbers<[1], [0], [0], [1], [0, 0, 1, 1], [], []>} : vector<112x16xbf16>, vector<16x128xbf16>, vector<112x128xf32> -> vector<112x128xf32>
      %83 = arith.maximumf %78, %82 : vector<112x128xf32>
      %84 = arith.index_cast %arg17 : i32 to index
      %c448 = arith.constant 448 : index
      %c0_74 = arith.constant 0 : index
      %85 = vector.load %arg1[%84, %c448, %c0_74] : memref<8x896x16xbf16, #tpu.memory_space<vmem>>, vector<1x112x16xbf16>
      %86 = vector.shape_cast %85 : vector<1x112x16xbf16> to vector<112x16xbf16>
      %cst_75 = arith.constant dense<0.000000e+00> : vector<112x128xf32>
      %87 = tpu.matmul %86, %6, %cst_75 {dimension_numbers = #tpu.dot_dimension_numbers<[1], [0], [0], [1], [0, 0, 1, 1], [], []>} : vector<112x16xbf16>, vector<16x128xbf16>, vector<112x128xf32> -> vector<112x128xf32>
      %88 = arith.maximumf %83, %87 : vector<112x128xf32>
      %89 = arith.index_cast %arg17 : i32 to index
      %c672 = arith.constant 672 : index
      %c0_76 = arith.constant 0 : index
      %90 = vector.load %arg1[%89, %c672, %c0_76] : memref<8x896x16xbf16, #tpu.memory_space<vmem>>, vector<1x112x16xbf16>
      %91 = vector.shape_cast %90 : vector<1x112x16xbf16> to vector<112x16xbf16>
      %cst_77 = arith.constant dense<0.000000e+00> : vector<112x128xf32>
      %92 = tpu.matmul %91, %6, %cst_77 {dimension_numbers = #tpu.dot_dimension_numbers<[1], [0], [0], [1], [0, 0, 1, 1], [], []>} : vector<112x16xbf16>, vector<16x128xbf16>, vector<112x128xf32> -> vector<112x128xf32>
      %93 = arith.maximumf %88, %92 : vector<112x128xf32>
      %cst_78 = arith.constant 0.000000e+00 : f32
      %94 = vector.broadcast %cst_78 : f32 to vector<112x128xf32>
      %95 = arith.maximumf %93, %94 : vector<112x128xf32>
      %96 = arith.truncf %95 : vector<112x128xf32> to vector<112x128xbf16>
      %c17 = arith.constant 17 : index
      %c0_79 = arith.constant 0 : index
      %97 = vector.load %arg12[%c17, %c0_79] : memref<256x128xbf16, #tpu.memory_space<vmem>>, vector<112x128xbf16>
      tpu.vector_store %arg12[%c17, %c0_79], %96 {strides = array<i32>} : memref<256x128xbf16, #tpu.memory_space<vmem>>, vector<112x128xbf16>,
      %98 = arith.index_cast %arg17 : i32 to index
      %c112 = arith.constant 112 : index
      %c0_80 = arith.constant 0 : index
      %99 = vector.load %arg1[%98, %c112, %c0_80] : memref<8x896x16xbf16, #tpu.memory_space<vmem>>, vector<1x112x16xbf16>
      %100 = vector.shape_cast %99 : vector<1x112x16xbf16> to vector<112x16xbf16>
      %cst_81 = arith.constant dense<0.000000e+00> : vector<112x128xf32>
      %101 = tpu.matmul %100, %6, %cst_81 {dimension_numbers = #tpu.dot_dimension_numbers<[1], [0], [0], [1], [0, 0, 1, 1], [], []>} : vector<112x16xbf16>, vector<16x128xbf16>, vector<112x128xf32> -> vector<112x128xf32>
      %102 = arith.index_cast %arg17 : i32 to index
      %c336 = arith.constant 336 : index
      %c0_82 = arith.constant 0 : index
      %103 = vector.load %arg1[%102, %c336, %c0_82] : memref<8x896x16xbf16, #tpu.memory_space<vmem>>, vector<1x112x16xbf16>
      %104 = vector.shape_cast %103 : vector<1x112x16xbf16> to vector<112x16xbf16>
      %cst_83 = arith.constant dense<0.000000e+00> : vector<112x128xf32>
      %105 = tpu.matmul %104, %6, %cst_83 {dimension_numbers = #tpu.dot_dimension_numbers<[1], [0], [0], [1], [0, 0, 1, 1], [], []>} : vector<112x16xbf16>, vector<16x128xbf16>, vector<112x128xf32> -> vector<112x128xf32>
      %106 = arith.maximumf %101, %105 : vector<112x128xf32>
      %107 = arith.index_cast %arg17 : i32 to index
      %c560 = arith.constant 560 : index
      %c0_84 = arith.constant 0 : index
      %108 = vector.load %arg1[%107, %c560, %c0_84] : memref<8x896x16xbf16, #tpu.memory_space<vmem>>, vector<1x112x16xbf16>
      %109 = vector.shape_cast %108 : vector<1x112x16xbf16> to vector<112x16xbf16>
      %cst_85 = arith.constant dense<0.000000e+00> : vector<112x128xf32>
      %110 = tpu.matmul %109, %6, %cst_85 {dimension_numbers = #tpu.dot_dimension_numbers<[1], [0], [0], [1], [0, 0, 1, 1], [], []>} : vector<112x16xbf16>, vector<16x128xbf16>, vector<112x128xf32> -> vector<112x128xf32>
      %111 = arith.maximumf %106, %110 : vector<112x128xf32>
      %112 = arith.index_cast %arg17 : i32 to index
      %c784 = arith.constant 784 : index
      %c0_86 = arith.constant 0 : index
      %113 = vector.load %arg1[%112, %c784, %c0_86] : memref<8x896x16xbf16, #tpu.memory_space<vmem>>, vector<1x112x16xbf16>
      %114 = vector.shape_cast %113 : vector<1x112x16xbf16> to vector<112x16xbf16>
      %cst_87 = arith.constant dense<0.000000e+00> : vector<112x128xf32>
      %115 = tpu.matmul %114, %6, %cst_87 {dimension_numbers = #tpu.dot_dimension_numbers<[1], [0], [0], [1], [0, 0, 1, 1], [], []>} : vector<112x16xbf16>, vector<16x128xbf16>, vector<112x128xf32> -> vector<112x128xf32>
      %116 = arith.maximumf %111, %115 : vector<112x128xf32>
      %cst_88 = arith.constant 0.000000e+00 : f32
      %117 = vector.broadcast %cst_88 : f32 to vector<112x128xf32>
      %118 = arith.maximumf %116, %117 : vector<112x128xf32>
      %119 = arith.truncf %118 : vector<112x128xf32> to vector<112x128xbf16>
      %c129 = arith.constant 129 : index
      %c0_89 = arith.constant 0 : index
      %120 = vector.load %arg12[%c129, %c0_89] : memref<256x128xbf16, #tpu.memory_space<vmem>>, vector<112x128xbf16>
      tpu.vector_store %arg12[%c129, %c0_89], %119 {strides = array<i32>} : memref<256x128xbf16, #tpu.memory_space<vmem>>, vector<112x128xbf16>,
      %c0_90 = arith.constant 0 : index
      %c0_91 = arith.constant 0 : index
      %121 = vector.load %arg12[%c0_90, %c0_91] : memref<256x128xbf16, #tpu.memory_space<vmem>>, vector<112x128xbf16>
      %c0_92 = arith.constant 0 : index
      %c0_93 = arith.constant 0 : index
      %c0_94 = arith.constant 0 : index
      %122 = vector.load %arg3[%c0_92, %c0_93, %c0_94] : memref<9x128x128xbf16, #tpu.memory_space<vmem>>, vector<1x128x128xbf16>
      %123 = vector.shape_cast %122 : vector<1x128x128xbf16> to vector<128x128xbf16>
      %cst_95 = arith.constant dense<0.000000e+00> : vector<112x128xf32>
      %124 = tpu.matmul %121, %123, %cst_95 {dimension_numbers = #tpu.dot_dimension_numbers<[1], [0], [0], [1], [0, 0, 1, 1], [], []>} : vector<112x128xbf16>, vector<128x128xbf16>, vector<112x128xf32> -> vector<112x128xf32>
      %c1_96 = arith.constant 1 : index
      %c0_97 = arith.constant 0 : index
      %125 = vector.load %arg12[%c1_96, %c0_97] : memref<256x128xbf16, #tpu.memory_space<vmem>>, vector<112x128xbf16>
      %c1_98 = arith.constant 1 : index
      %c0_99 = arith.constant 0 : index
      %c0_100 = arith.constant 0 : index
      %126 = vector.load %arg3[%c1_98, %c0_99, %c0_100] : memref<9x128x128xbf16, #tpu.memory_space<vmem>>, vector<1x128x128xbf16>
      %127 = vector.shape_cast %126 : vector<1x128x128xbf16> to vector<128x128xbf16>
      %cst_101 = arith.constant dense<0.000000e+00> : vector<112x128xf32>
      %128 = tpu.matmul %125, %127, %cst_101 {dimension_numbers = #tpu.dot_dimension_numbers<[1], [0], [0], [1], [0, 0, 1, 1], [], []>} : vector<112x128xbf16>, vector<128x128xbf16>, vector<112x128xf32> -> vector<112x128xf32>
      %129 = arith.addf %124, %128 : vector<112x128xf32>
      %c2_102 = arith.constant 2 : index
      %c0_103 = arith.constant 0 : index
      %130 = vector.load %arg12[%c2_102, %c0_103] : memref<256x128xbf16, #tpu.memory_space<vmem>>, vector<112x128xbf16>
      %c2_104 = arith.constant 2 : index
      %c0_105 = arith.constant 0 : index
      %c0_106 = arith.constant 0 : index
      %131 = vector.load %arg3[%c2_104, %c0_105, %c0_106] : memref<9x128x128xbf16, #tpu.memory_space<vmem>>, vector<1x128x128xbf16>
      %132 = vector.shape_cast %131 : vector<1x128x128xbf16> to vector<128x128xbf16>
      %cst_107 = arith.constant dense<0.000000e+00> : vector<112x128xf32>
      %133 = tpu.matmul %130, %132, %cst_107 {dimension_numbers = #tpu.dot_dimension_numbers<[1], [0], [0], [1], [0, 0, 1, 1], [], []>} : vector<112x128xbf16>, vector<128x128xbf16>, vector<112x128xf32> -> vector<112x128xf32>
      %134 = arith.addf %129, %133 : vector<112x128xf32>
      %c16 = arith.constant 16 : index
      %c0_108 = arith.constant 0 : index
      %135 = vector.load %arg12[%c16, %c0_108] : memref<256x128xbf16, #tpu.memory_space<vmem>>, vector<112x128xbf16>
      %c3_109 = arith.constant 3 : index
      %c0_110 = arith.constant 0 : index
      %c0_111 = arith.constant 0 : index
      %136 = vector.load %arg3[%c3_109, %c0_110, %c0_111] : memref<9x128x128xbf16, #tpu.memory_space<vmem>>, vector<1x128x128xbf16>
      %137 = vector.shape_cast %136 : vector<1x128x128xbf16> to vector<128x128xbf16>
      %cst_112 = arith.constant dense<0.000000e+00> : vector<112x128xf32>
      %138 = tpu.matmul %135, %137, %cst_112 {dimension_numbers = #tpu.dot_dimension_numbers<[1], [0], [0], [1], [0, 0, 1, 1], [], []>} : vector<112x128xbf16>, vector<128x128xbf16>, vector<112x128xf32> -> vector<112x128xf32>
      %139 = arith.addf %134, %138 : vector<112x128xf32>
      %c17_113 = arith.constant 17 : index
      %c0_114 = arith.constant 0 : index
      %140 = vector.load %arg12[%c17_113, %c0_114] : memref<256x128xbf16, #tpu.memory_space<vmem>>, vector<112x128xbf16>
      %c4_115 = arith.constant 4 : index
      %c0_116 = arith.constant 0 : index
      %c0_117 = arith.constant 0 : index
      %141 = vector.load %arg3[%c4_115, %c0_116, %c0_117] : memref<9x128x128xbf16, #tpu.memory_space<vmem>>, vector<1x128x128xbf16>
      %142 = vector.shape_cast %141 : vector<1x128x128xbf16> to vector<128x128xbf16>
      %cst_118 = arith.constant dense<0.000000e+00> : vector<112x128xf32>
      %143 = tpu.matmul %140, %142, %cst_118 {dimension_numbers = #tpu.dot_dimension_numbers<[1], [0], [0], [1], [0, 0, 1, 1], [], []>} : vector<112x128xbf16>, vector<128x128xbf16>, vector<112x128xf32> -> vector<112x128xf32>
      %144 = arith.addf %139, %143 : vector<112x128xf32>
      %c18 = arith.constant 18 : index
      %c0_119 = arith.constant 0 : index
      %145 = vector.load %arg12[%c18, %c0_119] : memref<256x128xbf16, #tpu.memory_space<vmem>>, vector<112x128xbf16>
      %c5_120 = arith.constant 5 : index
      %c0_121 = arith.constant 0 : index
      %c0_122 = arith.constant 0 : index
      %146 = vector.load %arg3[%c5_120, %c0_121, %c0_122] : memref<9x128x128xbf16, #tpu.memory_space<vmem>>, vector<1x128x128xbf16>
      %147 = vector.shape_cast %146 : vector<1x128x128xbf16> to vector<128x128xbf16>
      %cst_123 = arith.constant dense<0.000000e+00> : vector<112x128xf32>
      %148 = tpu.matmul %145, %147, %cst_123 {dimension_numbers = #tpu.dot_dimension_numbers<[1], [0], [0], [1], [0, 0, 1, 1], [], []>} : vector<112x128xbf16>, vector<128x128xbf16>, vector<112x128xf32> -> vector<112x128xf32>
      %149 = arith.addf %144, %148 : vector<112x128xf32>
      %c32 = arith.constant 32 : index
      %c0_124 = arith.constant 0 : index
      %150 = vector.load %arg12[%c32, %c0_124] : memref<256x128xbf16, #tpu.memory_space<vmem>>, vector<112x128xbf16>
      %c6_125 = arith.constant 6 : index
      %c0_126 = arith.constant 0 : index
      %c0_127 = arith.constant 0 : index
      %151 = vector.load %arg3[%c6_125, %c0_126, %c0_127] : memref<9x128x128xbf16, #tpu.memory_space<vmem>>, vector<1x128x128xbf16>
      %152 = vector.shape_cast %151 : vector<1x128x128xbf16> to vector<128x128xbf16>
      %cst_128 = arith.constant dense<0.000000e+00> : vector<112x128xf32>
      %153 = tpu.matmul %150, %152, %cst_128 {dimension_numbers = #tpu.dot_dimension_numbers<[1], [0], [0], [1], [0, 0, 1, 1], [], []>} : vector<112x128xbf16>, vector<128x128xbf16>, vector<112x128xf32> -> vector<112x128xf32>
      %154 = arith.addf %149, %153 : vector<112x128xf32>
      %c33 = arith.constant 33 : index
      %c0_129 = arith.constant 0 : index
      %155 = vector.load %arg12[%c33, %c0_129] : memref<256x128xbf16, #tpu.memory_space<vmem>>, vector<112x128xbf16>
      %c7_130 = arith.constant 7 : index
      %c0_131 = arith.constant 0 : index
      %c0_132 = arith.constant 0 : index
      %156 = vector.load %arg3[%c7_130, %c0_131, %c0_132] : memref<9x128x128xbf16, #tpu.memory_space<vmem>>, vector<1x128x128xbf16>
      %157 = vector.shape_cast %156 : vector<1x128x128xbf16> to vector<128x128xbf16>
      %cst_133 = arith.constant dense<0.000000e+00> : vector<112x128xf32>
      %158 = tpu.matmul %155, %157, %cst_133 {dimension_numbers = #tpu.dot_dimension_numbers<[1], [0], [0], [1], [0, 0, 1, 1], [], []>} : vector<112x128xbf16>, vector<128x128xbf16>, vector<112x128xf32> -> vector<112x128xf32>
      %159 = arith.addf %154, %158 : vector<112x128xf32>
      %c34 = arith.constant 34 : index
      %c0_134 = arith.constant 0 : index
      %160 = vector.load %arg12[%c34, %c0_134] : memref<256x128xbf16, #tpu.memory_space<vmem>>, vector<112x128xbf16>
      %c8_135 = arith.constant 8 : index
      %c0_136 = arith.constant 0 : index
      %c0_137 = arith.constant 0 : index
      %161 = vector.load %arg3[%c8_135, %c0_136, %c0_137] : memref<9x128x128xbf16, #tpu.memory_space<vmem>>, vector<1x128x128xbf16>
      %162 = vector.shape_cast %161 : vector<1x128x128xbf16> to vector<128x128xbf16>
      %cst_138 = arith.constant dense<0.000000e+00> : vector<112x128xf32>
      %163 = tpu.matmul %160, %162, %cst_138 {dimension_numbers = #tpu.dot_dimension_numbers<[1], [0], [0], [1], [0, 0, 1, 1], [], []>} : vector<112x128xbf16>, vector<128x128xbf16>, vector<112x128xf32> -> vector<112x128xf32>
      %164 = arith.addf %159, %163 : vector<112x128xf32>
      %c0_139 = arith.constant 0 : index
      %c0_140 = arith.constant 0 : index
      %165 = vector.load %arg13[%c0_139, %c0_140] : memref<224x128xf32, #tpu.memory_space<vmem>>, vector<112x128xf32>
      tpu.vector_store %arg13[%c0_139, %c0_140], %164 {strides = array<i32>} : memref<224x128xf32, #tpu.memory_space<vmem>>, vector<112x128xf32>,
      %c112_141 = arith.constant 112 : index
      %c0_142 = arith.constant 0 : index
      %166 = vector.load %arg12[%c112_141, %c0_142] : memref<256x128xbf16, #tpu.memory_space<vmem>>, vector<110x128xbf16>
      %c0_143 = arith.constant 0 : index
      %c0_144 = arith.constant 0 : index
      %c0_145 = arith.constant 0 : index
      %167 = vector.load %arg3[%c0_143, %c0_144, %c0_145] : memref<9x128x128xbf16, #tpu.memory_space<vmem>>, vector<1x128x128xbf16>
      %168 = vector.shape_cast %167 : vector<1x128x128xbf16> to vector<128x128xbf16>
      %cst_146 = arith.constant dense<0.000000e+00> : vector<110x128xf32>
      %169 = tpu.matmul %166, %168, %cst_146 {dimension_numbers = #tpu.dot_dimension_numbers<[1], [0], [0], [1], [0, 0, 1, 1], [], []>} : vector<110x128xbf16>, vector<128x128xbf16>, vector<110x128xf32> -> vector<110x128xf32>
      %c113 = arith.constant 113 : index
      %c0_147 = arith.constant 0 : index
      %170 = vector.load %arg12[%c113, %c0_147] : memref<256x128xbf16, #tpu.memory_space<vmem>>, vector<110x128xbf16>
      %c1_148 = arith.constant 1 : index
      %c0_149 = arith.constant 0 : index
      %c0_150 = arith.constant 0 : index
      %171 = vector.load %arg3[%c1_148, %c0_149, %c0_150] : memref<9x128x128xbf16, #tpu.memory_space<vmem>>, vector<1x128x128xbf16>
      %172 = vector.shape_cast %171 : vector<1x128x128xbf16> to vector<128x128xbf16>
      %cst_151 = arith.constant dense<0.000000e+00> : vector<110x128xf32>
      %173 = tpu.matmul %170, %172, %cst_151 {dimension_numbers = #tpu.dot_dimension_numbers<[1], [0], [0], [1], [0, 0, 1, 1], [], []>} : vector<110x128xbf16>, vector<128x128xbf16>, vector<110x128xf32> -> vector<110x128xf32>
      %174 = arith.addf %169, %173 : vector<110x128xf32>
      %c114 = arith.constant 114 : index
      %c0_152 = arith.constant 0 : index
      %175 = vector.load %arg12[%c114, %c0_152] : memref<256x128xbf16, #tpu.memory_space<vmem>>, vector<110x128xbf16>
      %c2_153 = arith.constant 2 : index
      %c0_154 = arith.constant 0 : index
      %c0_155 = arith.constant 0 : index
      %176 = vector.load %arg3[%c2_153, %c0_154, %c0_155] : memref<9x128x128xbf16, #tpu.memory_space<vmem>>, vector<1x128x128xbf16>
      %177 = vector.shape_cast %176 : vector<1x128x128xbf16> to vector<128x128xbf16>
      %cst_156 = arith.constant dense<0.000000e+00> : vector<110x128xf32>
      %178 = tpu.matmul %175, %177, %cst_156 {dimension_numbers = #tpu.dot_dimension_numbers<[1], [0], [0], [1], [0, 0, 1, 1], [], []>} : vector<110x128xbf16>, vector<128x128xbf16>, vector<110x128xf32> -> vector<110x128xf32>
      %179 = arith.addf %174, %178 : vector<110x128xf32>
      %c128 = arith.constant 128 : index
      %c0_157 = arith.constant 0 : index
      %180 = vector.load %arg12[%c128, %c0_157] : memref<256x128xbf16, #tpu.memory_space<vmem>>, vector<110x128xbf16>
      %c3_158 = arith.constant 3 : index
      %c0_159 = arith.constant 0 : index
      %c0_160 = arith.constant 0 : index
      %181 = vector.load %arg3[%c3_158, %c0_159, %c0_160] : memref<9x128x128xbf16, #tpu.memory_space<vmem>>, vector<1x128x128xbf16>
      %182 = vector.shape_cast %181 : vector<1x128x128xbf16> to vector<128x128xbf16>
      %cst_161 = arith.constant dense<0.000000e+00> : vector<110x128xf32>
      %183 = tpu.matmul %180, %182, %cst_161 {dimension_numbers = #tpu.dot_dimension_numbers<[1], [0], [0], [1], [0, 0, 1, 1], [], []>} : vector<110x128xbf16>, vector<128x128xbf16>, vector<110x128xf32> -> vector<110x128xf32>
      %184 = arith.addf %179, %183 : vector<110x128xf32>
      %c129_162 = arith.constant 129 : index
      %c0_163 = arith.constant 0 : index
      %185 = vector.load %arg12[%c129_162, %c0_163] : memref<256x128xbf16, #tpu.memory_space<vmem>>, vector<110x128xbf16>
      %c4_164 = arith.constant 4 : index
      %c0_165 = arith.constant 0 : index
      %c0_166 = arith.constant 0 : index
      %186 = vector.load %arg3[%c4_164, %c0_165, %c0_166] : memref<9x128x128xbf16, #tpu.memory_space<vmem>>, vector<1x128x128xbf16>
      %187 = vector.shape_cast %186 : vector<1x128x128xbf16> to vector<128x128xbf16>
      %cst_167 = arith.constant dense<0.000000e+00> : vector<110x128xf32>
      %188 = tpu.matmul %185, %187, %cst_167 {dimension_numbers = #tpu.dot_dimension_numbers<[1], [0], [0], [1], [0, 0, 1, 1], [], []>} : vector<110x128xbf16>, vector<128x128xbf16>, vector<110x128xf32> -> vector<110x128xf32>
      %189 = arith.addf %184, %188 : vector<110x128xf32>
      %c130 = arith.constant 130 : index
      %c0_168 = arith.constant 0 : index
      %190 = vector.load %arg12[%c130, %c0_168] : memref<256x128xbf16, #tpu.memory_space<vmem>>, vector<110x128xbf16>
      %c5_169 = arith.constant 5 : index
      %c0_170 = arith.constant 0 : index
      %c0_171 = arith.constant 0 : index
      %191 = vector.load %arg3[%c5_169, %c0_170, %c0_171] : memref<9x128x128xbf16, #tpu.memory_space<vmem>>, vector<1x128x128xbf16>
      %192 = vector.shape_cast %191 : vector<1x128x128xbf16> to vector<128x128xbf16>
      %cst_172 = arith.constant dense<0.000000e+00> : vector<110x128xf32>
      %193 = tpu.matmul %190, %192, %cst_172 {dimension_numbers = #tpu.dot_dimension_numbers<[1], [0], [0], [1], [0, 0, 1, 1], [], []>} : vector<110x128xbf16>, vector<128x128xbf16>, vector<110x128xf32> -> vector<110x128xf32>
      %194 = arith.addf %189, %193 : vector<110x128xf32>
      %c144 = arith.constant 144 : index
      %c0_173 = arith.constant 0 : index
      %195 = vector.load %arg12[%c144, %c0_173] : memref<256x128xbf16, #tpu.memory_space<vmem>>, vector<110x128xbf16>
      %c6_174 = arith.constant 6 : index
      %c0_175 = arith.constant 0 : index
      %c0_176 = arith.constant 0 : index
      %196 = vector.load %arg3[%c6_174, %c0_175, %c0_176] : memref<9x128x128xbf16, #tpu.memory_space<vmem>>, vector<1x128x128xbf16>
      %197 = vector.shape_cast %196 : vector<1x128x128xbf16> to vector<128x128xbf16>
      %cst_177 = arith.constant dense<0.000000e+00> : vector<110x128xf32>
      %198 = tpu.matmul %195, %197, %cst_177 {dimension_numbers = #tpu.dot_dimension_numbers<[1], [0], [0], [1], [0, 0, 1, 1], [], []>} : vector<110x128xbf16>, vector<128x128xbf16>, vector<110x128xf32> -> vector<110x128xf32>
      %199 = arith.addf %194, %198 : vector<110x128xf32>
      %c145 = arith.constant 145 : index
      %c0_178 = arith.constant 0 : index
      %200 = vector.load %arg12[%c145, %c0_178] : memref<256x128xbf16, #tpu.memory_space<vmem>>, vector<110x128xbf16>
      %c7_179 = arith.constant 7 : index
      %c0_180 = arith.constant 0 : index
      %c0_181 = arith.constant 0 : index
      %201 = vector.load %arg3[%c7_179, %c0_180, %c0_181] : memref<9x128x128xbf16, #tpu.memory_space<vmem>>, vector<1x128x128xbf16>
      %202 = vector.shape_cast %201 : vector<1x128x128xbf16> to vector<128x128xbf16>
      %cst_182 = arith.constant dense<0.000000e+00> : vector<110x128xf32>
      %203 = tpu.matmul %200, %202, %cst_182 {dimension_numbers = #tpu.dot_dimension_numbers<[1], [0], [0], [1], [0, 0, 1, 1], [], []>} : vector<110x128xbf16>, vector<128x128xbf16>, vector<110x128xf32> -> vector<110x128xf32>
      %204 = arith.addf %199, %203 : vector<110x128xf32>
      %c146 = arith.constant 146 : index
      %c0_183 = arith.constant 0 : index
      %205 = vector.load %arg12[%c146, %c0_183] : memref<256x128xbf16, #tpu.memory_space<vmem>>, vector<110x128xbf16>
      %c8_184 = arith.constant 8 : index
      %c0_185 = arith.constant 0 : index
      %c0_186 = arith.constant 0 : index
      %206 = vector.load %arg3[%c8_184, %c0_185, %c0_186] : memref<9x128x128xbf16, #tpu.memory_space<vmem>>, vector<1x128x128xbf16>
      %207 = vector.shape_cast %206 : vector<1x128x128xbf16> to vector<128x128xbf16>
      %cst_187 = arith.constant dense<0.000000e+00> : vector<110x128xf32>
      %208 = tpu.matmul %205, %207, %cst_187 {dimension_numbers = #tpu.dot_dimension_numbers<[1], [0], [0], [1], [0, 0, 1, 1], [], []>} : vector<110x128xbf16>, vector<128x128xbf16>, vector<110x128xf32> -> vector<110x128xf32>
      %209 = arith.addf %204, %208 : vector<110x128xf32>
      %c112_188 = arith.constant 112 : index
      %c0_189 = arith.constant 0 : index
      %210 = vector.load %arg13[%c112_188, %c0_189] : memref<224x128xf32, #tpu.memory_space<vmem>>, vector<110x128xf32>
      tpu.vector_store %arg13[%c112_188, %c0_189], %209 {strides = array<i32>} : memref<224x128xf32, #tpu.memory_space<vmem>>, vector<110x128xf32>,
      %c0_190 = arith.constant 0 : index
      %c0_191 = arith.constant 0 : index
      %211 = tpu.strided_load %arg13[%c0_190, %c0_191] {strides = array<i32: 2, 1>} : memref<224x128xf32, #tpu.memory_space<vmem>>, vector<7x128xf32>
      %c1_192 = arith.constant 1 : index
      %c0_193 = arith.constant 0 : index
      %212 = tpu.strided_load %arg13[%c1_192, %c0_193] {strides = array<i32: 2, 1>} : memref<224x128xf32, #tpu.memory_space<vmem>>, vector<7x128xf32>
      %c16_194 = arith.constant 16 : index
      %c0_195 = arith.constant 0 : index
      %213 = tpu.strided_load %arg13[%c16_194, %c0_195] {strides = array<i32: 2, 1>} : memref<224x128xf32, #tpu.memory_space<vmem>>, vector<7x128xf32>
      %c17_196 = arith.constant 17 : index
      %c0_197 = arith.constant 0 : index
      %214 = tpu.strided_load %arg13[%c17_196, %c0_197] {strides = array<i32: 2, 1>} : memref<224x128xf32, #tpu.memory_space<vmem>>, vector<7x128xf32>
      %215 = arith.maximumf %211, %212 : vector<7x128xf32>
      %216 = arith.maximumf %213, %214 : vector<7x128xf32>
      %217 = arith.maximumf %215, %216 : vector<7x128xf32>
      %218 = vector.broadcast %7 : vector<1x128xf32> to vector<7x128xf32>
      %219 = arith.addf %217, %218 : vector<7x128xf32>
      %cst_198 = arith.constant 0.000000e+00 : f32
      %220 = vector.broadcast %cst_198 : f32 to vector<7x128xf32>
      %221 = arith.maximumf %219, %220 : vector<7x128xf32>
      %222 = arith.truncf %221 : vector<7x128xf32> to vector<7x128xbf16>
      %c10 = arith.constant 10 : index
      %c0_199 = arith.constant 0 : index
      %223 = vector.load %arg14[%c10, %c0_199] : memref<88x128xbf16, #tpu.memory_space<vmem>>, vector<7x128xbf16>
      tpu.vector_store %arg14[%c10, %c0_199], %222 {strides = array<i32>} : memref<88x128xbf16, #tpu.memory_space<vmem>>, vector<7x128xbf16>,
      %c32_200 = arith.constant 32 : index
      %c0_201 = arith.constant 0 : index
      %224 = tpu.strided_load %arg13[%c32_200, %c0_201] {strides = array<i32: 2, 1>} : memref<224x128xf32, #tpu.memory_space<vmem>>, vector<7x128xf32>
      %c33_202 = arith.constant 33 : index
      %c0_203 = arith.constant 0 : index
      %225 = tpu.strided_load %arg13[%c33_202, %c0_203] {strides = array<i32: 2, 1>} : memref<224x128xf32, #tpu.memory_space<vmem>>, vector<7x128xf32>
      %c48 = arith.constant 48 : index
      %c0_204 = arith.constant 0 : index
      %226 = tpu.strided_load %arg13[%c48, %c0_204] {strides = array<i32: 2, 1>} : memref<224x128xf32, #tpu.memory_space<vmem>>, vector<7x128xf32>
      %c49 = arith.constant 49 : index
      %c0_205 = arith.constant 0 : index
      %227 = tpu.strided_load %arg13[%c49, %c0_205] {strides = array<i32: 2, 1>} : memref<224x128xf32, #tpu.memory_space<vmem>>, vector<7x128xf32>
      %228 = arith.maximumf %224, %225 : vector<7x128xf32>
      %229 = arith.maximumf %226, %227 : vector<7x128xf32>
      %230 = arith.maximumf %228, %229 : vector<7x128xf32>
      %231 = vector.broadcast %7 : vector<1x128xf32> to vector<7x128xf32>
      %232 = arith.addf %230, %231 : vector<7x128xf32>
      %cst_206 = arith.constant 0.000000e+00 : f32
      %233 = vector.broadcast %cst_206 : f32 to vector<7x128xf32>
      %234 = arith.maximumf %232, %233 : vector<7x128xf32>
      %235 = arith.truncf %234 : vector<7x128xf32> to vector<7x128xbf16>
      %c19 = arith.constant 19 : index
      %c0_207 = arith.constant 0 : index
      %236 = vector.load %arg14[%c19, %c0_207] : memref<88x128xbf16, #tpu.memory_space<vmem>>, vector<7x128xbf16>
      tpu.vector_store %arg14[%c19, %c0_207], %235 {strides = array<i32>} : memref<88x128xbf16, #tpu.memory_space<vmem>>, vector<7x128xbf16>,
      %c64 = arith.constant 64 : index
      %c0_208 = arith.constant 0 : index
      %237 = tpu.strided_load %arg13[%c64, %c0_208] {strides = array<i32: 2, 1>} : memref<224x128xf32, #tpu.memory_space<vmem>>, vector<7x128xf32>
      %c65 = arith.constant 65 : index
      %c0_209 = arith.constant 0 : index
      %238 = tpu.strided_load %arg13[%c65, %c0_209] {strides = array<i32: 2, 1>} : memref<224x128xf32, #tpu.memory_space<vmem>>, vector<7x128xf32>
      %c80 = arith.constant 80 : index
      %c0_210 = arith.constant 0 : index
      %239 = tpu.strided_load %arg13[%c80, %c0_210] {strides = array<i32: 2, 1>} : memref<224x128xf32, #tpu.memory_space<vmem>>, vector<7x128xf32>
      %c81 = arith.constant 81 : index
      %c0_211 = arith.constant 0 : index
      %240 = tpu.strided_load %arg13[%c81, %c0_211] {strides = array<i32: 2, 1>} : memref<224x128xf32, #tpu.memory_space<vmem>>, vector<7x128xf32>
      %241 = arith.maximumf %237, %238 : vector<7x128xf32>
      %242 = arith.maximumf %239, %240 : vector<7x128xf32>
      %243 = arith.maximumf %241, %242 : vector<7x128xf32>
      %244 = vector.broadcast %7 : vector<1x128xf32> to vector<7x128xf32>
      %245 = arith.addf %243, %244 : vector<7x128xf32>
      %cst_212 = arith.constant 0.000000e+00 : f32
      %246 = vector.broadcast %cst_212 : f32 to vector<7x128xf32>
      %247 = arith.maximumf %245, %246 : vector<7x128xf32>
      %248 = arith.truncf %247 : vector<7x128xf32> to vector<7x128xbf16>
      %c28 = arith.constant 28 : index
      %c0_213 = arith.constant 0 : index
      %249 = vector.load %arg14[%c28, %c0_213] : memref<88x128xbf16, #tpu.memory_space<vmem>>, vector<7x128xbf16>
      tpu.vector_store %arg14[%c28, %c0_213], %248 {strides = array<i32>} : memref<88x128xbf16, #tpu.memory_space<vmem>>, vector<7x128xbf16>,
      %c96 = arith.constant 96 : index
      %c0_214 = arith.constant 0 : index
      %250 = tpu.strided_load %arg13[%c96, %c0_214] {strides = array<i32: 2, 1>} : memref<224x128xf32, #tpu.memory_space<vmem>>, vector<7x128xf32>
      %c97 = arith.constant 97 : index
      %c0_215 = arith.constant 0 : index
      %251 = tpu.strided_load %arg13[%c97, %c0_215] {strides = array<i32: 2, 1>} : memref<224x128xf32, #tpu.memory_space<vmem>>, vector<7x128xf32>
      %c112_216 = arith.constant 112 : index
      %c0_217 = arith.constant 0 : index
      %252 = tpu.strided_load %arg13[%c112_216, %c0_217] {strides = array<i32: 2, 1>} : memref<224x128xf32, #tpu.memory_space<vmem>>, vector<7x128xf32>
      %c113_218 = arith.constant 113 : index
      %c0_219 = arith.constant 0 : index
      %253 = tpu.strided_load %arg13[%c113_218, %c0_219] {strides = array<i32: 2, 1>} : memref<224x128xf32, #tpu.memory_space<vmem>>, vector<7x128xf32>
      %254 = arith.maximumf %250, %251 : vector<7x128xf32>
      %255 = arith.maximumf %252, %253 : vector<7x128xf32>
      %256 = arith.maximumf %254, %255 : vector<7x128xf32>
      %257 = vector.broadcast %7 : vector<1x128xf32> to vector<7x128xf32>
      %258 = arith.addf %256, %257 : vector<7x128xf32>
      %cst_220 = arith.constant 0.000000e+00 : f32
      %259 = vector.broadcast %cst_220 : f32 to vector<7x128xf32>
      %260 = arith.maximumf %258, %259 : vector<7x128xf32>
      %261 = arith.truncf %260 : vector<7x128xf32> to vector<7x128xbf16>
      %c37 = arith.constant 37 : index
      %c0_221 = arith.constant 0 : index
      %262 = vector.load %arg14[%c37, %c0_221] : memref<88x128xbf16, #tpu.memory_space<vmem>>, vector<7x128xbf16>
      tpu.vector_store %arg14[%c37, %c0_221], %261 {strides = array<i32>} : memref<88x128xbf16, #tpu.memory_space<vmem>>, vector<7x128xbf16>,
      %c128_222 = arith.constant 128 : index
      %c0_223 = arith.constant 0 : index
      %263 = tpu.strided_load %arg13[%c128_222, %c0_223] {strides = array<i32: 2, 1>} : memref<224x128xf32, #tpu.memory_space<vmem>>, vector<7x128xf32>
      %c129_224 = arith.constant 129 : index
      %c0_225 = arith.constant 0 : index
      %264 = tpu.strided_load %arg13[%c129_224, %c0_225] {strides = array<i32: 2, 1>} : memref<224x128xf32, #tpu.memory_space<vmem>>, vector<7x128xf32>
      %c144_226 = arith.constant 144 : index
      %c0_227 = arith.constant 0 : index
      %265 = tpu.strided_load %arg13[%c144_226, %c0_227] {strides = array<i32: 2, 1>} : memref<224x128xf32, #tpu.memory_space<vmem>>, vector<7x128xf32>
      %c145_228 = arith.constant 145 : index
      %c0_229 = arith.constant 0 : index
      %266 = tpu.strided_load %arg13[%c145_228, %c0_229] {strides = array<i32: 2, 1>} : memref<224x128xf32, #tpu.memory_space<vmem>>, vector<7x128xf32>
      %267 = arith.maximumf %263, %264 : vector<7x128xf32>
      %268 = arith.maximumf %265, %266 : vector<7x128xf32>
      %269 = arith.maximumf %267, %268 : vector<7x128xf32>
      %270 = vector.broadcast %7 : vector<1x128xf32> to vector<7x128xf32>
      %271 = arith.addf %269, %270 : vector<7x128xf32>
      %cst_230 = arith.constant 0.000000e+00 : f32
      %272 = vector.broadcast %cst_230 : f32 to vector<7x128xf32>
      %273 = arith.maximumf %271, %272 : vector<7x128xf32>
      %274 = arith.truncf %273 : vector<7x128xf32> to vector<7x128xbf16>
      %c46 = arith.constant 46 : index
      %c0_231 = arith.constant 0 : index
      %275 = vector.load %arg14[%c46, %c0_231] : memref<88x128xbf16, #tpu.memory_space<vmem>>, vector<7x128xbf16>
      tpu.vector_store %arg14[%c46, %c0_231], %274 {strides = array<i32>} : memref<88x128xbf16, #tpu.memory_space<vmem>>, vector<7x128xbf16>,
      %c160 = arith.constant 160 : index
      %c0_232 = arith.constant 0 : index
      %276 = tpu.strided_load %arg13[%c160, %c0_232] {strides = array<i32: 2, 1>} : memref<224x128xf32, #tpu.memory_space<vmem>>, vector<7x128xf32>
      %c161 = arith.constant 161 : index
      %c0_233 = arith.constant 0 : index
      %277 = tpu.strided_load %arg13[%c161, %c0_233] {strides = array<i32: 2, 1>} : memref<224x128xf32, #tpu.memory_space<vmem>>, vector<7x128xf32>
      %c176 = arith.constant 176 : index
      %c0_234 = arith.constant 0 : index
      %278 = tpu.strided_load %arg13[%c176, %c0_234] {strides = array<i32: 2, 1>} : memref<224x128xf32, #tpu.memory_space<vmem>>, vector<7x128xf32>
      %c177 = arith.constant 177 : index
      %c0_235 = arith.constant 0 : index
      %279 = tpu.strided_load %arg13[%c177, %c0_235] {strides = array<i32: 2, 1>} : memref<224x128xf32, #tpu.memory_space<vmem>>, vector<7x128xf32>
      %280 = arith.maximumf %276, %277 : vector<7x128xf32>
      %281 = arith.maximumf %278, %279 : vector<7x128xf32>
      %282 = arith.maximumf %280, %281 : vector<7x128xf32>
      %283 = vector.broadcast %7 : vector<1x128xf32> to vector<7x128xf32>
      %284 = arith.addf %282, %283 : vector<7x128xf32>
      %cst_236 = arith.constant 0.000000e+00 : f32
      %285 = vector.broadcast %cst_236 : f32 to vector<7x128xf32>
      %286 = arith.maximumf %284, %285 : vector<7x128xf32>
      %287 = arith.truncf %286 : vector<7x128xf32> to vector<7x128xbf16>
      %c55 = arith.constant 55 : index
      %c0_237 = arith.constant 0 : index
      %288 = vector.load %arg14[%c55, %c0_237] : memref<88x128xbf16, #tpu.memory_space<vmem>>, vector<7x128xbf16>
      tpu.vector_store %arg14[%c55, %c0_237], %287 {strides = array<i32>} : memref<88x128xbf16, #tpu.memory_space<vmem>>, vector<7x128xbf16>,
      %c192 = arith.constant 192 : index
      %c0_238 = arith.constant 0 : index
      %289 = tpu.strided_load %arg13[%c192, %c0_238] {strides = array<i32: 2, 1>} : memref<224x128xf32, #tpu.memory_space<vmem>>, vector<7x128xf32>
      %c193 = arith.constant 193 : index
      %c0_239 = arith.constant 0 : index
      %290 = tpu.strided_load %arg13[%c193, %c0_239] {strides = array<i32: 2, 1>} : memref<224x128xf32, #tpu.memory_space<vmem>>, vector<7x128xf32>
      %c208 = arith.constant 208 : index
      %c0_240 = arith.constant 0 : index
      %291 = tpu.strided_load %arg13[%c208, %c0_240] {strides = array<i32: 2, 1>} : memref<224x128xf32, #tpu.memory_space<vmem>>, vector<7x128xf32>
      %c209 = arith.constant 209 : index
      %c0_241 = arith.constant 0 : index
      %292 = tpu.strided_load %arg13[%c209, %c0_241] {strides = array<i32: 2, 1>} : memref<224x128xf32, #tpu.memory_space<vmem>>, vector<7x128xf32>
      %293 = arith.maximumf %289, %290 : vector<7x128xf32>
      %294 = arith.maximumf %291, %292 : vector<7x128xf32>
      %295 = arith.maximumf %293, %294 : vector<7x128xf32>
      %296 = vector.broadcast %7 : vector<1x128xf32> to vector<7x128xf32>
      %297 = arith.addf %295, %296 : vector<7x128xf32>
      %cst_242 = arith.constant 0.000000e+00 : f32
      %298 = vector.broadcast %cst_242 : f32 to vector<7x128xf32>
      %299 = arith.maximumf %297, %298 : vector<7x128xf32>
      %300 = arith.truncf %299 : vector<7x128xf32> to vector<7x128xbf16>
      %c64_243 = arith.constant 64 : index
      %c0_244 = arith.constant 0 : index
      %301 = vector.load %arg14[%c64_243, %c0_244] : memref<88x128xbf16, #tpu.memory_space<vmem>>, vector<7x128xbf16>
      tpu.vector_store %arg14[%c64_243, %c0_244], %300 {strides = array<i32>} : memref<88x128xbf16, #tpu.memory_space<vmem>>, vector<7x128xbf16>,
      %c0_245 = arith.constant 0 : index
      %c0_246 = arith.constant 0 : index
      %302 = vector.load %arg14[%c0_245, %c0_246] : memref<88x128xbf16, #tpu.memory_space<vmem>>, vector<61x128xbf16>
      %c0_247 = arith.constant 0 : index
      %c0_248 = arith.constant 0 : index
      %c0_249 = arith.constant 0 : index
      %303 = vector.load %arg5[%c0_247, %c0_248, %c0_249] : memref<9x128x128xbf16, #tpu.memory_space<vmem>>, vector<1x128x128xbf16>
      %304 = vector.shape_cast %303 : vector<1x128x128xbf16> to vector<128x128xbf16>
      %cst_250 = arith.constant dense<0.000000e+00> : vector<61x128xf32>
      %305 = tpu.matmul %302, %304, %cst_250 {dimension_numbers = #tpu.dot_dimension_numbers<[1], [0], [0], [1], [0, 0, 1, 1], [], []>} : vector<61x128xbf16>, vector<128x128xbf16>, vector<61x128xf32> -> vector<61x128xf32>
      %c1_251 = arith.constant 1 : index
      %c0_252 = arith.constant 0 : index
      %306 = vector.load %arg14[%c1_251, %c0_252] : memref<88x128xbf16, #tpu.memory_space<vmem>>, vector<61x128xbf16>
      %c1_253 = arith.constant 1 : index
      %c0_254 = arith.constant 0 : index
      %c0_255 = arith.constant 0 : index
      %307 = vector.load %arg5[%c1_253, %c0_254, %c0_255] : memref<9x128x128xbf16, #tpu.memory_space<vmem>>, vector<1x128x128xbf16>
      %308 = vector.shape_cast %307 : vector<1x128x128xbf16> to vector<128x128xbf16>
      %cst_256 = arith.constant dense<0.000000e+00> : vector<61x128xf32>
      %309 = tpu.matmul %306, %308, %cst_256 {dimension_numbers = #tpu.dot_dimension_numbers<[1], [0], [0], [1], [0, 0, 1, 1], [], []>} : vector<61x128xbf16>, vector<128x128xbf16>, vector<61x128xf32> -> vector<61x128xf32>
      %310 = arith.addf %305, %309 : vector<61x128xf32>
      %c2_257 = arith.constant 2 : index
      %c0_258 = arith.constant 0 : index
      %311 = vector.load %arg14[%c2_257, %c0_258] : memref<88x128xbf16, #tpu.memory_space<vmem>>, vector<61x128xbf16>
      %c2_259 = arith.constant 2 : index
      %c0_260 = arith.constant 0 : index
      %c0_261 = arith.constant 0 : index
      %312 = vector.load %arg5[%c2_259, %c0_260, %c0_261] : memref<9x128x128xbf16, #tpu.memory_space<vmem>>, vector<1x128x128xbf16>
      %313 = vector.shape_cast %312 : vector<1x128x128xbf16> to vector<128x128xbf16>
      %cst_262 = arith.constant dense<0.000000e+00> : vector<61x128xf32>
      %314 = tpu.matmul %311, %313, %cst_262 {dimension_numbers = #tpu.dot_dimension_numbers<[1], [0], [0], [1], [0, 0, 1, 1], [], []>} : vector<61x128xbf16>, vector<128x128xbf16>, vector<61x128xf32> -> vector<61x128xf32>
      %315 = arith.addf %310, %314 : vector<61x128xf32>
      %c9 = arith.constant 9 : index
      %c0_263 = arith.constant 0 : index
      %316 = vector.load %arg14[%c9, %c0_263] : memref<88x128xbf16, #tpu.memory_space<vmem>>, vector<61x128xbf16>
      %c3_264 = arith.constant 3 : index
      %c0_265 = arith.constant 0 : index
      %c0_266 = arith.constant 0 : index
      %317 = vector.load %arg5[%c3_264, %c0_265, %c0_266] : memref<9x128x128xbf16, #tpu.memory_space<vmem>>, vector<1x128x128xbf16>
      %318 = vector.shape_cast %317 : vector<1x128x128xbf16> to vector<128x128xbf16>
      %cst_267 = arith.constant dense<0.000000e+00> : vector<61x128xf32>
      %319 = tpu.matmul %316, %318, %cst_267 {dimension_numbers = #tpu.dot_dimension_numbers<[1], [0], [0], [1], [0, 0, 1, 1], [], []>} : vector<61x128xbf16>, vector<128x128xbf16>, vector<61x128xf32> -> vector<61x128xf32>
      %320 = arith.addf %315, %319 : vector<61x128xf32>
      %c10_268 = arith.constant 10 : index
      %c0_269 = arith.constant 0 : index
      %321 = vector.load %arg14[%c10_268, %c0_269] : memref<88x128xbf16, #tpu.memory_space<vmem>>, vector<61x128xbf16>
      %c4_270 = arith.constant 4 : index
      %c0_271 = arith.constant 0 : index
      %c0_272 = arith.constant 0 : index
      %322 = vector.load %arg5[%c4_270, %c0_271, %c0_272] : memref<9x128x128xbf16, #tpu.memory_space<vmem>>, vector<1x128x128xbf16>
      %323 = vector.shape_cast %322 : vector<1x128x128xbf16> to vector<128x128xbf16>
      %cst_273 = arith.constant dense<0.000000e+00> : vector<61x128xf32>
      %324 = tpu.matmul %321, %323, %cst_273 {dimension_numbers = #tpu.dot_dimension_numbers<[1], [0], [0], [1], [0, 0, 1, 1], [], []>} : vector<61x128xbf16>, vector<128x128xbf16>, vector<61x128xf32> -> vector<61x128xf32>
      %325 = arith.addf %320, %324 : vector<61x128xf32>
      %c11 = arith.constant 11 : index
      %c0_274 = arith.constant 0 : index
      %326 = vector.load %arg14[%c11, %c0_274] : memref<88x128xbf16, #tpu.memory_space<vmem>>, vector<61x128xbf16>
      %c5_275 = arith.constant 5 : index
      %c0_276 = arith.constant 0 : index
      %c0_277 = arith.constant 0 : index
      %327 = vector.load %arg5[%c5_275, %c0_276, %c0_277] : memref<9x128x128xbf16, #tpu.memory_space<vmem>>, vector<1x128x128xbf16>
      %328 = vector.shape_cast %327 : vector<1x128x128xbf16> to vector<128x128xbf16>
      %cst_278 = arith.constant dense<0.000000e+00> : vector<61x128xf32>
      %329 = tpu.matmul %326, %328, %cst_278 {dimension_numbers = #tpu.dot_dimension_numbers<[1], [0], [0], [1], [0, 0, 1, 1], [], []>} : vector<61x128xbf16>, vector<128x128xbf16>, vector<61x128xf32> -> vector<61x128xf32>
      %330 = arith.addf %325, %329 : vector<61x128xf32>
      %c18_279 = arith.constant 18 : index
      %c0_280 = arith.constant 0 : index
      %331 = vector.load %arg14[%c18_279, %c0_280] : memref<88x128xbf16, #tpu.memory_space<vmem>>, vector<61x128xbf16>
      %c6_281 = arith.constant 6 : index
      %c0_282 = arith.constant 0 : index
      %c0_283 = arith.constant 0 : index
      %332 = vector.load %arg5[%c6_281, %c0_282, %c0_283] : memref<9x128x128xbf16, #tpu.memory_space<vmem>>, vector<1x128x128xbf16>
      %333 = vector.shape_cast %332 : vector<1x128x128xbf16> to vector<128x128xbf16>
      %cst_284 = arith.constant dense<0.000000e+00> : vector<61x128xf32>
      %334 = tpu.matmul %331, %333, %cst_284 {dimension_numbers = #tpu.dot_dimension_numbers<[1], [0], [0], [1], [0, 0, 1, 1], [], []>} : vector<61x128xbf16>, vector<128x128xbf16>, vector<61x128xf32> -> vector<61x128xf32>
      %335 = arith.addf %330, %334 : vector<61x128xf32>
      %c19_285 = arith.constant 19 : index
      %c0_286 = arith.constant 0 : index
      %336 = vector.load %arg14[%c19_285, %c0_286] : memref<88x128xbf16, #tpu.memory_space<vmem>>, vector<61x128xbf16>
      %c7_287 = arith.constant 7 : index
      %c0_288 = arith.constant 0 : index
      %c0_289 = arith.constant 0 : index
      %337 = vector.load %arg5[%c7_287, %c0_288, %c0_289] : memref<9x128x128xbf16, #tpu.memory_space<vmem>>, vector<1x128x128xbf16>
      %338 = vector.shape_cast %337 : vector<1x128x128xbf16> to vector<128x128xbf16>
      %cst_290 = arith.constant dense<0.000000e+00> : vector<61x128xf32>
      %339 = tpu.matmul %336, %338, %cst_290 {dimension_numbers = #tpu.dot_dimension_numbers<[1], [0], [0], [1], [0, 0, 1, 1], [], []>} : vector<61x128xbf16>, vector<128x128xbf16>, vector<61x128xf32> -> vector<61x128xf32>
      %340 = arith.addf %335, %339 : vector<61x128xf32>
      %c20 = arith.constant 20 : index
      %c0_291 = arith.constant 0 : index
      %341 = vector.load %arg14[%c20, %c0_291] : memref<88x128xbf16, #tpu.memory_space<vmem>>, vector<61x128xbf16>
      %c8_292 = arith.constant 8 : index
      %c0_293 = arith.constant 0 : index
      %c0_294 = arith.constant 0 : index
      %342 = vector.load %arg5[%c8_292, %c0_293, %c0_294] : memref<9x128x128xbf16, #tpu.memory_space<vmem>>, vector<1x128x128xbf16>
      %343 = vector.shape_cast %342 : vector<1x128x128xbf16> to vector<128x128xbf16>
      %cst_295 = arith.constant dense<0.000000e+00> : vector<61x128xf32>
      %344 = tpu.matmul %341, %343, %cst_295 {dimension_numbers = #tpu.dot_dimension_numbers<[1], [0], [0], [1], [0, 0, 1, 1], [], []>} : vector<61x128xbf16>, vector<128x128xbf16>, vector<61x128xf32> -> vector<61x128xf32>
      %345 = arith.addf %340, %344 : vector<61x128xf32>
      %c0_296 = arith.constant 0 : index
      %c0_297 = arith.constant 0 : index
      %346 = vector.load %arg15[%c0_296, %c0_297] : memref<64x128xf32, #tpu.memory_space<vmem>>, vector<61x128xf32>
      tpu.vector_store %arg15[%c0_296, %c0_297], %345 {strides = array<i32>} : memref<64x128xf32, #tpu.memory_space<vmem>>, vector<61x128xf32>,
      %c16_i32 = arith.constant 16 : i32
      %347 = arith.muli %arg17, %c16_i32 : i32
      %348 = tpu.assume_multiple %347, 8 : i32
      %c0_298 = arith.constant 0 : index
      %c0_299 = arith.constant 0 : index
      %349 = tpu.strided_load %arg15[%c0_298, %c0_299] {strides = array<i32: 2, 1>} : memref<64x128xf32, #tpu.memory_space<vmem>>, vector<3x128xf32>
      %c1_300 = arith.constant 1 : index
      %c0_301 = arith.constant 0 : index
      %350 = tpu.strided_load %arg15[%c1_300, %c0_301] {strides = array<i32: 2, 1>} : memref<64x128xf32, #tpu.memory_space<vmem>>, vector<3x128xf32>
      %c9_302 = arith.constant 9 : index
      %c0_303 = arith.constant 0 : index
      %351 = tpu.strided_load %arg15[%c9_302, %c0_303] {strides = array<i32: 2, 1>} : memref<64x128xf32, #tpu.memory_space<vmem>>, vector<3x128xf32>
      %c10_304 = arith.constant 10 : index
      %c0_305 = arith.constant 0 : index
      %352 = tpu.strided_load %arg15[%c10_304, %c0_305] {strides = array<i32: 2, 1>} : memref<64x128xf32, #tpu.memory_space<vmem>>, vector<3x128xf32>
      %353 = arith.maximumf %349, %350 : vector<3x128xf32>
      %354 = arith.maximumf %351, %352 : vector<3x128xf32>
      %355 = arith.maximumf %353, %354 : vector<3x128xf32>
      %356 = vector.broadcast %8 : vector<1x128xf32> to vector<3x128xf32>
      %357 = arith.addf %355, %356 : vector<3x128xf32>
      %cst_306 = arith.constant 0.000000e+00 : f32
      %358 = vector.broadcast %cst_306 : f32 to vector<3x128xf32>
      %359 = arith.maximumf %357, %358 : vector<3x128xf32>
      %c0_i32_307 = arith.constant 0 : i32
      %360 = arith.addi %348, %c0_i32_307 : i32
      %361 = arith.index_cast %360 : i32 to index
      %c0_308 = arith.constant 0 : index
      %362 = vector.load %arg16[%361, %c0_308] : memref<128x128xf32, #tpu.memory_space<vmem>>, vector<3x128xf32>
      tpu.vector_store %arg16[%361, %c0_308], %359 {strides = array<i32>} : memref<128x128xf32, #tpu.memory_space<vmem>>, vector<3x128xf32>,
      %c18_309 = arith.constant 18 : index
      %c0_310 = arith.constant 0 : index
      %363 = tpu.strided_load %arg15[%c18_309, %c0_310] {strides = array<i32: 2, 1>} : memref<64x128xf32, #tpu.memory_space<vmem>>, vector<3x128xf32>
      %c19_311 = arith.constant 19 : index
      %c0_312 = arith.constant 0 : index
      %364 = tpu.strided_load %arg15[%c19_311, %c0_312] {strides = array<i32: 2, 1>} : memref<64x128xf32, #tpu.memory_space<vmem>>, vector<3x128xf32>
      %c27 = arith.constant 27 : index
      %c0_313 = arith.constant 0 : index
      %365 = tpu.strided_load %arg15[%c27, %c0_313] {strides = array<i32: 2, 1>} : memref<64x128xf32, #tpu.memory_space<vmem>>, vector<3x128xf32>
      %c28_314 = arith.constant 28 : index
      %c0_315 = arith.constant 0 : index
      %366 = tpu.strided_load %arg15[%c28_314, %c0_315] {strides = array<i32: 2, 1>} : memref<64x128xf32, #tpu.memory_space<vmem>>, vector<3x128xf32>
      %367 = arith.maximumf %363, %364 : vector<3x128xf32>
      %368 = arith.maximumf %365, %366 : vector<3x128xf32>
      %369 = arith.maximumf %367, %368 : vector<3x128xf32>
      %370 = vector.broadcast %8 : vector<1x128xf32> to vector<3x128xf32>
      %371 = arith.addf %369, %370 : vector<3x128xf32>
      %cst_316 = arith.constant 0.000000e+00 : f32
      %372 = vector.broadcast %cst_316 : f32 to vector<3x128xf32>
      %373 = arith.maximumf %371, %372 : vector<3x128xf32>
      %c3_i32 = arith.constant 3 : i32
      %374 = arith.addi %348, %c3_i32 : i32
      %375 = arith.index_cast %374 : i32 to index
      %c0_317 = arith.constant 0 : index
      %376 = vector.load %arg16[%375, %c0_317] : memref<128x128xf32, #tpu.memory_space<vmem>>, vector<3x128xf32>
      tpu.vector_store %arg16[%375, %c0_317], %373 {strides = array<i32>} : memref<128x128xf32, #tpu.memory_space<vmem>>, vector<3x128xf32>,
      %c36 = arith.constant 36 : index
      %c0_318 = arith.constant 0 : index
      %377 = tpu.strided_load %arg15[%c36, %c0_318] {strides = array<i32: 2, 1>} : memref<64x128xf32, #tpu.memory_space<vmem>>, vector<3x128xf32>
      %c37_319 = arith.constant 37 : index
      %c0_320 = arith.constant 0 : index
      %378 = tpu.strided_load %arg15[%c37_319, %c0_320] {strides = array<i32: 2, 1>} : memref<64x128xf32, #tpu.memory_space<vmem>>, vector<3x128xf32>
      %c45 = arith.constant 45 : index
      %c0_321 = arith.constant 0 : index
      %379 = tpu.strided_load %arg15[%c45, %c0_321] {strides = array<i32: 2, 1>} : memref<64x128xf32, #tpu.memory_space<vmem>>, vector<3x128xf32>
      %c46_322 = arith.constant 46 : index
      %c0_323 = arith.constant 0 : index
      %380 = tpu.strided_load %arg15[%c46_322, %c0_323] {strides = array<i32: 2, 1>} : memref<64x128xf32, #tpu.memory_space<vmem>>, vector<3x128xf32>
      %381 = arith.maximumf %377, %378 : vector<3x128xf32>
      %382 = arith.maximumf %379, %380 : vector<3x128xf32>
      %383 = arith.maximumf %381, %382 : vector<3x128xf32>
      %384 = vector.broadcast %8 : vector<1x128xf32> to vector<3x128xf32>
      %385 = arith.addf %383, %384 : vector<3x128xf32>
      %cst_324 = arith.constant 0.000000e+00 : f32
      %386 = vector.broadcast %cst_324 : f32 to vector<3x128xf32>
      %387 = arith.maximumf %385, %386 : vector<3x128xf32>
      %c6_i32 = arith.constant 6 : i32
      %388 = arith.addi %348, %c6_i32 : i32
      %389 = arith.index_cast %388 : i32 to index
      %c0_325 = arith.constant 0 : index
      %390 = vector.load %arg16[%389, %c0_325] : memref<128x128xf32, #tpu.memory_space<vmem>>, vector<3x128xf32>
      tpu.vector_store %arg16[%389, %c0_325], %387 {strides = array<i32>} : memref<128x128xf32, #tpu.memory_space<vmem>>, vector<3x128xf32>,
    }
    %c8_i32_12 = arith.constant 8 : i32
    %c0_13 = arith.constant 0 : index
    %c0_14 = arith.constant 0 : index
    %10 = tpu.strided_load %arg16[%c0_13, %c0_14] {strides = array<i32: 16, 1>} : memref<128x128xf32, #tpu.memory_space<vmem>>, vector<8x128xf32>
    %11 = arith.truncf %10 : vector<8x128xf32> to vector<8x128xbf16>
    %c0_15 = arith.constant 0 : index
    %c0_16 = arith.constant 0 : index
    %c0_17 = arith.constant 0 : index
    %12 = vector.load %arg7[%c0_15, %c0_16, %c0_17] : memref<9x128x256xbf16, #tpu.memory_space<vmem>>, vector<1x128x256xbf16>
    %13 = vector.shape_cast %12 : vector<1x128x256xbf16> to vector<128x256xbf16>
    %cst_18 = arith.constant dense<0.000000e+00> : vector<8x256xf32>
    %14 = tpu.matmul %11, %13, %cst_18 {dimension_numbers = #tpu.dot_dimension_numbers<[1], [0], [0], [1], [0, 0, 1, 1], [], []>} : vector<8x128xbf16>, vector<128x256xbf16>, vector<8x256xf32> -> vector<8x256xf32>
    %c1 = arith.constant 1 : index
    %c0_19 = arith.constant 0 : index
    %15 = tpu.strided_load %arg16[%c1, %c0_19] {strides = array<i32: 16, 1>} : memref<128x128xf32, #tpu.memory_space<vmem>>, vector<8x128xf32>
    %16 = arith.truncf %15 : vector<8x128xf32> to vector<8x128xbf16>
    %c1_20 = arith.constant 1 : index
    %c0_21 = arith.constant 0 : index
    %c0_22 = arith.constant 0 : index
    %17 = vector.load %arg7[%c1_20, %c0_21, %c0_22] : memref<9x128x256xbf16, #tpu.memory_space<vmem>>, vector<1x128x256xbf16>
    %18 = vector.shape_cast %17 : vector<1x128x256xbf16> to vector<128x256xbf16>
    %cst_23 = arith.constant dense<0.000000e+00> : vector<8x256xf32>
    %19 = tpu.matmul %16, %18, %cst_23 {dimension_numbers = #tpu.dot_dimension_numbers<[1], [0], [0], [1], [0, 0, 1, 1], [], []>} : vector<8x128xbf16>, vector<128x256xbf16>, vector<8x256xf32> -> vector<8x256xf32>
    %20 = arith.addf %14, %19 : vector<8x256xf32>
    %c2 = arith.constant 2 : index
    %c0_24 = arith.constant 0 : index
    %21 = tpu.strided_load %arg16[%c2, %c0_24] {strides = array<i32: 16, 1>} : memref<128x128xf32, #tpu.memory_space<vmem>>, vector<8x128xf32>
    %22 = arith.truncf %21 : vector<8x128xf32> to vector<8x128xbf16>
    %c2_25 = arith.constant 2 : index
    %c0_26 = arith.constant 0 : index
    %c0_27 = arith.constant 0 : index
    %23 = vector.load %arg7[%c2_25, %c0_26, %c0_27] : memref<9x128x256xbf16, #tpu.memory_space<vmem>>, vector<1x128x256xbf16>
    %24 = vector.shape_cast %23 : vector<1x128x256xbf16> to vector<128x256xbf16>
    %cst_28 = arith.constant dense<0.000000e+00> : vector<8x256xf32>
    %25 = tpu.matmul %22, %24, %cst_28 {dimension_numbers = #tpu.dot_dimension_numbers<[1], [0], [0], [1], [0, 0, 1, 1], [], []>} : vector<8x128xbf16>, vector<128x256xbf16>, vector<8x256xf32> -> vector<8x256xf32>
    %26 = arith.addf %20, %25 : vector<8x256xf32>
    %c3 = arith.constant 3 : index
    %c0_29 = arith.constant 0 : index
    %27 = tpu.strided_load %arg16[%c3, %c0_29] {strides = array<i32: 16, 1>} : memref<128x128xf32, #tpu.memory_space<vmem>>, vector<8x128xf32>
    %28 = arith.truncf %27 : vector<8x128xf32> to vector<8x128xbf16>
    %c3_30 = arith.constant 3 : index
    %c0_31 = arith.constant 0 : index
    %c0_32 = arith.constant 0 : index
    %29 = vector.load %arg7[%c3_30, %c0_31, %c0_32] : memref<9x128x256xbf16, #tpu.memory_space<vmem>>, vector<1x128x256xbf16>
    %30 = vector.shape_cast %29 : vector<1x128x256xbf16> to vector<128x256xbf16>
    %cst_33 = arith.constant dense<0.000000e+00> : vector<8x256xf32>
    %31 = tpu.matmul %28, %30, %cst_33 {dimension_numbers = #tpu.dot_dimension_numbers<[1], [0], [0], [1], [0, 0, 1, 1], [], []>} : vector<8x128xbf16>, vector<128x256xbf16>, vector<8x256xf32> -> vector<8x256xf32>
    %32 = arith.addf %26, %31 : vector<8x256xf32>
    %c4 = arith.constant 4 : index
    %c0_34 = arith.constant 0 : index
    %33 = tpu.strided_load %arg16[%c4, %c0_34] {strides = array<i32: 16, 1>} : memref<128x128xf32, #tpu.memory_space<vmem>>, vector<8x128xf32>
    %34 = arith.truncf %33 : vector<8x128xf32> to vector<8x128xbf16>
    %c4_35 = arith.constant 4 : index
    %c0_36 = arith.constant 0 : index
    %c0_37 = arith.constant 0 : index
    %35 = vector.load %arg7[%c4_35, %c0_36, %c0_37] : memref<9x128x256xbf16, #tpu.memory_space<vmem>>, vector<1x128x256xbf16>
    %36 = vector.shape_cast %35 : vector<1x128x256xbf16> to vector<128x256xbf16>
    %cst_38 = arith.constant dense<0.000000e+00> : vector<8x256xf32>
    %37 = tpu.matmul %34, %36, %cst_38 {dimension_numbers = #tpu.dot_dimension_numbers<[1], [0], [0], [1], [0, 0, 1, 1], [], []>} : vector<8x128xbf16>, vector<128x256xbf16>, vector<8x256xf32> -> vector<8x256xf32>
    %38 = arith.addf %32, %37 : vector<8x256xf32>
    %c5 = arith.constant 5 : index
    %c0_39 = arith.constant 0 : index
    %39 = tpu.strided_load %arg16[%c5, %c0_39] {strides = array<i32: 16, 1>} : memref<128x128xf32, #tpu.memory_space<vmem>>, vector<8x128xf32>
    %40 = arith.truncf %39 : vector<8x128xf32> to vector<8x128xbf16>
    %c5_40 = arith.constant 5 : index
    %c0_41 = arith.constant 0 : index
    %c0_42 = arith.constant 0 : index
    %41 = vector.load %arg7[%c5_40, %c0_41, %c0_42] : memref<9x128x256xbf16, #tpu.memory_space<vmem>>, vector<1x128x256xbf16>
    %42 = vector.shape_cast %41 : vector<1x128x256xbf16> to vector<128x256xbf16>
    %cst_43 = arith.constant dense<0.000000e+00> : vector<8x256xf32>
    %43 = tpu.matmul %40, %42, %cst_43 {dimension_numbers = #tpu.dot_dimension_numbers<[1], [0], [0], [1], [0, 0, 1, 1], [], []>} : vector<8x128xbf16>, vector<128x256xbf16>, vector<8x256xf32> -> vector<8x256xf32>
    %44 = arith.addf %38, %43 : vector<8x256xf32>
    %c6 = arith.constant 6 : index
    %c0_44 = arith.constant 0 : index
    %45 = tpu.strided_load %arg16[%c6, %c0_44] {strides = array<i32: 16, 1>} : memref<128x128xf32, #tpu.memory_space<vmem>>, vector<8x128xf32>
    %46 = arith.truncf %45 : vector<8x128xf32> to vector<8x128xbf16>
    %c6_45 = arith.constant 6 : index
    %c0_46 = arith.constant 0 : index
    %c0_47 = arith.constant 0 : index
    %47 = vector.load %arg7[%c6_45, %c0_46, %c0_47] : memref<9x128x256xbf16, #tpu.memory_space<vmem>>, vector<1x128x256xbf16>
    %48 = vector.shape_cast %47 : vector<1x128x256xbf16> to vector<128x256xbf16>
    %cst_48 = arith.constant dense<0.000000e+00> : vector<8x256xf32>
    %49 = tpu.matmul %46, %48, %cst_48 {dimension_numbers = #tpu.dot_dimension_numbers<[1], [0], [0], [1], [0, 0, 1, 1], [], []>} : vector<8x128xbf16>, vector<128x256xbf16>, vector<8x256xf32> -> vector<8x256xf32>
    %50 = arith.addf %44, %49 : vector<8x256xf32>
    %c7 = arith.constant 7 : index
    %c0_49 = arith.constant 0 : index
    %51 = tpu.strided_load %arg16[%c7, %c0_49] {strides = array<i32: 16, 1>} : memref<128x128xf32, #tpu.memory_space<vmem>>, vector<8x128xf32>
    %52 = arith.truncf %51 : vector<8x128xf32> to vector<8x128xbf16>
    %c7_50 = arith.constant 7 : index
    %c0_51 = arith.constant 0 : index
    %c0_52 = arith.constant 0 : index
    %53 = vector.load %arg7[%c7_50, %c0_51, %c0_52] : memref<9x128x256xbf16, #tpu.memory_space<vmem>>, vector<1x128x256xbf16>
    %54 = vector.shape_cast %53 : vector<1x128x256xbf16> to vector<128x256xbf16>
    %cst_53 = arith.constant dense<0.000000e+00> : vector<8x256xf32>
    %55 = tpu.matmul %52, %54, %cst_53 {dimension_numbers = #tpu.dot_dimension_numbers<[1], [0], [0], [1], [0, 0, 1, 1], [], []>} : vector<8x128xbf16>, vector<128x256xbf16>, vector<8x256xf32> -> vector<8x256xf32>
    %56 = arith.addf %50, %55 : vector<8x256xf32>
    %c8 = arith.constant 8 : index
    %c0_54 = arith.constant 0 : index
    %57 = tpu.strided_load %arg16[%c8, %c0_54] {strides = array<i32: 16, 1>} : memref<128x128xf32, #tpu.memory_space<vmem>>, vector<8x128xf32>
    %58 = arith.truncf %57 : vector<8x128xf32> to vector<8x128xbf16>
    %c8_55 = arith.constant 8 : index
    %c0_56 = arith.constant 0 : index
    %c0_57 = arith.constant 0 : index
    %59 = vector.load %arg7[%c8_55, %c0_56, %c0_57] : memref<9x128x256xbf16, #tpu.memory_space<vmem>>, vector<1x128x256xbf16>
    %60 = vector.shape_cast %59 : vector<1x128x256xbf16> to vector<128x256xbf16>
    %cst_58 = arith.constant dense<0.000000e+00> : vector<8x256xf32>
    %61 = tpu.matmul %58, %60, %cst_58 {dimension_numbers = #tpu.dot_dimension_numbers<[1], [0], [0], [1], [0, 0, 1, 1], [], []>} : vector<8x128xbf16>, vector<128x256xbf16>, vector<8x256xf32> -> vector<8x256xf32>
    %62 = arith.addf %56, %61 : vector<8x256xf32>
    %c0_59 = arith.constant 0 : index
    %c0_60 = arith.constant 0 : index
    %63 = vector.load %arg8[%c0_59, %c0_60] : memref<1x256xf32, #tpu.memory_space<vmem>>, vector<1x256xf32>
    %64 = vector.broadcast %63 : vector<1x256xf32> to vector<8x256xf32>
    %65 = arith.addf %62, %64 : vector<8x256xf32>
    %cst_61 = arith.constant 0.000000e+00 : f32
    %66 = vector.broadcast %cst_61 : f32 to vector<8x256xf32>
    %67 = arith.maximumf %65, %66 : vector<8x256xf32>
    %68 = arith.truncf %67 : vector<8x256xf32> to vector<8x256xbf16>
    %c0_62 = arith.constant 0 : index
    %c0_63 = arith.constant 0 : index
    %69 = vector.load %arg9[%c0_62, %c0_63] : memref<256x128xbf16, #tpu.memory_space<vmem>>, vector<256x128xbf16>
    %cst_64 = arith.constant dense<0.000000e+00> : vector<8x128xf32>
    %70 = tpu.matmul %68, %69, %cst_64 {dimension_numbers = #tpu.dot_dimension_numbers<[1], [0], [0], [1], [0, 0, 1, 1], [], []>} : vector<8x256xbf16>, vector<256x128xbf16>, vector<8x128xf32> -> vector<8x128xf32>
    %c0_65 = arith.constant 0 : index
    %c0_66 = arith.constant 0 : index
    %71 = vector.load %arg10[%c0_65, %c0_66] : memref<1x128xf32, #tpu.memory_space<vmem>>, vector<1x128xf32>
    %72 = vector.broadcast %71 : vector<1x128xf32> to vector<8x128xf32>
    %73 = arith.addf %70, %72 : vector<8x128xf32>
    %c0_67 = arith.constant 0 : index
    %c0_68 = arith.constant 0 : index
    %74 = vector.load %arg11[%c0_67, %c0_68] : memref<8x128xf32, #tpu.memory_space<vmem>>, vector<8x128xf32>
    tpu.vector_store %arg11[%c0_67, %c0_68], %73 {strides = array<i32>} : memref<8x128xf32, #tpu.memory_space<vmem>>, vector<8x128xf32>,
    return
  }
  func.func @transform_0(%arg0: i32) -> (i32, i32, i32) {
    %c0_i32 = arith.constant 0 : i32
    %c0_i32_0 = arith.constant 0 : i32
    %c0_i32_1 = arith.constant 0 : i32
    return %arg0, %c0_i32, %c0_i32_0 : i32, i32, i32
  }
  func.func @transform_1(%arg0: i32) -> (i32, i32) {
    %c0_i32 = arith.constant 0 : i32
    %c0_i32_0 = arith.constant 0 : i32
    %c0_i32_1 = arith.constant 0 : i32
    return %c0_i32, %c0_i32_0 : i32, i32
  }
  func.func @transform_2(%arg0: i32) -> (i32, i32, i32) {
    %c0_i32 = arith.constant 0 : i32
    %c0_i32_0 = arith.constant 0 : i32
    %c0_i32_1 = arith.constant 0 : i32
    %c0_i32_2 = arith.constant 0 : i32
    return %c0_i32, %c0_i32_0, %c0_i32_1 : i32, i32, i32
  }
  func.func @transform_3(%arg0: i32) -> (i32, i32) {
    %c0_i32 = arith.constant 0 : i32
    %c0_i32_0 = arith.constant 0 : i32
    %c0_i32_1 = arith.constant 0 : i32
    return %c0_i32, %c0_i32_0 : i32, i32
  }
  func.func @transform_4(%arg0: i32) -> (i32, i32, i32) {
    %c0_i32 = arith.constant 0 : i32
    %c0_i32_0 = arith.constant 0 : i32
    %c0_i32_1 = arith.constant 0 : i32
    %c0_i32_2 = arith.constant 0 : i32
    return %c0_i32, %c0_i32_0, %c0_i32_1 : i32, i32, i32
  }
  func.func @transform_5(%arg0: i32) -> (i32, i32) {
    %c0_i32 = arith.constant 0 : i32
    %c0_i32_0 = arith.constant 0 : i32
    %c0_i32_1 = arith.constant 0 : i32
    return %c0_i32, %c0_i32_0 : i32, i32
  }
  func.func @transform_6(%arg0: i32) -> (i32, i32, i32) {
    %c0_i32 = arith.constant 0 : i32
    %c0_i32_0 = arith.constant 0 : i32
    %c0_i32_1 = arith.constant 0 : i32
    %c0_i32_2 = arith.constant 0 : i32
    return %c0_i32, %c0_i32_0, %c0_i32_1 : i32, i32, i32
  }
  func.func @transform_7(%arg0: i32) -> (i32, i32) {
    %c0_i32 = arith.constant 0 : i32
    %c0_i32_0 = arith.constant 0 : i32
    %c0_i32_1 = arith.constant 0 : i32
    return %c0_i32, %c0_i32_0 : i32, i32
  }
  func.func @transform_8(%arg0: i32) -> (i32, i32) {
    %c0_i32 = arith.constant 0 : i32
    %c0_i32_0 = arith.constant 0 : i32
    %c0_i32_1 = arith.constant 0 : i32
    return %c0_i32, %c0_i32_0 : i32, i32
  }
  func.func @transform_9(%arg0: i32) -> (i32, i32) {
    %c0_i32 = arith.constant 0 : i32
    %c0_i32_0 = arith.constant 0 : i32
    %c0_i32_1 = arith.constant 0 : i32
    return %c0_i32, %c0_i32_0 : i32, i32
  }
  func.func @transform_10(%arg0: i32) -> (i32, i32) {
    %c0_i32 = arith.constant 0 : i32
    %c0_i32_0 = arith.constant 0 : i32
    return %arg0, %c0_i32 : i32, i32
  }
}

</mosaic_0001>

<bundles_post_ra>
// kernel: net_forward.1
= control target key start
LH: loop header
LB: loop body
LE: loop exit
PB: predicated region body
PF: predicated region fallthrough
CT: control target
= control target key end

     0   :  { %vm37_vm0 = vcmask 1040384   ;;  %vm38_vm1 = vsmask.f32 256  ;;  %v40_v0 = vld [vmem:[#allocation2 + $0x8] sm:$0x1]  ;;  %v15124_v1 = vmov 0   ;;  %s15113_s0 = inlined_call_operand.vmem [shape: bf16[8,896,16], index: 0, kind: input, shape index: {}]   ;;  %s15114_s1 = inlined_call_operand.vmem [shape: bf16[16,128], index: 1, kind: input, shape index: {}]   ;;  %s15115_s2 = inlined_call_operand.vmem [shape: bf16[9,128,128], index: 2, kind: input, shape index: {}]   ;;  %s15116_s3 = inlined_call_operand.vmem [shape: f32[1,128], index: 3, kind: input, shape index: {}]   ;;  %s15117_s4 = inlined_call_operand.vmem [shape: bf16[9,128,128], index: 4, kind: input, shape index: {}]   ;;  %s15118_s5 = inlined_call_operand.vmem [shape: f32[1,128], index: 5, kind: input, shape index: {}]   ;;  %s15119_s6 = inlined_call_operand.vmem [shape: bf16[9,128,256], index: 6, kind: input, shape index: {}]   ;;  %s15120_s7 = inlined_call_operand.vmem [shape: f32[1,256], index: 7, kind: input, shape index: {}]   ;;  %s15121_s8 = inlined_call_operand.vmem [shape: bf16[256,128], index: 8, kind: input, shape index: {}]   ;;  %s15122_s9 = inlined_call_operand.vmem [shape: f32[1,128], index: 9, kind: input, shape index: {}]   ;;  %s15123_s10 = inlined_call_operand.vmem [shape: f32[8,128], index: 10, kind: output, shape index: {}]  }
   0x1   :  { %36 = vst [vmem:[#allocation2] sm:$0xff] %v15124_v1  ;;  %49 = vst [vmem:[#allocation4] sm:$0xf] %v15124_v1  ;;  %vm43_vm3 = vcmask 1047552   ;;  %vm44_vm4 = vsmask.f32 7938 }
   0x2   :  { %50 = vst [vmem:[#allocation4 + $0x4] sm:$0xf] %v15124_v1  ;;  %51 = vst [vmem:[#allocation4 + $0x8] sm:$0xf] %v15124_v1  ;;  %v46_v3 = vld [vmem:[#allocation2 + $0x78] sm:$0xff]  ;;  %s12519_s21 = smov 0  }
   0x3   :  { %52 = vst [vmem:[#allocation4 + $0xc] sm:$0xf] %v15124_v1  ;;  %53 = vst [vmem:[#allocation4 + $0x10] sm:$0xf] %v15124_v1  ;;  %v12494_v4 = vld [vmem:[%s15114_s1] sm:$0xf] }
   0x4   :  { %54 = vst [vmem:[#allocation4 + $0x14] sm:$0xf] %v15124_v1  ;;  %55 = vst [vmem:[#allocation4 + $0x18] sm:$0xf] %v15124_v1  ;;  %v12505_v7 = vld [vmem:[%s15114_s1 + $0x4] sm:$0xf] }
   0x5   :  { %56 = vst [vmem:[#allocation4 + $0x1c] sm:$0xf] %v15124_v1  ;;  %57 = vst [vmem:[#allocation4 + $0x20] sm:$0xf] %v15124_v1  ;;  %v12510_v8 = vld [vmem:[%s15116_s3] ss:$0 sm:$0xff] }
   0x6   :  { %58 = vst [vmem:[#allocation4 + $0x24] sm:$0xf] %v15124_v1  ;;  %59 = vst [vmem:[#allocation4 + $0x28] sm:$0xf] %v15124_v1  ;;  %v12517_v10 = vld [vmem:[%s15118_s5] ss:$0 sm:$0xff] }
   0x7   :  { %vm12487_vm2 = vmand %vm37_vm0, %vm38_vm1  ;;  %15131 = vst [vmem:[#allocation7_spill] sm:$0xff] %v12494_v4 }
   0x8   :  { %v41_v5 = vsel %vm12487_vm2, 0, %v40_v0  ;;  %vm12498_vm5 = vmand %vm43_vm3, %vm44_vm4  ;;  %15134 = vst [vmem:[#allocation8_spill] sm:$0xff] %v12505_v7 }
   0x9   :  { %42 = vst [vmem:[#allocation2 + $0x8] sm:$0x1] %v41_v5  ;;  %v47_v9 = vsel %vm12498_vm5, 0, %v46_v3  ;;  %15135 = vst [vmem:[#allocation9_spill] sm:$0xff] %v12517_v10 }
   0xa   :  { %48 = vst [vmem:[#allocation2 + $0x78] sm:$0xff] %v47_v9 }
   0xb LB: > { %v15126_v12 = vmov 0.0   ;;  %vm12417_vm6 = vmmov 0   ;;  %s9634_s1 = smul.u32 448, %s12413_s21  ;;  %vm128_vm7 = vcmask 130048   ;;  %vm1669_vm8 = vsmask.f32 7424  ;;  %s12413_s21 = sphi %s12519_s21, %s69_s21  }
   0xc   : > { %10105 = vmatprep.subr.bf16.mxu1 %v15126_v12  ;;  %10107 = vmatprep.mubr.msk.bf16.mxu1 %vm12417_vm6, %v15126_v12  ;;  %vm2037_vm9 = vcmask 1046528   ;;  %vm5288_vm10 = vcmask 1043457   ;;  %vm5289_vm11 = vsmask.f32 7942  ;;  %vm5317_vm13 = vcmask 1041408   ;;  %s9339_s17 = sshll.u32 %s12413_s21, 4 }
   0xd   : > { %10225 = vmatprep.subr.bf16.mxu0 %v15126_v12  ;;  %s12539_s22 = scalar_lea.vmem %s15113_s0, %s9634_s1  ;;  %10227 = vmatprep.mubr.msk.bf16.mxu0 %vm12417_vm6, %v15126_v12  ;;  %vm5290_vm12 = vmand %vm5288_vm10, %vm5289_vm11  ;;  %vm5318_vm14 = vsmask.f32 1280  ;;  %vm5351_vm0 = vcmask 1043458   ;;  %vm5352_vm3 = vsmask.f32 7946  ;;  %vm5414_vm11 = vcmask 1043459  }
   0xe   : > { %v15137_v4 = vld [vmem:[#allocation7_spill] sm:$0xff]  ;;  %v11876_v13 = vld [vmem:[%s12539_s22] sm:$0xff]   ;;  %v11879_v16 = vld [vmem:[%s12539_s22 + $0x18] sm:$0xff]   ;;  %s7015_s18 = scalar_lea.vmem [#allocation6], %s9339_s17  ;;  %s69_s21 = sadd.s32 1, %s12413_s21  }
   0xf   : > { %v15136_v7 = vld [vmem:[#allocation8_spill] sm:$0xff]  ;;  %v11877_v14 = vld [vmem:[%s12539_s22 + $0x8] sm:$0xff]   ;;  %v11880_v17 = vld [vmem:[%s12539_s22 + $0x20] sm:$0xff]   ;;  %p66_p0 = scmp.ge.s32.totalorder %s69_s21, 8  }
  0x10   : > { %v12526_v11 = vcombine.low %v15137_v4, %v15136_v7  ;;  %v11878_v15 = vld [vmem:[%s12539_s22 + $0x10] sm:$0xff]   ;;  %v11881_v18 = vld [vmem:[%s12539_s22 + $0x28] sm:$0xff]   ;;  %v11898_v19 = vld [vmem:[%s12539_s22 + $0x38] sm:$0xff]  }
  0x11   : > { %v11882_v20 = vld [vmem:[%s12539_s22 + $0x30] sm:$0xff]   ;;  %v11900_v21 = vld [vmem:[%s12539_s22 + $0x40] sm:$0xff]   ;;  %v11902_v23 = vld [vmem:[%s12539_s22 + $0x48] sm:$0xff]  }
  0x12   : > { %10106 = vmatpush3.bf16.msra.mxu1 %v12526_v11  ;;  %10226 = vmatpush3.bf16.msra.mxu0 %v12526_v11  ;;  %v11883_v22 = vld [vmem:[%s12539_s22 + $0x70] sm:$0xff]   ;;  %v11884_v24 = vld [vmem:[%s12539_s22 + $0x78] sm:$0xff]   ;;  %v11885_v26 = vld [vmem:[%s12539_s22 + $0x80] sm:$0xff]  }
  0x13   : > { %10135 = vmatprep.subr.bf16.mxu1 %v15126_v12  ;;  %10285 = vmatprep.subr.bf16.mxu0 %v15126_v12  ;;  %v11904_v25 = vld [vmem:[%s12539_s22 + $0x50] sm:$0xff]   ;;  %v11906_v27 = vld [vmem:[%s12539_s22 + $0x58] sm:$0xff]   ;;  %v11886_v28 = vld [vmem:[%s12539_s22 + $0x88] sm:$0xff]  }
  0x14   : > { %v11908_v29 = vld [vmem:[%s12539_s22 + $0x60] sm:$0xff]   ;;  %v11887_v30 = vld [vmem:[%s12539_s22 + $0x90] sm:$0xff]   ;;  %v11910_v31 = vld [vmem:[%s12539_s22 + $0x68] sm:$0xff]  }
  0x15   : > { %10108 = vmatmul.mubr.msk.bf16.vlgmr.msra.gmra.mrb[0].mxu1 %vm128_vm7, %v11876_v13  ;;  %10228 = vmatmul.mubr.msk.bf16.vlgmr.msra.gmra.mrb[0].mxu0 %vm128_vm7, %v11898_v19  ;;  %v11888_v32 = vld [vmem:[%s12539_s22 + $0x98] sm:$0xff]   ;;  %v11889_v34 = vld [vmem:[%s12539_s22 + $0xa0] sm:$0xff]   ;;  %v11916_v37 = vld [vmem:[%s12539_s22 + $0x128] sm:$0xff]  }
  0x16   : > { %10136 = vmatpush3.bf16.msra.mxu1 %v12526_v11  ;;  %10111 = vmatprep.mubr.msk.bf16.mxu1 %vm12417_vm6, %v15126_v12  ;;  %v11912_v33 = vld [vmem:[%s12539_s22 + $0x118] sm:$0xff]   ;;  %v11914_v35 = vld [vmem:[%s12539_s22 + $0x120] sm:$0xff]   ;;  %v11891_v38 = vld [vmem:[%s12539_s22 + $0xe8] sm:$0xff]  }
  0x17   : > { %10165 = vmatprep.subr.bf16.mxu1 %v15126_v12  ;;  %10231 = vmatprep.mubr.msk.bf16.mxu0 %vm12417_vm6, %v15126_v12  ;;  %v11890_v36 = vld [vmem:[%s12539_s22 + $0xe0] sm:$0xff]   ;;  %v11918_v39 = vld [vmem:[%s12539_s22 + $0x130] sm:$0xff]   ;;  %v11920_v41 = vld [vmem:[%s12539_s22 + $0x138] sm:$0xff]  }
  0x18   : > { %10286 = vmatpush3.bf16.msra.mxu0 %v12526_v11  ;;  %v11892_v40 = vld [vmem:[%s12539_s22 + $0xf0] sm:$0xff]   ;;  %v11893_v42 = vld [vmem:[%s12539_s22 + $0xf8] sm:$0xff]   ;;  %v11922_v43 = vld [vmem:[%s12539_s22 + $0x140] sm:$0xff]  }
  0x19   : > { %10345 = vmatprep.subr.bf16.mxu0 %v15126_v12  ;;  %v11894_v44 = vld [vmem:[%s12539_s22 + $0x100] sm:$0xff]   ;;  %v11924_v45 = vld [vmem:[%s12539_s22 + $0x148] sm:$0xff]   ;;  %v11896_v47 = vld [vmem:[%s12539_s22 + $0x110] sm:$0xff]  }
  0x1a   : > { %v11895_v46 = vld [vmem:[%s12539_s22 + $0x108] sm:$0xff]   ;;  %v11897_v48 = vld [vmem:[%s12539_s22 + $0x150] sm:$0xff]   ;;  %v11899_v49 = vld [vmem:[%s12539_s22 + $0x158] sm:$0xff]  }
  0x1b   : > { %v11901_v50 = vld [vmem:[%s12539_s22 + $0x160] sm:$0xff]   ;;  %v11903_v51 = vld [vmem:[%s12539_s22 + $0x168] sm:$0xff]   ;;  %v11905_v52 = vld [vmem:[%s12539_s22 + $0x170] sm:$0xff]  }
  0x1c   : > { %v11907_v53 = vld [vmem:[%s12539_s22 + $0x178] sm:$0xff]   ;;  %v11909_v56 = vld [vmem:[%s12539_s22 + $0x180] sm:$0xff]   ;;  %v11911_v61 = vld [vmem:[%s12539_s22 + $0xa8] sm:$0xff]  }
  0x1d   : > { %10112 = vmatmul.mubr.msk.bf16.gmra.mrb[4].mxu1 %vm128_vm7, %v11877_v14  ;;  %10232 = vmatmul.mubr.msk.bf16.gmra.mrb[4].mxu0 %vm128_vm7, %v11900_v21  ;;  %v11913_v5 = vld [vmem:[%s12539_s22 + $0xb0] sm:$0xff]   ;;  %vm5319_vm15 = vmand %vm5317_vm13, %vm5318_vm14  ;;  %vm5435_vm14 = vcmask 1043456   ;;  %v12180_v2 = vld [vmem:[%s15119_s6] ss:$8 sps:$4 sm:$0xff] (%p66_p0)  }
  0x1e   : > { %10115 = vmatprep.mubr.msk.bf16.mxu1 %vm12417_vm6, %v15126_v12  ;;  %10235 = vmatprep.mubr.msk.bf16.mxu0 %vm12417_vm6, %v15126_v12  ;;  %vm5353_vm4 = vmand %vm5351_vm0, %vm5352_vm3  ;;  %v12181_v6 = vld [vmem:[%s15119_s6 + $0x94] ss:$8 sps:$4 sm:$0xff] (%p66_p0)  }
  0x25   : > { %10116 = vmatmul.mubr.msk.bf16.gmra.mrb[8].mxu1 %vm128_vm7, %v11878_v15  ;;  %10236 = vmatmul.mubr.msk.bf16.gmra.mrb[8].mxu0 %vm128_vm7, %v11902_v23  ;;  %v11915_v15 = vld [vmem:[%s12539_s22 + $0xb8] sm:$0xff]  }
  0x26   : > { %10119 = vmatprep.mubr.msk.bf16.mxu1 %vm12417_vm6, %v15126_v12  ;;  %10239 = vmatprep.mubr.msk.bf16.mxu0 %vm12417_vm6, %v15126_v12 }
  0x2d   : > { %10120 = vmatmul.mubr.msk.bf16.gmra.mrb[12].mxu1 %vm128_vm7, %v11879_v16  ;;  %10240 = vmatmul.mubr.msk.bf16.gmra.mrb[12].mxu0 %vm128_vm7, %v11904_v25  ;;  %v11934_v25 = vld [vmem:[%s15115_s2 + $0x50] sm:$0xff]  }
  0x2e   : > { %10123 = vmatprep.mubr.msk.bf16.mxu1 %vm12417_vm6, %v15126_v12  ;;  %10243 = vmatprep.mubr.msk.bf16.mxu0 %vm12417_vm6, %v15126_v12 }
  0x35   : > { %10124 = vmatmul.mubr.msk.bf16.gmra.mrb[16].mxu1 %vm128_vm7, %v11880_v17  ;;  %10244 = vmatmul.mubr.msk.bf16.gmra.mrb[16].mxu0 %vm128_vm7, %v11906_v27  ;;  %v11935_v27 = vld [vmem:[%s15115_s2 + $0x58] sm:$0xff]  }
  0x36   : > { %10127 = vmatprep.mubr.msk.bf16.mxu1 %vm12417_vm6, %v15126_v12  ;;  %10247 = vmatprep.mubr.msk.bf16.mxu0 %vm12417_vm6, %v15126_v12 }
  0x3d   : > { %10128 = vmatmul.mubr.msk.bf16.gmra.mrb[20].mxu1 %vm128_vm7, %v11881_v18  ;;  %10248 = vmatmul.mubr.msk.bf16.gmra.mrb[20].mxu0 %vm128_vm7, %v11908_v29  ;;  %v11932_v18 = vld [vmem:[%s15115_s2 + $0x40] sm:$0xff]   ;;  %v11919_v29 = vld [vmem:[%s12539_s22 + $0xc8] sm:$0xff]  }
  0x3e   : > { %10131 = vmatprep.mubr.msk.bf16.mxu1 %vm12417_vm6, %v15126_v12  ;;  %10251 = vmatprep.mubr.msk.bf16.mxu0 %vm12417_vm6, %v15126_v12 }
  0x45   : > { %10132 = vmatmul.mubr.msk.bf16.gmra.mrb[24].mxu1 %vm128_vm7, %v11882_v20  ;;  %10252 = vmatmul.mubr.msk.bf16.gmra.mrb[24].mxu0 %vm128_vm7, %v11910_v31  ;;  %v11933_v20 = vld [vmem:[%s15115_s2 + $0x48] sm:$0xff]  }
  0x46   : > { %10137 = vmatprep.mubr.msk.bf16.mxu1 %vm12417_vm6, %v15126_v12  ;;  %10287 = vmatprep.mubr.msk.bf16.mxu0 %vm12417_vm6, %v15126_v12 }
  0x4d   : > { %10138 = vmatmul.mubr.msk.bf16.vlgmr.msra.gmra.mrb[28].mxu1 %vm128_vm7, %v11883_v22  ;;  %10288 = vmatmul.mubr.msk.bf16.vlgmr.msra.gmra.mrb[28].mxu0 %vm128_vm7, %v11912_v33  ;;  %v11917_v22 = vld [vmem:[%s12539_s22 + $0xc0] sm:$0xff]  }
  0x4e   : > { %10166 = vmatpush3.bf16.msra.mxu1 %v12526_v11  ;;  %10141 = vmatprep.mubr.msk.bf16.mxu1 %vm12417_vm6, %v15126_v12 }
  0x4f   : > { %10195 = vmatprep.subr.bf16.mxu1 %v15126_v12  ;;  %10291 = vmatprep.mubr.msk.bf16.mxu0 %vm12417_vm6, %v15126_v12 }
  0x50   : > { %10346 = vmatpush3.bf16.msra.mxu0 %v11932_v18 }
  0x51   : > { %10347 = vmatprep.subr.bf16.mxu0 %v15126_v12 }
  0x54   : > { %10348 = vmatpush3.bf16.msra.mxu0 %v11933_v20 }
  0x55   : > { %10142 = vmatmul.mubr.msk.bf16.gmra.mrb[32].mxu1 %vm128_vm7, %v11884_v24  ;;  %10292 = vmatmul.mubr.msk.bf16.gmra.mrb[32].mxu0 %vm128_vm7, %v11914_v35 }
  0x56   : > { %10145 = vmatprep.mubr.msk.bf16.mxu1 %vm12417_vm6, %v15126_v12  ;;  %10295 = vmatprep.mubr.msk.bf16.mxu0 %vm12417_vm6, %v15126_v12 }
  0x57   : > { %10349 = vmatprep.subr.bf16.mxu0 %v15126_v12 }
  0x58   : > { %10350 = vmatpush3.bf16.msra.mxu0 %v11934_v25 }
  0x59   : > { %10351 = vmatprep.subr.bf16.mxu0 %v15126_v12 }
  0x5c   : > { %10352 = vmatpush3.bf16.msra.mxu0 %v11935_v27 }
  0x5d   : > { %10146 = vmatmul.mubr.msk.bf16.gmra.mrb[36].mxu1 %vm128_vm7, %v11885_v26  ;;  %10296 = vmatmul.mubr.msk.bf16.gmra.mrb[36].mxu0 %vm128_vm7, %v11916_v37 }
  0x5e   : > { %10149 = vmatprep.mubr.msk.bf16.mxu1 %vm12417_vm6, %v15126_v12  ;;  %10299 = vmatprep.mubr.msk.bf16.mxu0 %vm12417_vm6, %v15126_v12 }
  0x5f   : > { %10353 = vmatprep.subr.bf16.mxu0 %v15126_v12 }
  0x65   : > { %10150 = vmatmul.mubr.msk.bf16.gmra.mrb[40].mxu1 %vm128_vm7, %v11886_v28  ;;  %10300 = vmatmul.mubr.msk.bf16.gmra.mrb[40].mxu0 %vm128_vm7, %v11918_v39  ;;  %v11938_v39 = vld [vmem:[%s15115_s2 + $0x70] sm:$0xff]  }
  0x66   : > { %10153 = vmatprep.mubr.msk.bf16.mxu1 %vm12417_vm6, %v15126_v12  ;;  %10303 = vmatprep.mubr.msk.bf16.mxu0 %vm12417_vm6, %v15126_v12 }
  0x6d   : > { %10154 = vmatmul.mubr.msk.bf16.gmra.mrb[44].mxu1 %vm128_vm7, %v11887_v30  ;;  %10304 = vmatmul.mubr.msk.bf16.gmra.mrb[44].mxu0 %vm128_vm7, %v11920_v41  ;;  %v11939_v41 = vld [vmem:[%s15115_s2 + $0x78] sm:$0xff]  }
  0x6e   : > { %10157 = vmatprep.mubr.msk.bf16.mxu1 %vm12417_vm6, %v15126_v12  ;;  %10307 = vmatprep.mubr.msk.bf16.mxu0 %vm12417_vm6, %v15126_v12 }
  0x75   : > { %10158 = vmatmul.mubr.msk.bf16.gmra.mrb[48].mxu1 %vm128_vm7, %v11888_v32  ;;  %10308 = vmatmul.mubr.msk.bf16.gmra.mrb[48].mxu0 %vm128_vm7, %v11922_v43  ;;  %v11936_v32 = vld [vmem:[%s15115_s2 + $0x60] sm:$0xff]  }
  0x76   : > { %10161 = vmatprep.mubr.msk.bf16.mxu1 %vm12417_vm6, %v15126_v12  ;;  %10311 = vmatprep.mubr.msk.bf16.mxu0 %vm12417_vm6, %v15126_v12 }
  0x77   : > { %10354 = vmatpush3.bf16.msra.mxu0 %v11936_v32  ;;  %v11927_v32 = vld [vmem:[%s12539_s22 + $0x198] sm:$0xff]  }
  0x78   : > { %10355 = vmatprep.subr.bf16.mxu0 %v15126_v12 }
  0x7d   : > { %10162 = vmatmul.mubr.msk.bf16.gmra.mrb[52].mxu1 %vm128_vm7, %v11889_v34  ;;  %10312 = vmatmul.mubr.msk.bf16.gmra.mrb[52].mxu0 %vm128_vm7, %v11924_v45  ;;  %v11937_v34 = vld [vmem:[%s15115_s2 + $0x68] sm:$0xff]  }
  0x7e   : > { %10167 = vmatprep.mubr.msk.bf16.mxu1 %vm12417_vm6, %v15126_v12  ;;  %10361 = vmatprep.mubr.msk.bf16.mxu0 %vm12417_vm6, %v15126_v12 }
  0x7f   : > { %10356 = vmatpush3.bf16.msra.mxu0 %v11937_v34 }
  0x80   : > { %10357 = vmatprep.subr.bf16.mxu0 %v15126_v12 }
  0x83   : > { %10358 = vmatpush3.bf16.msra.mxu0 %v11938_v39 }
  0x84   : > { %10359 = vmatprep.subr.bf16.mxu0 %v15126_v12 }
  0x85   : > { %10168 = vmatmul.mubr.msk.bf16.vlgmr.msra.gmra.mrb[56].mxu1 %vm128_vm7, %v11890_v36  ;;  %v11921_v36 = vld [vmem:[%s12539_s22 + $0xd0] sm:$0xff]  }
  0x86   : > { %10196 = vmatpush3.bf16.msra.mxu1 %v12526_v11  ;;  %10171 = vmatprep.mubr.msk.bf16.mxu1 %vm12417_vm6, %v15126_v12 }
  0x87   : > { %10255 = vmatprep.subr.bf16.mxu1 %v15126_v12  ;;  %10360 = vmatpush3.bf16.msra.mxu0 %v11939_v41 }
  0x88   : > { %10389 = vmatprep.subr.bf16.mxu0 %v15126_v12 }
  0x8d   : > { %10172 = vmatmul.mubr.msk.bf16.gmra.mrb[60].mxu1 %vm128_vm7, %v11891_v38 }
  0x8e   : > { %10175 = vmatprep.mubr.msk.bf16.mxu1 %vm12417_vm6, %v15126_v12 }
  0x95   : > { %10176 = vmatmul.mubr.msk.bf16.gmra.mrb[64].mxu1 %vm128_vm7, %v11892_v40 }
  0x96   : > { %10179 = vmatprep.mubr.msk.bf16.mxu1 %vm12417_vm6, %v15126_v12 }
  0x9d   : > { %10180 = vmatmul.mubr.msk.bf16.gmra.mrb[68].mxu1 %vm128_vm7, %v11893_v42 }
  0x9e   : > { %10183 = vmatprep.mubr.msk.bf16.mxu1 %vm12417_vm6, %v15126_v12 }
  0xa5   : > { %10184 = vmatmul.mubr.msk.bf16.gmra.mrb[72].mxu1 %vm128_vm7, %v11894_v44  ;;  %v11923_v44 = vld [vmem:[%s12539_s22 + $0xd8] sm:$0xff]  }
  0xa6   : > { %10187 = vmatprep.mubr.msk.bf16.mxu1 %vm12417_vm6, %v15126_v12 }
  0xad   : > { %10188 = vmatmul.mubr.msk.bf16.gmra.mrb[76].mxu1 %vm128_vm7, %v11895_v46 }
  0xae   : > { %10191 = vmatprep.mubr.msk.bf16.mxu1 %vm12417_vm6, %v15126_v12 }
  0xb5   : > { %10192 = vmatmul.mubr.msk.bf16.gmra.mrb[80].mxu1 %vm128_vm7, %v11896_v47 }
  0xb6   : > { %10197 = vmatprep.mubr.msk.bf16.mxu1 %vm12417_vm6, %v15126_v12 }
  0xbd   : > { %10198 = vmatmul.mubr.msk.bf16.vlgmr.msra.gmra.mrb[84].mxu1 %vm128_vm7, %v11897_v48 }
  0xbe   : > { %10256 = vmatpush3.bf16.msra.mxu1 %v12526_v11  ;;  %10201 = vmatprep.mubr.msk.bf16.mxu1 %vm12417_vm6, %v15126_v12 }
  0xbf   : > { %10315 = vmatprep.subr.bf16.mxu1 %v15126_v12 }
  0xc5   : > { %10202 = vmatmul.mubr.msk.bf16.gmra.mrb[88].mxu1 %vm128_vm7, %v11899_v49  ;;  %v11931_v49 = vld [vmem:[%s12539_s22 + $0x1b8] sm:$0xff]  }
  0xc6   : > { %10205 = vmatprep.mubr.msk.bf16.mxu1 %vm12417_vm6, %v15126_v12 }
  0xcd   : > { %10206 = vmatmul.mubr.msk.bf16.gmra.mrb[92].mxu1 %vm128_vm7, %v11901_v50 }
  0xce   : > { %10209 = vmatprep.mubr.msk.bf16.mxu1 %vm12417_vm6, %v15126_v12 }
  0xd5   : > { %10210 = vmatmul.mubr.msk.bf16.gmra.mrb[96].mxu1 %vm128_vm7, %v11903_v51  ;;  %v11925_v51 = vld [vmem:[%s12539_s22 + $0x188] sm:$0xff]  }
  0xd6   : > { %10213 = vmatprep.mubr.msk.bf16.mxu1 %vm12417_vm6, %v15126_v12 }
  0xdd   : > { %10214 = vmatmul.mubr.msk.bf16.gmra.mrb[100].mxu1 %vm128_vm7, %v11905_v52 }
  0xde   : > { %10217 = vmatprep.mubr.msk.bf16.mxu1 %vm12417_vm6, %v15126_v12 }
  0xe5   : > { %10218 = vmatmul.mubr.msk.bf16.gmra.mrb[104].mxu1 %vm128_vm7, %v11907_v53 }
  0xe6   : > { %10221 = vmatprep.mubr.msk.bf16.mxu1 %vm12417_vm6, %v15126_v12 }
  0xe8   : > { %v12718_v54 = vpop.f32.mrb[0].mxu1 }
  0xe9   : > { %v10109_v55 = vpop.f32.mrb[1].mxu1 }
  0xea   : > { %v12721_v57 = vpop.f32.mrb[2].mxu1 }
  0xeb   : > { %v10110_v58 = vpop.f32.mrb[3].mxu1 }
  0xed   : > { %10222 = vmatmul.mubr.msk.bf16.gmra.mrb[108].mxu1 %vm128_vm7, %v11909_v56  ;;  %v12832_v56 = vpop.f32.mrb[0].mxu0 }
  0xee   : > { %10257 = vmatprep.mubr.msk.bf16.mxu1 %vm12417_vm6, %v15126_v12  ;;  %v10229_v58 = vpop.f32.mrb[1].mxu0 }
  0xf0   : > { %v12726_v59 = vpop.f32.mrb[4].mxu1 }
  0xf1   : > { %v10113_v60 = vpop.f32.mrb[5].mxu1 }
  0xf2   : > { %v12729_v62 = vpop.f32.mrb[6].mxu1 }
  0xf3   : > { %v10114_v63 = vpop.f32.mrb[7].mxu1 }
  0xf5   : > { %10258 = vmatmul.mubr.msk.bf16.vlgmr.msra.gmra.mrb[112].mxu1 %vm128_vm7, %v11911_v61  ;;  %v12836_v61 = vpop.f32.mrb[2].mxu0 }
  0xf6   : > { %10316 = vmatpush3.bf16.msra.mxu1 %v12526_v11  ;;  %10261 = vmatprep.mubr.msk.bf16.mxu1 %vm12417_vm6, %v15126_v12 }
  0xf7   : > { %10741 = vmatprep.subr.bf16.mxu1 %v15126_v12 }
  0xf8   : > { %v12736_v0 = vpop.f32.mrb[8].mxu1 }
  0xf9   : > { %v10117_v3 = vpop.f32.mrb[9].mxu1 }
  0xfa   : > { %v12739_v9 = vpop.f32.mrb[10].mxu1 }
  0xfb   : > { %v10118_v13 = vpop.f32.mrb[11].mxu1 }
  0xfc   : > { %v10230_v13 = vpop.f32.mrb[3].mxu0 }
  0xfd   : > { %10262 = vmatmul.mubr.msk.bf16.gmra.mrb[116].mxu1 %vm128_vm7, %v11913_v5  ;;  %v11926_v5 = vld [vmem:[%s12539_s22 + $0x190] sm:$0xff]  }
  0xfe   : > { %10265 = vmatprep.mubr.msk.bf16.mxu1 %vm12417_vm6, %v15126_v12 }
 0x100   : > { %v12744_v14 = vpop.f32.mrb[12].mxu1 }
 0x101   : > { %v10121_v11 = vpop.f32.mrb[13].mxu1 }
 0x102   : > { %v12747_v16 = vpop.f32.mrb[14].mxu1 }
 0x103   : > { %v10122_v17 = vpop.f32.mrb[15].mxu1 }
 0x105   : > { %10266 = vmatmul.mubr.msk.bf16.gmra.mrb[120].mxu1 %vm128_vm7, %v11915_v15  ;;  %v12843_v15 = vpop.f32.mrb[4].mxu0 }
 0x106   : > { %10269 = vmatprep.mubr.msk.bf16.mxu1 %vm12417_vm6, %v15126_v12  ;;  %v10233_v20 = vpop.f32.mrb[5].mxu0 }
 0x108   : > { %v12756_v19 = vpop.f32.mrb[16].mxu1 }
 0x109   : > { %v10125_v21 = vpop.f32.mrb[17].mxu1 }
 0x10a   : > { %v12762_v23 = vpop.f32.mrb[18].mxu1  ;;  %v12847_v21 = vpop.f32.mrb[6].mxu0 }
 0x10b   : > { %v10126_v24 = vpop.f32.mrb[19].mxu1 }
 0x10d   : > { %10270 = vmatmul.mubr.msk.bf16.gmra.mrb[124].mxu1 %vm128_vm7, %v11917_v22  ;;  %v10234_v22 = vpop.f32.mrb[7].mxu0 }
 0x10e   : > { %10273 = vmatprep.mubr.msk.bf16.mxu1 %vm12417_vm6, %v15126_v12  ;;  %v12852_v24 = vpop.f32.mrb[8].mxu0 }
 0x10f   : > { %v10237_v25 = vpop.f32.mrb[9].mxu0 }
 0x110   : > { %v12772_v26 = vpop.f32.mrb[20].mxu1 }
 0x111   : > { %v10129_v28 = vpop.f32.mrb[21].mxu1 }
 0x112   : > { %v12778_v30 = vpop.f32.mrb[22].mxu1  ;;  %v12856_v28 = vpop.f32.mrb[10].mxu0 }
 0x113   : > { %v10130_v31 = vpop.f32.mrb[23].mxu1  ;;  %v10238_v34 = vpop.f32.mrb[11].mxu0 }
 0x115   : > { %10274 = vmatmul.mubr.msk.bf16.gmra.mrb[128].mxu1 %vm128_vm7, %v11919_v29  ;;  %v11930_v29 = vld [vmem:[%s12539_s22 + $0x1b0] sm:$0xff]  }
 0x116   : > { %10277 = vmatprep.mubr.msk.bf16.mxu1 %vm12417_vm6, %v15126_v12 }
 0x118   : > { %v12788_v33 = vpop.f32.mrb[24].mxu1 }
 0x119   : > { %v10133_v35 = vpop.f32.mrb[25].mxu1 }
 0x11a   : > { %v12794_v37 = vpop.f32.mrb[26].mxu1 }
 0x11b   : > { %v10134_v38 = vpop.f32.mrb[27].mxu1 }
 0x11d   : > { %10278 = vmatmul.mubr.msk.bf16.gmra.mrb[132].mxu1 %vm128_vm7, %v11921_v36  ;;  %v12863_v36 = vpop.f32.mrb[12].mxu0 }
 0x11e   : > { %10281 = vmatprep.mubr.msk.bf16.mxu1 %vm12417_vm6, %v15126_v12  ;;  %v10241_v41 = vpop.f32.mrb[13].mxu0 }
 0x120   : > { %v12804_v40 = vpop.f32.mrb[28].mxu1 }
 0x121   : > { %v398_v42 = vmax.f32 %v12718_v54, %v12804_v40  ;;  %v10139_v43 = vpop.f32.mrb[29].mxu1  ;;  %v15139_v54 = vmov 0.0  }
 0x122   : > { %v12812_v45 = vpop.f32.mrb[30].mxu1  ;;  %v12867_v43 = vpop.f32.mrb[14].mxu0 }
 0x123   : > { %v10140_v47 = vpop.f32.mrb[31].mxu1 }
 0x125   : > { %10282 = vmatmul.mubr.msk.bf16.gmra.mrb[136].mxu1 %vm128_vm7, %v11923_v44  ;;  %v10242_v44 = vpop.f32.mrb[15].mxu0 }
 0x126   : > { %10317 = vmatprep.mubr.msk.bf16.mxu1 %vm12417_vm6, %v15126_v12  ;;  %v12872_v47 = vpop.f32.mrb[16].mxu0 }
 0x128   : > { %v12820_v48 = vpop.f32.mrb[32].mxu1 }
 0x129   : > { %v10143_v50 = vpop.f32.mrb[33].mxu1 }
 0x12a   : > { %v12825_v52 = vpop.f32.mrb[34].mxu1  ;;  %v10245_v50 = vpop.f32.mrb[17].mxu0 }
 0x12b   : > { %v10144_v55 = vpop.f32.mrb[35].mxu1 }
 0x12c   : > { %v12876_v55 = vpop.f32.mrb[18].mxu0 }
 0x12d   : > { %10318 = vmatmul.mubr.msk.bf16.vlgmr.msra.gmra.mrb[140].mxu1 %vm128_vm7, %v11925_v51  ;;  %v10246_v13 = vpop.f32.mrb[19].mxu0 }
 0x12e   : > { %10321 = vmatprep.mubr.msk.bf16.mxu1 %vm12417_vm6, %v15126_v12  ;;  %v12883_v20 = vpop.f32.mrb[20].mxu0 }
 0x130   : > { %v12834_v60 = vpop.f32.mrb[36].mxu1 }
 0x131   : > { %v10147_v3 = vpop.f32.mrb[37].mxu1 }
 0x132   : > { %v12841_v11 = vpop.f32.mrb[38].mxu1 }
 0x133   : > { %v10148_v18 = vpop.f32.mrb[39].mxu1 }
 0x135   : > { %10322 = vmatmul.mubr.msk.bf16.gmra.mrb[144].mxu1 %vm128_vm7, %v11926_v5  ;;  %v11928_v5 = vld [vmem:[%s12539_s22 + $0x1a0] sm:$0xff]  }
 0x136   : > { %10325 = vmatprep.mubr.msk.bf16.mxu1 %vm12417_vm6, %v15126_v12 }
 0x138   : > { %v12854_v27 = vpop.f32.mrb[40].mxu1 }
 0x139   : > { %v10151_v31 = vpop.f32.mrb[41].mxu1 }
 0x13a   : > { %v12861_v35 = vpop.f32.mrb[42].mxu1  ;;  %v10249_v31 = vpop.f32.mrb[21].mxu0 }
 0x13b   : > { %v10152_v39 = vpop.f32.mrb[43].mxu1 }
 0x13d   : > { %10326 = vmatmul.mubr.msk.bf16.gmra.mrb[148].mxu1 %vm128_vm7, %v11927_v32  ;;  %v12887_v32 = vpop.f32.mrb[22].mxu0 }
 0x13e   : > { %10329 = vmatprep.mubr.msk.bf16.mxu1 %vm12417_vm6, %v15126_v12  ;;  %v10250_v34 = vpop.f32.mrb[23].mxu0 }
 0x13f   : > { %v12892_v39 = vpop.f32.mrb[24].mxu0 }
 0x140   : > { %v12874_v51 = vpop.f32.mrb[44].mxu1  ;;  %v10253_v41 = vpop.f32.mrb[25].mxu0 }
 0x141   : > { %v10155_v3 = vpop.f32.mrb[45].mxu1  ;;  %v12896_v50 = vpop.f32.mrb[26].mxu0 }
 0x142   : > { %v12881_v18 = vpop.f32.mrb[46].mxu1  ;;  %v10254_v31 = vpop.f32.mrb[27].mxu0 }
 0x143   : > { %v10156_v25 = vpop.f32.mrb[47].mxu1 }
 0x144   : > { %v11929_v25 = vld [vmem:[%s12539_s22 + $0x1a8] sm:$0xff]  }
 0x145   : > { %10330 = vmatmul.mubr.msk.bf16.gmra.mrb[152].mxu1 %vm128_vm7, %v11928_v5  ;;  %v12903_v5 = vpop.f32.mrb[28].mxu0 }
 0x146   : > { %10333 = vmatprep.mubr.msk.bf16.mxu1 %vm12417_vm6, %v15126_v12  ;;  %v10289_v41 = vpop.f32.mrb[29].mxu0 }
 0x147   : > { %v12907_v58 = vpop.f32.mrb[30].mxu0 }
 0x148   : > { %v12894_v44 = vpop.f32.mrb[48].mxu1  ;;  %v10290_v38 = vpop.f32.mrb[31].mxu0 }
 0x149   : > { %v10159_v13 = vpop.f32.mrb[49].mxu1 }
 0x14a   : > { %v12901_v1 = vpop.f32.mrb[50].mxu1 }
 0x14b   : > { %v10160_v22 = vpop.f32.mrb[51].mxu1 }
 0x14c   : > { %v12919_v22 = vpop.f32.mrb[32].mxu0 }
 0x14d   : > { %10334 = vmatmul.mubr.msk.bf16.gmra.mrb[156].mxu1 %vm128_vm7, %v11929_v25  ;;  %v10293_v38 = vpop.f32.mrb[33].mxu0 }
 0x14e   : > { %10337 = vmatprep.mubr.msk.bf16.mxu1 %vm12417_vm6, %v15126_v12  ;;  %v12923_v34 = vpop.f32.mrb[34].mxu0 }
 0x14f   : > { %v10294_v63 = vpop.f32.mrb[35].mxu0 }
 0x150   : > { %v12912_v13 = vpop.f32.mrb[52].mxu1  ;;  %v12934_v41 = vpop.f32.mrb[36].mxu0 }
 0x151   : > { %v10163_v3 = vpop.f32.mrb[53].mxu1 }
 0x152   : > { %v12917_v17 = vpop.f32.mrb[54].mxu1 }
 0x153   : > { %v10164_v25 = vpop.f32.mrb[55].mxu1 }
 0x154   : > { %v15138_v25 = vmax.f32 %v12721_v57, %v12812_v45 }
 0x155   : > { %10338 = vmatmul.mubr.msk.bf16.gmra.mrb[160].mxu1 %vm128_vm7, %v11930_v29  ;;  %v10297_v29 = vpop.f32.mrb[37].mxu0 }
 0x156   : > { %10341 = vmatprep.mubr.msk.bf16.mxu1 %vm12417_vm6, %v15126_v12  ;;  %v12941_v4 = vpop.f32.mrb[38].mxu0  ;;  %v11948_v29 = vld [vmem:[%s15115_s2 + $0x40] sm:$0xff]  }
 0x157   : > { %v10298_v12 = vpop.f32.mrb[39].mxu0  ;;  %10742 = vmatpush3.bf16.msra.mxu1 %v11948_v29 }
 0x158   : > { %v516_v31 = vpop.f32.mrb[56].mxu1  ;;  %v12951_v45 = vpop.f32.mrb[40].mxu0  ;;  %10743 = vmatprep.subr.bf16.mxu1 %v15139_v54 }
 0x159   : > { %v12931_v3 = vmax.f32 %v398_v42, %v516_v31  ;;  %v10169_v53 = vpop.f32.mrb[57].mxu1  ;;  %v15140_v42 = vmax.f32 %v12726_v59, %v12820_v48  ;;  %v10301_v12 = vpop.f32.mrb[41].mxu0 }
 0x15a   : > { %v519_v46 = vpop.f32.mrb[58].mxu1 }
 0x15b   : > { %v12939_v38 = vmax.f32 %v15138_v25, %v519_v46  ;;  %v10170_v63 = vpop.f32.mrb[59].mxu1  ;;  %v15141_v46 = vmax.f32 %v12729_v62, %v12825_v52 }
 0x15c   : > { %v12958_v63 = vpop.f32.mrb[42].mxu0 }
 0x15d   : > { %10342 = vmatmul.mubr.msk.bf16.gmra.mrb[164].mxu1 %vm128_vm7, %v11931_v49  ;;  %v10302_v59 = vpop.f32.mrb[43].mxu0  ;;  %vm5381_vm7 = vsmask.f32 2304 }
 0x15e   : > { %10757 = vmatprep.mubr.msk.bf16.mxu1 %vm12417_vm6, %v15139_v54  ;;  %v11949_v59 = vld [vmem:[%s15115_s2 + $0x48] sm:$0xff]  }
 0x15f   : > { %10744 = vmatpush3.bf16.msra.mxu1 %v11949_v59  ;;  %v11950_v59 = vld [vmem:[%s15115_s2 + $0x50] sm:$0xff]  }
 0x160   : > { %v524_v40 = vpop.f32.mrb[60].mxu1  ;;  %10745 = vmatprep.subr.bf16.mxu1 %v15139_v54 }
 0x161   : > { %v12949_v53 = vmax.f32 %v15140_v42, %v524_v40  ;;  %v10173_v31 = vpop.f32.mrb[61].mxu1  ;;  %v15142_v40 = vmax.f32 %v12736_v0, %v12834_v60 }
 0x162   : > { %v527_v57 = vpop.f32.mrb[62].mxu1  ;;  %v12969_v31 = vpop.f32.mrb[44].mxu0 }
 0x163   : > { %v12956_v25 = vmax.f32 %v15141_v46, %v527_v57  ;;  %v10174_v49 = vpop.f32.mrb[63].mxu1  ;;  %v15143_v57 = vmax.f32 %v12739_v9, %v12841_v11  ;;  %v10305_v12 = vpop.f32.mrb[45].mxu0  ;;  %10746 = vmatpush3.bf16.msra.mxu1 %v11950_v59 }
 0x164   : > { %v12976_v29 = vpop.f32.mrb[46].mxu0  ;;  %10747 = vmatprep.subr.bf16.mxu1 %v15139_v54 }
 0x165   : > { %v10306_v0 = vpop.f32.mrb[47].mxu0 }
 0x168   : > { %v532_v48 = vpop.f32.mrb[64].mxu1 }
 0x169   : > { %v12967_v42 = vmax.f32 %v15142_v40, %v532_v48  ;;  %v10177_v62 = vpop.f32.mrb[65].mxu1  ;;  %v15144_v48 = vmax.f32 %v12744_v14, %v12854_v27 }
 0x16a   : > { %v535_v52 = vpop.f32.mrb[66].mxu1  ;;  %v12987_v62 = vpop.f32.mrb[48].mxu0 }
 0x16b   : > { %v12974_v46 = vmax.f32 %v15143_v57, %v535_v52  ;;  %v10178_v49 = vpop.f32.mrb[67].mxu1  ;;  %v15145_v52 = vmax.f32 %v12747_v16, %v12861_v35  ;;  %v10309_v12 = vpop.f32.mrb[49].mxu0 }
 0x16c   : > { %v12997_v0 = vpop.f32.mrb[50].mxu0  ;;  %v11951_v12 = vld [vmem:[%s15115_s2 + $0x58] sm:$0xff]  }
 0x16d   : > { %v10310_v14 = vpop.f32.mrb[51].mxu0  ;;  %10748 = vmatpush3.bf16.msra.mxu1 %v11951_v12 }
 0x16e   : > { %10749 = vmatprep.subr.bf16.mxu1 %v15139_v54 }
 0x170   : > { %v540_v60 = vpop.f32.mrb[68].mxu1 }
 0x171   : > { %v12985_v40 = vmax.f32 %v15144_v48, %v540_v60  ;;  %v10181_v9 = vpop.f32.mrb[69].mxu1  ;;  %v15146_v60 = vmax.f32 %v12756_v19, %v12874_v51 }
 0x172   : > { %v543_v11 = vpop.f32.mrb[70].mxu1  ;;  %v13005_v9 = vpop.f32.mrb[52].mxu0 }
 0x173   : > { %v12992_v57 = vmax.f32 %v15145_v52, %v543_v11  ;;  %v10182_v49 = vpop.f32.mrb[71].mxu1  ;;  %v15147_v11 = vmax.f32 %v12762_v23, %v12881_v18  ;;  %v10313_v59 = vpop.f32.mrb[53].mxu0 }
 0x174   : > { %v13015_v14 = vpop.f32.mrb[54].mxu0 }
 0x175   : > { %v10314_v19 = vpop.f32.mrb[55].mxu0 }
 0x176   : > { %v15151_v19 = vmax.f32 %v12794_v37, %v12917_v17 }
 0x178   : > { %v548_v27 = vpop.f32.mrb[72].mxu1 }
 0x179   : > { %v13003_v48 = vmax.f32 %v15146_v60, %v548_v27  ;;  %v10185_v16 = vpop.f32.mrb[73].mxu1  ;;  %v15148_v27 = vmax.f32 %v12772_v26, %v12894_v44  ;;  %v11956_v26 = vld [vmem:[%s15115_s2 + $0x68] sm:$0xff]   ;;  %v15150_v44 = vmax.f32 %v12788_v33, %v12912_v13  ;;  %v11962_v13 = vld [vmem:[%s15115_s2 + $0x78] sm:$0xff]  }
 0x17a   : > { %v551_v35 = vpop.f32.mrb[74].mxu1  ;;  %v15149_v16 = vmax.f32 %v12778_v30, %v12901_v1 }
 0x17b   : > { %v13010_v52 = vmax.f32 %v15147_v11, %v551_v35  ;;  %v10186_v49 = vpop.f32.mrb[75].mxu1 }
 0x17c   : > { %v11953_v49 = vld [vmem:[%s15115_s2 + $0x60] sm:$0xff]  }
 0x17d   : > { %10750 = vmatpush3.bf16.msra.mxu1 %v11953_v49 }
 0x17e   : > { %10751 = vmatprep.subr.bf16.mxu1 %v15139_v54 }
 0x180   : > { %v556_v51 = vpop.f32.mrb[76].mxu1 }
 0x181   : > { %v13021_v60 = vmax.f32 %v15148_v27, %v556_v51  ;;  %v10189_v23 = vpop.f32.mrb[77].mxu1  ;;  %10752 = vmatpush3.bf16.msra.mxu1 %v11956_v26  ;;  %v13056_v26 = vld [vmem:[#allocation2] sm:$0xff] }
 0x182   : > { %v559_v18 = vpop.f32.mrb[78].mxu1  ;;  %10753 = vmatprep.subr.bf16.mxu1 %v15139_v54  ;;  %v11959_v23 = vld [vmem:[%s15115_s2 + $0x70] sm:$0xff]  }
 0x183   : > { %v13026_v35 = vmax.f32 %v15149_v16, %v559_v18  ;;  %v10190_v11 = vpop.f32.mrb[79].mxu1 }
 0x185   : > { %10754 = vmatpush3.bf16.msra.mxu1 %v11959_v23 }
 0x186   : > { %10755 = vmatprep.subr.bf16.mxu1 %v15139_v54 }
 0x188   : > { %v564_v12 = vpop.f32.mrb[80].mxu1 }
 0x189   : > { %v13038_v59 = vmax.f32 %v15150_v44, %v564_v12  ;;  %v10193_v1 = vpop.f32.mrb[81].mxu1  ;;  %10756 = vmatpush3.bf16.msra.mxu1 %v11962_v13 }
 0x18a   : > { %v567_v30 = vpop.f32.mrb[82].mxu1  ;;  %10785 = vmatprep.subr.bf16.mxu1 %v15139_v54 }
 0x18b   : > { %v13043_v51 = vmax.f32 %v15151_v19, %v567_v30  ;;  %v10194_v27 = vpop.f32.mrb[83].mxu1  ;;  %v1673_v30 = vshll.u32 %v13056_v26, 16 }
 0x190   : > { %v689_v33 = vpop.f32.mrb[84].mxu1 }
 0x191   : > { %v744_v18 = vmax.f32 %v12931_v3, %v689_v33  ;;  %v10199_v37 = vpop.f32.mrb[85].mxu1 }
 0x192   : > { %v692_v17 = vpop.f32.mrb[86].mxu1 }
 0x193   : > { %v745_v16 = vmax.f32 %v12939_v38, %v692_v17  ;;  %v10200_v11 = vpop.f32.mrb[87].mxu1  ;;  %v758_v49 = vmax.f32 %v744_v18, 0.0  ;;  %v842_v17 = vld [vmem:[#allocation2 + $0x8] sm:$0xff]  ;;  %v1671_v18 = vshrl.u32 %v13056_v26, 16 }
 0x195   : > { %v759_v12 = vmax.f32 %v745_v16, 0.0  ;;  %v1675_v16 = vrot.slane %v1673_v30, 1 }
 0x197   : > { %v772_v44 = vpack.c.bf16 %v759_v12, %v758_v49 }
 0x198   : > { %v697_v1 = vpop.f32.mrb[88].mxu1 }
 0x199   : > { %v780_v19 = vshrl.u32 %v772_v44, 16  ;;  %v746_v27 = vmax.f32 %v12949_v53, %v697_v1  ;;  %v10203_v3 = vpop.f32.mrb[89].mxu1  ;;  %v783_v13 = vshll.u32 %v772_v44, 16  ;;  %v1676_v1 = vor.u32 %v1675_v16, %v1671_v18 }
 0x19a   : > { %v700_v23 = vpop.f32.mrb[90].mxu1 }
 0x19b   : > { %v782_v33 = vrot.slane %v780_v19, 7  ;;  %v747_v38 = vmax.f32 %v12956_v25, %v700_v23  ;;  %v10204_v37 = vpop.f32.mrb[91].mxu1  ;;  %v760_v7 = vmax.f32 %v746_v27, 0.0  ;;  %v11940_v27 = vld [vmem:[%s15115_s2] sm:$0xff]  }
 0x19d   : > { %v785_v11 = vor.u32 %v783_v13, %v782_v33  ;;  %v761_v49 = vmax.f32 %v747_v38, 0.0 }
 0x19f   : > { %v13064_v12 = vsel %vm12498_vm5, %v785_v11, %v842_v17  ;;  %v773_v10 = vpack.c.bf16 %v761_v49, %v760_v7 }
 0x1a0   : > { %844 = vst [vmem:[#allocation2 + $0x8] sm:$0xff] %v13064_v12  ;;  %v705_v53 = vpop.f32.mrb[92].mxu1  ;;  %v1678_v44 = vshll.u32 %v13064_v12, 16 }
 0x1a1   : > { %v787_v25 = vshrl.u32 %v773_v10, 16  ;;  %v748_v19 = vmax.f32 %v12967_v42, %v705_v53  ;;  %v10207_v3 = vpop.f32.mrb[93].mxu1  ;;  %v790_v38 = vshll.u32 %v773_v10, 16  ;;  %v11941_v42 = vld [vmem:[%s15115_s2 + $0x8] sm:$0xff]   ;;  %v1682_v53 = vshrl.u32 %v13064_v12, 16 }
 0x1a2   : > { %v708_v30 = vpop.f32.mrb[94].mxu1  ;;  %v1680_v23 = vrot.slane %v1678_v44, 1 }
 0x1a3   : > { %v789_v13 = vrot.slane %v787_v25, 7  ;;  %v749_v7 = vmax.f32 %v12974_v46, %v708_v30  ;;  %v10208_v37 = vpop.f32.mrb[95].mxu1  ;;  %v762_v16 = vmax.f32 %v748_v19, 0.0 }
 0x1a4   : > { %v1681_v17 = vsel %vm1669_vm8, %v1676_v1, %v1680_v23  ;;  %v1684_v30 = vor.u32 %v1682_v53, %v1680_v23  ;;  %v11943_v23 = vld [vmem:[%s15115_s2 + $0x18] sm:$0xff]  }
 0x1a5   : > { %v792_v18 = vor.u32 %v790_v38, %v789_v13  ;;  %v763_v11 = vmax.f32 %v749_v7, 0.0  ;;  %10362 = vmatmul.mubr.bf16.vlgmr.msra.gmra.mrb[56].mxu0 %v1681_v17 }
 0x1a6   : > { %10365 = vmatprep.mubr.msk.bf16.mxu0 %vm12417_vm6, %v15139_v54  ;;  %10390 = vmatpush3.bf16.msra.mxu0 %v11940_v27 }
 0x1a7   : > { %v13080_v49 = vsel %vm38_vm1, %v782_v33, %v792_v18  ;;  %v774_v10 = vpack.c.bf16 %v763_v11, %v762_v16  ;;  %10391 = vmatprep.subr.bf16.mxu0 %v15139_v54  ;;  %v11942_v33 = vld [vmem:[%s15115_s2 + $0x10] sm:$0xff]  }
 0x1a8   : > { %845 = vst [vmem:[#allocation2 + $0x10] sm:$0xff] %v13080_v49  ;;  %v713_v46 = vpop.f32.mrb[96].mxu1  ;;  %v1686_v1 = vshll.u32 %v13080_v49, 16  ;;  %v1690_v53 = vshrl.u32 %v13080_v49, 16 }
 0x1a9   : > { %v795_v44 = vshrl.u32 %v774_v10, 16  ;;  %v750_v25 = vmax.f32 %v12985_v40, %v713_v46  ;;  %v10211_v19 = vpop.f32.mrb[97].mxu1  ;;  %v798_v7 = vshll.u32 %v774_v10, 16 }
 0x1aa   : > { %v716_v3 = vpop.f32.mrb[98].mxu1  ;;  %v1688_v27 = vrot.slane %v1686_v1, 1  ;;  %10392 = vmatpush3.bf16.msra.mxu0 %v11941_v42 }
 0x1ab   : > { %v797_v38 = vrot.slane %v795_v44, 7  ;;  %v751_v37 = vmax.f32 %v12992_v57, %v716_v3  ;;  %v10212_v17 = vpop.f32.mrb[99].mxu1  ;;  %10393 = vmatprep.subr.bf16.mxu0 %v15139_v54  ;;  %v764_v40 = vmax.f32 %v750_v25, 0.0 }
 0x1ac   : > { %v1689_v18 = vsel %vm1669_vm8, %v1684_v30, %v1688_v27 }
 0x1ad   : > { %v800_v16 = vor.u32 %v798_v7, %v797_v38  ;;  %v765_v11 = vmax.f32 %v751_v37, 0.0  ;;  %10366 = vmatmul.mubr.bf16.gmra.mrb[60].mxu0 %v1689_v18  ;;  %v11944_v7 = vld [vmem:[%s15115_s2 + $0x20] sm:$0xff]  }
 0x1ae   : > { %10369 = vmatprep.mubr.msk.bf16.mxu0 %vm12417_vm6, %v15139_v54  ;;  %10394 = vmatpush3.bf16.msra.mxu0 %v11942_v33  ;;  %v1692_v33 = vor.u32 %v1690_v53, %v1688_v27 }
 0x1af   : > { %v13099_v42 = vsel %vm38_vm1, %v789_v13, %v800_v16  ;;  %v775_v57 = vpack.c.bf16 %v765_v11, %v764_v40  ;;  %10395 = vmatprep.subr.bf16.mxu0 %v15139_v54  ;;  %v2381_v10 = vld [vmem:[#allocation2 + $0x10] sm:$0xff] }
 0x1b0   : > { %846 = vst [vmem:[#allocation2 + $0x18] sm:$0xff] %v13099_v42  ;;  %v721_v46 = vpop.f32.mrb[100].mxu1  ;;  %v1694_v1 = vshll.u32 %v13099_v42, 16  ;;  %v2413_v44 = vshll.u32 %v2381_v10, 16  ;;  %v2417_v11 = vshrl.u32 %v2381_v10, 16 }
 0x1b1   : > { %v803_v25 = vshrl.u32 %v775_v57, 16  ;;  %v752_v19 = vmax.f32 %v13003_v48, %v721_v46  ;;  %v10215_v3 = vpop.f32.mrb[101].mxu1  ;;  %v806_v18 = vshll.u32 %v775_v57, 16 }
 0x1b2   : > { %v724_v30 = vpop.f32.mrb[102].mxu1  ;;  %v1696_v13 = vrot.slane %v1694_v1, 1  ;;  %10396 = vmatpush3.bf16.msra.mxu0 %v11943_v23  ;;  %v13109_v37 = vrot.slane %v2413_v44, 1 }
 0x1b3   : > { %v805_v17 = vrot.slane %v803_v25, 7  ;;  %v753_v16 = vmax.f32 %v13010_v52, %v724_v30  ;;  %v10216_v40 = vpop.f32.mrb[103].mxu1  ;;  %10397 = vmatprep.subr.bf16.mxu0 %v15139_v54  ;;  %v766_v27 = vmax.f32 %v752_v19, 0.0  ;;  %v11945_v52 = vld [vmem:[%s15115_s2 + $0x28] sm:$0xff]   ;;  %v1698_v25 = vshrl.u32 %v13099_v42, 16 }
 0x1b4   : > { %v1697_v48 = vsel %vm1669_vm8, %v1692_v33, %v1696_v13  ;;  %v3022_v23 = vor.u32 %v2417_v11, %v13109_v37  ;;  %v11946_v40 = vld [vmem:[%s15115_s2 + $0x30] sm:$0xff]  }
 0x1b5   : > { %v808_v46 = vor.u32 %v806_v18, %v805_v17  ;;  %v767_v53 = vmax.f32 %v753_v16, 0.0  ;;  %10370 = vmatmul.mubr.bf16.gmra.mrb[64].mxu0 %v1697_v48  ;;  %v1700_v16 = vor.u32 %v1698_v25, %v1696_v13 }
 0x1b6   : > { %10373 = vmatprep.mubr.msk.bf16.mxu0 %vm12417_vm6, %v15139_v54  ;;  %10398 = vmatpush3.bf16.msra.mxu0 %v11944_v7 }
 0x1b7   : > { %v13121_v57 = vsel %vm38_vm1, %v797_v38, %v808_v46  ;;  %v776_v10 = vpack.c.bf16 %v767_v53, %v766_v27  ;;  %10399 = vmatprep.subr.bf16.mxu0 %v15139_v54  ;;  %v2382_v1 = vld [vmem:[#allocation2 + $0x18] sm:$0xff] }
 0x1b8   : > { %847 = vst [vmem:[#allocation2 + $0x20] sm:$0xff] %v13121_v57  ;;  %v729_v44 = vpop.f32.mrb[104].mxu1  ;;  %v1702_v19 = vshll.u32 %v13121_v57, 16  ;;  %v2421_v7 = vshll.u32 %v2382_v1, 16 }
 0x1b9   : > { %v811_v3 = vshrl.u32 %v776_v10, 16  ;;  %v754_v30 = vmax.f32 %v13021_v60, %v729_v44  ;;  %v10219_v33 = vpop.f32.mrb[105].mxu1  ;;  %v814_v48 = vshll.u32 %v776_v10, 16 }
 0x1ba   : > { %v732_v18 = vpop.f32.mrb[106].mxu1  ;;  %v1704_v38 = vrot.slane %v1702_v19, 1  ;;  %10400 = vmatpush3.bf16.msra.mxu0 %v11945_v52  ;;  %v13133_v53 = vrot.slane %v2421_v7, 1  ;;  %v11947_v52 = vld [vmem:[%s15115_s2 + $0x38] sm:$0xff]  }
 0x1bb   : > { %v813_v11 = vrot.slane %v811_v3, 7  ;;  %v755_v46 = vmax.f32 %v13026_v35, %v732_v18  ;;  %v10220_v27 = vpop.f32.mrb[107].mxu1  ;;  %10401 = vmatprep.subr.bf16.mxu0 %v15139_v54  ;;  %v768_v44 = vmax.f32 %v754_v30, 0.0  ;;  %v1706_v3 = vshrl.u32 %v13121_v57, 16 }
 0x1bc   : > { %v1705_v60 = vsel %vm1669_vm8, %v1700_v16, %v1704_v38  ;;  %v13143_v35 = vsel %vm1669_vm8, %v3022_v23, %v13133_v53 }
 0x1bd   : > { %v816_v1 = vor.u32 %v814_v48, %v813_v11  ;;  %v769_v13 = vmax.f32 %v755_v46, 0.0  ;;  %10374 = vmatmul.mubr.bf16.gmra.mrb[68].mxu0 %v1705_v60  ;;  %v1708_v23 = vor.u32 %v1706_v3, %v1704_v38 }
 0x1be   : > { %10377 = vmatprep.mubr.msk.bf16.mxu0 %vm12417_vm6, %v15139_v54  ;;  %10402 = vmatpush3.bf16.msra.mxu0 %v11946_v40 }
 0x1bf   : > { %v13146_v10 = vsel %vm38_vm1, %v805_v17, %v816_v1  ;;  %v777_v25 = vpack.c.bf16 %v769_v13, %v768_v44  ;;  %10403 = vmatprep.subr.bf16.mxu0 %v15139_v54 }
 0x1c0   : > { %848 = vst [vmem:[#allocation2 + $0x28] sm:$0xff] %v13146_v10  ;;  %v737_v19 = vpop.f32.mrb[108].mxu1  ;;  %v1710_v30 = vshll.u32 %v13146_v10, 16 }
 0x1c1   : > { %v819_v33 = vshrl.u32 %v777_v25, 16  ;;  %v756_v7 = vmax.f32 %v13038_v59, %v737_v19  ;;  %v10223_v18 = vpop.f32.mrb[109].mxu1  ;;  %v822_v48 = vshll.u32 %v777_v25, 16 }
 0x1c2   : > { %v740_v16 = vpop.f32.mrb[110].mxu1  ;;  %v1712_v40 = vrot.slane %v1710_v30, 1  ;;  %10404 = vmatpush3.bf16.msra.mxu0 %v11947_v52 }
 0x1c3   : > { %v821_v17 = vrot.slane %v819_v33, 7  ;;  %v757_v46 = vmax.f32 %v13043_v51, %v740_v16  ;;  %v10224_v27 = vpop.f32.mrb[111].mxu1  ;;  %10433 = vmatprep.subr.bf16.mxu0 %v15139_v54  ;;  %v770_v44 = vmax.f32 %v756_v7, 0.0  ;;  %v1714_v51 = vshrl.u32 %v13146_v10, 16  ;;  %v851_v33 = vld [vmem:[#allocation2 + $0x40] sm:$0x1] }
 0x1c4   : > { %v1713_v60 = vsel %vm1669_vm8, %v1708_v23, %v1712_v40 }
 0x1c5   : > { %v824_v1 = vor.u32 %v822_v48, %v821_v17  ;;  %v771_v13 = vmax.f32 %v757_v46, 0.0  ;;  %10378 = vmatmul.mubr.bf16.gmra.mrb[72].mxu0 %v1713_v60  ;;  %v1716_v18 = vor.u32 %v1714_v51, %v1712_v40 }
 0x1c6   : > { %10381 = vmatprep.mubr.msk.bf16.mxu0 %vm12417_vm6, %v15139_v54 }
 0x1c7   : > { %v13159_v59 = vsel %vm38_vm1, %v813_v11, %v824_v1  ;;  %v778_v38 = vpack.c.bf16 %v771_v13, %v770_v44 }
 0x1c8   : > { %849 = vst [vmem:[#allocation2 + $0x30] sm:$0xff] %v13159_v59  ;;  %v1117_v52 = vpop.f32.mrb[112].mxu1  ;;  %v1718_v25 = vshll.u32 %v13159_v59, 16 }
 0x1c9   : > { %v827_v19 = vshrl.u32 %v778_v38, 16  ;;  %v1172_v3 = vmax.f32 %v12832_v56, %v1117_v52  ;;  %v10259_v30 = vpop.f32.mrb[113].mxu1  ;;  %v830_v48 = vshll.u32 %v778_v38, 16 }
 0x1ca   : > { %v1120_v7 = vpop.f32.mrb[114].mxu1  ;;  %v1720_v16 = vrot.slane %v1718_v25, 1 }
 0x1cb   : > { %v829_v23 = vrot.slane %v827_v19, 7  ;;  %v1173_v11 = vmax.f32 %v12836_v61, %v1120_v7  ;;  %v13167_v46 = vmax.f32 %v1172_v3, %v12903_v5  ;;  %v10260_v27 = vpop.f32.mrb[115].mxu1  ;;  %v1722_v3 = vshrl.u32 %v13159_v59, 16 }
 0x1cc   : > { %v1721_v60 = vsel %vm1669_vm8, %v1716_v18, %v1720_v16 }
 0x1cd   : > { %v832_v1 = vor.u32 %v830_v48, %v829_v23  ;;  %v852_v44 = vsel %vm12487_vm2, %v829_v23, %v851_v33  ;;  %v13173_v56 = vmax.f32 %v1173_v11, %v12907_v58  ;;  %10382 = vmatmul.mubr.bf16.gmra.mrb[76].mxu0 %v1721_v60  ;;  %v1724_v18 = vor.u32 %v1722_v3, %v1720_v16 }
 0x1ce   : > { %853 = vst [vmem:[#allocation2 + $0x40] sm:$0x1] %v852_v44  ;;  %10385 = vmatprep.mubr.msk.bf16.mxu0 %vm12417_vm6, %v15139_v54 }
 0x1cf   : > { %v13178_v61 = vsel %vm38_vm1, %v821_v17, %v832_v1 }
 0x1d0   : > { %850 = vst [vmem:[#allocation2 + $0x38] sm:$0xff] %v13178_v61  ;;  %v1125_v5 = vpop.f32.mrb[116].mxu1 }
 0x1d1   : > { %v1174_v40 = vmax.f32 %v12843_v15, %v1125_v5  ;;  %v10263_v13 = vpop.f32.mrb[117].mxu1 }
 0x1d2   : > { %v1128_v38 = vpop.f32.mrb[118].mxu1 }
 0x1d3   : > { %v1175_v52 = vmax.f32 %v12847_v21, %v1128_v38  ;;  %v13184_v58 = vmax.f32 %v1174_v40, %v12919_v22  ;;  %v10264_v51 = vpop.f32.mrb[119].mxu1 }
 0x1d5   : > { %v13187_v25 = vmax.f32 %v1175_v52, %v12923_v34 }
 0x1d7   : > { %v13189_v19 = vld [vmem:[#allocation2 + $0x38] sm:$0x1] }
 0x1d8   : > { %v1133_v17 = vpop.f32.mrb[120].mxu1  ;;  %v1726_v30 = vshll.u32 %v13189_v19, 16 }
 0x1d9   : > { %v1176_v15 = vmax.f32 %v12852_v24, %v1133_v17  ;;  %v10267_v33 = vpop.f32.mrb[121].mxu1 }
 0x1da   : > { %v1136_v7 = vpop.f32.mrb[122].mxu1  ;;  %v1728_v21 = vrot.slane %v1726_v30, 1 }
 0x1db   : > { %v1177_v22 = vmax.f32 %v12856_v28, %v1136_v7  ;;  %v13196_v23 = vmax.f32 %v1176_v15, %v12934_v41  ;;  %v10268_v34 = vpop.f32.mrb[123].mxu1  ;;  %v11952_v28 = vld [vmem:[%s15115_s2 + $0x80] sm:$0xff]  }
 0x1dc   : > { %v1729_v48 = vsel %vm1669_vm8, %v1724_v18, %v1728_v21 }
 0x1dd   : > { %v13200_v11 = vmax.f32 %v1177_v22, %v12941_v4  ;;  %10386 = vmatmul.mubr.bf16.gmra.mrb[80].mxu0 %v1729_v48 }
 0x1de   : > { %10405 = vmatprep.mubr.msk.bf16.mxu0 %vm12417_vm6, %v15139_v54 }
 0x1e0   : > { %v1141_v24 = vpop.f32.mrb[124].mxu1 }
 0x1e1   : > { %v1178_v27 = vmax.f32 %v12863_v36, %v1141_v24  ;;  %v10271_v16 = vpop.f32.mrb[125].mxu1  ;;  %v11954_v36 = vld [vmem:[%s15115_s2 + $0x88] sm:$0xff]  }
 0x1e2   : > { %v1144_v60 = vpop.f32.mrb[126].mxu1 }
 0x1e3   : > { %v1179_v41 = vmax.f32 %v12867_v43, %v1144_v60  ;;  %v13210_v1 = vmax.f32 %v1178_v27, %v12951_v45  ;;  %v10272_v4 = vpop.f32.mrb[127].mxu1 }
 0x1e5   : > { %v13213_v44 = vmax.f32 %v1179_v41, %v12958_v63  ;;  %10406 = vmatmul.mubr.bf16.vlgmr.msra.gmra.mrb[56].mxu0 %v13056_v26  ;;  %v11955_v63 = vld [vmem:[%s15115_s2 + $0x90] sm:$0xff]  }
 0x1e6   : > { %10409 = vmatprep.mubr.msk.bf16.mxu0 %vm12417_vm6, %v15139_v54  ;;  %10434 = vmatpush3.bf16.msra.mxu0 %v11952_v28 }
 0x1e7   : > { %10435 = vmatprep.subr.bf16.mxu0 %v15139_v54 }
 0x1e8   : > { %v1149_v43 = vpop.f32.mrb[128].mxu1 }
 0x1e9   : > { %v1180_v45 = vmax.f32 %v12872_v47, %v1149_v43  ;;  %v10275_v5 = vpop.f32.mrb[129].mxu1  ;;  %v11957_v47 = vld [vmem:[%s15115_s2 + $0x98] sm:$0xff]  }
 0x1ea   : > { %v1152_v40 = vpop.f32.mrb[130].mxu1  ;;  %10436 = vmatpush3.bf16.msra.mxu0 %v11954_v36  ;;  %v3490_v5 = vshll.u32 %v13178_v61, 16 }
 0x1eb   : > { %v1181_v26 = vmax.f32 %v12876_v55, %v1152_v40  ;;  %v13228_v13 = vmax.f32 %v1180_v45, %v12969_v31  ;;  %v10276_v38 = vpop.f32.mrb[131].mxu1  ;;  %10437 = vmatprep.subr.bf16.mxu0 %v15139_v54 }
 0x1ed   : > { %v13232_v52 = vmax.f32 %v1181_v26, %v12976_v29  ;;  %10410 = vmatmul.mubr.bf16.gmra.mrb[60].mxu0 %v13064_v12  ;;  %v11958_v29 = vld [vmem:[%s15115_s2 + $0xa0] sm:$0xff]  }
 0x1ee   : > { %10413 = vmatprep.mubr.msk.bf16.mxu0 %vm12417_vm6, %v15139_v54  ;;  %10438 = vmatpush3.bf16.msra.mxu0 %v11955_v63 }
 0x1ef   : > { %10439 = vmatprep.subr.bf16.mxu0 %v15139_v54 }
 0x1f0   : > { %v1157_v55 = vpop.f32.mrb[132].mxu1 }
 0x1f1   : > { %v1182_v31 = vmax.f32 %v12883_v20, %v1157_v55  ;;  %v10279_v51 = vpop.f32.mrb[133].mxu1  ;;  %v11960_v20 = vld [vmem:[%s15115_s2 + $0xa8] sm:$0xff]  }
 0x1f2   : > { %v1160_v17 = vpop.f32.mrb[134].mxu1  ;;  %10440 = vmatpush3.bf16.msra.mxu0 %v11957_v47  ;;  %v3492_v51 = vrot.slane %v3490_v5, 1 }
 0x1f3   : > { %v1183_v3 = vmax.f32 %v12887_v32, %v1160_v17  ;;  %v13247_v30 = vmax.f32 %v1182_v31, %v12987_v62  ;;  %v10280_v15 = vpop.f32.mrb[135].mxu1  ;;  %10441 = vmatprep.subr.bf16.mxu0 %v15139_v54  ;;  %v1616_v31 = vld [vmem:[#allocation2 + $0x40] sm:$0xff] }
 0x1f5   : > { %v13251_v33 = vmax.f32 %v1183_v3, %v12997_v0  ;;  %10414 = vmatmul.mubr.bf16.gmra.mrb[64].mxu0 %v13080_v49  ;;  %v11961_v0 = vld [vmem:[%s15115_s2 + $0xb0] sm:$0xff]  }
 0x1f6   : > { %10417 = vmatprep.mubr.msk.bf16.mxu0 %vm12417_vm6, %v15139_v54  ;;  %10442 = vmatpush3.bf16.msra.mxu0 %v11958_v29 }
 0x1f7   : > { %10443 = vmatprep.subr.bf16.mxu0 %v15139_v54 }
 0x1f8   : > { %v1165_v32 = vpop.f32.mrb[136].mxu1 }
 0x1f9   : > { %v1184_v62 = vmax.f32 %v12892_v39, %v1165_v32  ;;  %v10283_v7 = vpop.f32.mrb[137].mxu1  ;;  %v11963_v39 = vld [vmem:[%s15115_s2 + $0xb8] sm:$0xff]  }
 0x1fa   : > { %v1168_v18 = vpop.f32.mrb[138].mxu1  ;;  %10444 = vmatpush3.bf16.msra.mxu0 %v11960_v20 }
 0x1fb   : > { %v1185_v21 = vmax.f32 %v12896_v50, %v1168_v18  ;;  %v13266_v22 = vmax.f32 %v1184_v62, %v13005_v9  ;;  %v10284_v34 = vpop.f32.mrb[139].mxu1  ;;  %10445 = vmatprep.subr.bf16.mxu0 %v15139_v54 }
 0x1fd   : > { %v13270_v48 = vmax.f32 %v1185_v21, %v13015_v14  ;;  %10418 = vmatmul.mubr.bf16.gmra.mrb[68].mxu0 %v13099_v42 }
 0x1fe   : > { %10421 = vmatprep.mubr.msk.bf16.mxu0 %vm12417_vm6, %v15139_v54  ;;  %10446 = vmatpush3.bf16.msra.mxu0 %v11961_v0  ;;  %v11964_v0 = vld [vmem:[%s15115_s2] sm:$0xff]  }
 0x1ff   : > { %10447 = vmatprep.subr.bf16.mxu0 %v15139_v54 }
 0x200   : > { %v1463_v50 = vpop.f32.mrb[140].mxu1 }
 0x201   : > { %v1518_v9 = vmax.f32 %v13167_v46, %v1463_v50  ;;  %v10319_v24 = vpop.f32.mrb[141].mxu1 }
 0x202   : > { %v1466_v27 = vpop.f32.mrb[142].mxu1  ;;  %10448 = vmatpush3.bf16.msra.mxu0 %v11963_v39 }
 0x203   : > { %v1519_v14 = vmax.f32 %v13173_v56, %v1466_v27  ;;  %v10320_v16 = vpop.f32.mrb[143].mxu1  ;;  %10477 = vmatprep.subr.bf16.mxu0 %v15139_v54  ;;  %v1532_v60 = vmax.f32 %v1518_v9, 0.0 }
 0x204   : > { %v11965_v16 = vld [vmem:[%s15115_s2 + $0x8] sm:$0xff]  }
 0x205   : > { %v1533_v28 = vmax.f32 %v1519_v14, 0.0  ;;  %10422 = vmatmul.mubr.bf16.gmra.mrb[72].mxu0 %v13121_v57 }
 0x206   : > { %10425 = vmatprep.mubr.msk.bf16.mxu0 %vm12417_vm6, %v15139_v54 }
 0x207   : > { %v1546_v41 = vpack.c.bf16 %v1533_v28, %v1532_v60 }
 0x208   : > { %v1471_v4 = vpop.f32.mrb[144].mxu1 }
 0x209   : > { %v1554_v36 = vshrl.u32 %v1546_v41, 16  ;;  %v1520_v46 = vmax.f32 %v13184_v58, %v1471_v4  ;;  %v10323_v43 = vpop.f32.mrb[145].mxu1  ;;  %v1557_v40 = vshll.u32 %v1546_v41, 16 }
 0x20a   : > { %v1474_v45 = vpop.f32.mrb[146].mxu1 }
 0x20b   : > { %v1556_v56 = vrot.slane %v1554_v36, 7  ;;  %v1521_v63 = vmax.f32 %v13187_v25, %v1474_v45  ;;  %v10324_v26 = vpop.f32.mrb[147].mxu1  ;;  %v1534_v47 = vmax.f32 %v1520_v46, 0.0  ;;  %v3488_v25 = vshrl.u32 %v13178_v61, 16 }
 0x20c   : > { %v2039_v36 = vrot.slane %v13064_v12, 1 }
 0x20d   : > { %v1559_v38 = vor.u32 %v1557_v40, %v1556_v56  ;;  %v1535_v55 = vmax.f32 %v1521_v63, 0.0  ;;  %10426 = vmatmul.mubr.bf16.gmra.mrb[76].mxu0 %v13146_v10  ;;  %v3493_v7 = vor.u32 %v3492_v51, %v3488_v25 }
 0x20e   : > { %10429 = vmatprep.mubr.msk.bf16.mxu0 %vm12417_vm6, %v15139_v54 }
 0x20f   : > { %v13293_v58 = vsel %vm12498_vm5, %v1559_v38, %v1616_v31  ;;  %v1547_v17 = vpack.c.bf16 %v1535_v55, %v1534_v47  ;;  %v11966_v38 = vld [vmem:[%s15115_s2 + $0x10] sm:$0xff]  }
 0x210   : > { %1618 = vst [vmem:[#allocation2 + $0x40] sm:$0xff] %v13293_v58  ;;  %v1479_v29 = vpop.f32.mrb[148].mxu1  ;;  %v3495_v3 = vshll.u32 %v13293_v58, 16  ;;  %v3499_v46 = vshrl.u32 %v13293_v58, 16 }
 0x211   : > { %v1561_v15 = vshrl.u32 %v1547_v17, 16  ;;  %v1522_v20 = vmax.f32 %v13196_v23, %v1479_v29  ;;  %v10327_v32 = vpop.f32.mrb[149].mxu1  ;;  %v1564_v34 = vshll.u32 %v1547_v17, 16  ;;  %v2011_v23 = vld [vmem:[#allocation2] sm:$0xfe] }
 0x212   : > { %v1482_v62 = vpop.f32.mrb[150].mxu1  ;;  %v3497_v18 = vrot.slane %v3495_v3, 1  ;;  %v2038_v4 = vrot.slane %v2011_v23, 1  ;;  %v11968_v29 = vld [vmem:[%s15115_s2 + $0xc0] sm:$0xff]  }
 0x213   : > { %v1563_v21 = vrot.slane %v1561_v15, 7  ;;  %v1523_v39 = vmax.f32 %v13200_v11, %v1482_v62  ;;  %v10328_v50 = vpop.f32.mrb[151].mxu1  ;;  %v1536_v27 = vmax.f32 %v1522_v20, 0.0 }
 0x214   : > { %v3498_v9 = vsel %vm1669_vm8, %v3493_v7, %v3497_v18  ;;  %v3501_v63 = vor.u32 %v3499_v46, %v3497_v18 }
 0x215   : > { %v1566_v24 = vor.u32 %v1564_v34, %v1563_v21  ;;  %v1537_v14 = vmax.f32 %v1523_v39, 0.0  ;;  %10430 = vmatmul.mubr.bf16.gmra.mrb[80].mxu0 %v13159_v59  ;;  %10758 = vmatmul.mubr.bf16.vlgmr.msra.gmra.mrb[168].mxu1 %v3498_v9  ;;  %v2041_v39 = vrot.slane %v13080_v49, 1 }
 0x216   : > { %10449 = vmatprep.mubr.msk.bf16.mxu0 %vm12417_vm6, %v15139_v54  ;;  %10786 = vmatpush3.bf16.msra.mxu1 %v11964_v0 }
 0x217   : > { %v13311_v11 = vsel %vm38_vm1, %v1556_v56, %v1566_v24  ;;  %v1548_v60 = vpack.c.bf16 %v1537_v14, %v1536_v27  ;;  %10787 = vmatprep.subr.bf16.mxu1 %v15139_v54  ;;  %10761 = vmatprep.mubr.msk.bf16.mxu1 %vm12417_vm6, %v15139_v54  ;;  %v13316_v28 = vld [vmem:[#allocation2 + $0x40] sm:$0xff] }
 0x218   : > { %1619 = vst [vmem:[#allocation2 + $0x48] sm:$0xff] %v13311_v11  ;;  %v1487_v41 = vpop.f32.mrb[152].mxu1  ;;  %v3503_v43 = vshll.u32 %v13311_v11, 16  ;;  %v4212_v47 = vshll.u32 %v13316_v28, 16  ;;  %v4210_v25 = vshrl.u32 %v13316_v28, 16  ;;  %v3507_v50 = vshrl.u32 %v13311_v11, 16 }
 0x219   : > { %v1569_v45 = vshrl.u32 %v1548_v60, 16  ;;  %v1524_v5 = vmax.f32 %v13210_v1, %v1487_v41  ;;  %v10331_v56 = vpop.f32.mrb[153].mxu1  ;;  %v1572_v55 = vshll.u32 %v1548_v60, 16  ;;  %v2040_v1 = vsel %vm2037_vm9, %v2038_v4, %v2039_v36 }
 0x21a   : > { %v1490_v40 = vpop.f32.mrb[154].mxu1  ;;  %10788 = vmatpush3.bf16.msra.mxu1 %v11965_v16  ;;  %v3505_v26 = vrot.slane %v3503_v43, 1  ;;  %v13335_v3 = vrot.slane %v4212_v47, 1  ;;  %v2042_v56 = vsel %vm2037_vm9, %v2039_v36, %v2041_v39 }
 0x21b   : > { %v1571_v12 = vrot.slane %v1569_v45, 7  ;;  %v1525_v31 = vmax.f32 %v13213_v44, %v1490_v40  ;;  %v10332_v51 = vpop.f32.mrb[155].mxu1  ;;  %10789 = vmatprep.subr.bf16.mxu1 %v15139_v54  ;;  %v1538_v20 = vmax.f32 %v1524_v5, 0.0  ;;  %v11967_v44 = vld [vmem:[%s15115_s2 + $0x18] sm:$0xff]  }
 0x21c   : > { %v3506_v17 = vsel %vm1669_vm8, %v3501_v63, %v3505_v26  ;;  %v13343_v62 = vor.u32 %v13335_v3, %v4210_v25  ;;  %v3509_v60 = vor.u32 %v3507_v50, %v3505_v26  ;;  %v11971_v63 = vld [vmem:[%s15115_s2 + $0xd0] sm:$0xff]   ;;  %v11972_v51 = vld [vmem:[%s15115_s2 + $0x28] sm:$0xff]  }
 0x21d   : > { %v1574_v15 = vor.u32 %v1572_v55, %v1571_v12  ;;  %v1539_v32 = vmax.f32 %v1525_v31, 0.0  ;;  %10450 = vmatmul.mubr.bf16.vlgmr.msra.gmra.mrb[56].mxu0 %v2040_v1  ;;  %10762 = vmatmul.mubr.bf16.gmra.mrb[172].mxu1 %v3506_v17 }
 0x21e   : > { %10453 = vmatprep.mubr.msk.bf16.mxu0 %vm12417_vm6, %v15139_v54  ;;  %10790 = vmatpush3.bf16.msra.mxu1 %v11966_v38 }
 0x21f   : > { %v13346_v7 = vsel %vm38_vm1, %v1563_v21, %v1574_v15  ;;  %v1549_v18 = vpack.c.bf16 %v1539_v32, %v1538_v20  ;;  %10765 = vmatprep.mubr.msk.bf16.mxu1 %vm12417_vm6, %v15139_v54  ;;  %10791 = vmatprep.subr.bf16.mxu1 %v15139_v54  ;;  %v13351_v0 = vld [vmem:[#allocation2 + $0x48] sm:$0xff]  ;;  %v11973_v15 = vld [vmem:[%s15115_s2 + $0xd8] sm:$0xff]  }
 0x220   : > { %1620 = vst [vmem:[#allocation2 + $0x50] sm:$0xff] %v13346_v7  ;;  %v1495_v34 = vpop.f32.mrb[156].mxu1  ;;  %v3511_v9 = vshll.u32 %v13346_v7, 16  ;;  %10478 = vmatpush3.bf16.msra.mxu0 %v11968_v29  ;;  %v11970_v21 = vld [vmem:[%s15115_s2 + $0xc8] sm:$0xff]   ;;  %v4217_v24 = vshll.u32 %v13351_v0, 16  ;;  %v2043_v29 = vrot.slane %v13099_v42, 1 }
 0x221   : > { %v1577_v27 = vshrl.u32 %v1549_v18, 16  ;;  %v1526_v14 = vmax.f32 %v13228_v13, %v1495_v34  ;;  %v10335_v23 = vpop.f32.mrb[157].mxu1  ;;  %10479 = vmatprep.subr.bf16.mxu0 %v15139_v54  ;;  %v1580_v43 = vshll.u32 %v1549_v18, 16  ;;  %v11969_v13 = vld [vmem:[%s15115_s2 + $0x20] sm:$0xff]   ;;  %v3515_v25 = vshrl.u32 %v13346_v7, 16 }
 0x222   : > { %v1498_v16 = vpop.f32.mrb[158].mxu1  ;;  %v3513_v41 = vrot.slane %v3511_v9, 1  ;;  %10792 = vmatpush3.bf16.msra.mxu1 %v11967_v44  ;;  %v13363_v4 = vrot.slane %v4217_v24, 1  ;;  %v11975_v23 = vld [vmem:[%s15115_s2 + $0x30] sm:$0xff]  }
 0x223   : > { %v1579_v46 = vrot.slane %v1577_v27, 7  ;;  %v1527_v45 = vmax.f32 %v13232_v52, %v1498_v16  ;;  %v10336_v5 = vpop.f32.mrb[159].mxu1  ;;  %10793 = vmatprep.subr.bf16.mxu1 %v15139_v54  ;;  %v4221_v52 = vshrl.u32 %v13351_v0, 16  ;;  %v1540_v38 = vmax.f32 %v1526_v14, 0.0 }
 0x224   : > { %v3514_v40 = vsel %vm1669_vm8, %v3509_v60, %v3513_v41  ;;  %10480 = vmatpush3.bf16.msra.mxu0 %v11970_v21  ;;  %v3517_v50 = vor.u32 %v3515_v25, %v3513_v41  ;;  %v11974_v41 = vld [vmem:[%s15115_s2 + $0xe0] sm:$0xff]  }
 0x225   : > { %v1582_v26 = vor.u32 %v1580_v43, %v1579_v46  ;;  %v1541_v47 = vmax.f32 %v1527_v45, 0.0  ;;  %10454 = vmatmul.mubr.bf16.gmra.mrb[60].mxu0 %v2042_v56  ;;  %10766 = vmatmul.mubr.bf16.gmra.mrb[176].mxu1 %v3514_v40  ;;  %v4814_v36 = vor.u32 %v4221_v52, %v13363_v4  ;;  %v11978_v56 = vld [vmem:[%s15115_s2 + $0x38] sm:$0xff]  }
 0x226   : > { %10457 = vmatprep.mubr.msk.bf16.mxu0 %vm12417_vm6, %v15139_v54  ;;  %10769 = vmatprep.mubr.msk.bf16.mxu1 %vm12417_vm6, %v15139_v54 }
 0x227   : > { %v13384_v55 = vsel %vm38_vm1, %v1571_v12, %v1582_v26  ;;  %v1550_v31 = vpack.c.bf16 %v1541_v47, %v1540_v38  ;;  %10794 = vmatpush3.bf16.msra.mxu1 %v11969_v13  ;;  %10481 = vmatprep.subr.bf16.mxu0 %v15139_v54  ;;  %v13390_v1 = vld [vmem:[#allocation2 + $0x50] sm:$0xff] }
 0x228   : > { %1621 = vst [vmem:[#allocation2 + $0x58] sm:$0xff] %v13384_v55  ;;  %v1503_v17 = vpop.f32.mrb[160].mxu1  ;;  %v3519_v12 = vshll.u32 %v13384_v55, 16  ;;  %10482 = vmatpush3.bf16.msra.mxu0 %v11971_v63  ;;  %10795 = vmatprep.subr.bf16.mxu1 %v15139_v54  ;;  %v4225_v18 = vshll.u32 %v13390_v1, 16  ;;  %v2045_v63 = vrot.slane %v13121_v57, 1  ;;  %v3523_v52 = vshrl.u32 %v13384_v55, 16 }
 0x229   : > { %v1585_v20 = vshrl.u32 %v1550_v31, 16  ;;  %v1528_v32 = vmax.f32 %v13247_v30, %v1503_v17  ;;  %v10339_v44 = vpop.f32.mrb[161].mxu1  ;;  %10483 = vmatprep.subr.bf16.mxu0 %v15139_v54  ;;  %v1588_v24 = vshll.u32 %v1550_v31, 16  ;;  %v2044_v30 = vsel %vm2037_vm9, %v2041_v39, %v2043_v29 }
 0x22a   : > { %v1506_v34 = vpop.f32.mrb[162].mxu1  ;;  %v3521_v9 = vrot.slane %v3519_v12, 1  ;;  %v13407_v16 = vrot.slane %v4225_v18, 1 }
 0x22b   : > { %v1587_v21 = vrot.slane %v1585_v20, 7  ;;  %v1529_v27 = vmax.f32 %v13251_v33, %v1506_v34  ;;  %v10340_v14 = vpop.f32.mrb[163].mxu1  ;;  %10796 = vmatpush3.bf16.msra.mxu1 %v11972_v51  ;;  %v1542_v43 = vmax.f32 %v1528_v32, 0.0  ;;  %v2046_v32 = vsel %vm2037_vm9, %v2043_v29, %v2045_v63 }
 0x22c   : > { %v3522_v60 = vsel %vm1669_vm8, %v3517_v50, %v3521_v9  ;;  %10484 = vmatpush3.bf16.msra.mxu0 %v11973_v15  ;;  %10797 = vmatprep.subr.bf16.mxu1 %v15139_v54  ;;  %v13423_v39 = vsel %vm1669_vm8, %v4814_v36, %v13407_v16  ;;  %v3525_v51 = vor.u32 %v3523_v52, %v3521_v9  ;;  %v2047_v9 = vrot.slane %v13146_v10, 1  ;;  %v11979_v14 = vld [vmem:[%s15115_s2 + $0xf8] sm:$0xff]  }
 0x22d   : > { %v1590_v33 = vor.u32 %v1588_v24, %v1587_v21  ;;  %v1543_v45 = vmax.f32 %v1529_v27, 0.0  ;;  %10458 = vmatmul.mubr.bf16.gmra.mrb[64].mxu0 %v2044_v30  ;;  %10770 = vmatmul.mubr.bf16.gmra.mrb[180].mxu1 %v3522_v60 }
 0x22e   : > { %10461 = vmatprep.mubr.msk.bf16.mxu0 %vm12417_vm6, %v15139_v54  ;;  %10773 = vmatprep.mubr.msk.bf16.mxu1 %vm12417_vm6, %v15139_v54 }
 0x22f   : > { %v13426_v5 = vsel %vm38_vm1, %v1579_v46, %v1590_v33  ;;  %v1551_v13 = vpack.c.bf16 %v1543_v45, %v1542_v43  ;;  %10485 = vmatprep.subr.bf16.mxu0 %v15139_v54  ;;  %10798 = vmatpush3.bf16.msra.mxu1 %v11975_v23  ;;  %v11976_v46 = vld [vmem:[%s15115_s2 + $0xe8] sm:$0xff]   ;;  %v2048_v43 = vsel %vm2037_vm9, %v2045_v63, %v2047_v9  ;;  %v2049_v63 = vrot.slane %v13159_v59, 1 }
 0x230   : > { %1622 = vst [vmem:[#allocation2 + $0x60] sm:$0xff] %v13426_v5  ;;  %v1511_v40 = vpop.f32.mrb[164].mxu1  ;;  %v3527_v26 = vshll.u32 %v13426_v5, 16  ;;  %10486 = vmatpush3.bf16.msra.mxu0 %v11974_v41  ;;  %10799 = vmatprep.subr.bf16.mxu1 %v15139_v54  ;;  %v3531_v24 = vshrl.u32 %v13426_v5, 16 }
 0x231   : > { %v1593_v38 = vshrl.u32 %v1551_v13, 16  ;;  %v1530_v47 = vmax.f32 %v13266_v22, %v1511_v40  ;;  %v10343_v36 = vpop.f32.mrb[165].mxu1  ;;  %10487 = vmatprep.subr.bf16.mxu0 %v15139_v54  ;;  %v1596_v12 = vshll.u32 %v1551_v13, 16  ;;  %v11977_v22 = vld [vmem:[%s15115_s2 + $0xf0] sm:$0xff]  }
 0x232   : > { %v1514_v31 = vpop.f32.mrb[166].mxu1  ;;  %v3529_v17 = vrot.slane %v3527_v26, 1 }
 0x233   : > { %v1595_v25 = vrot.slane %v1593_v38, 7  ;;  %v1531_v15 = vmax.f32 %v13270_v48, %v1514_v31  ;;  %10800 = vmatpush3.bf16.msra.mxu1 %v11978_v56  ;;  %v10344_v20 = vpop.f32.mrb[167].mxu1  ;;  %v1544_v34 = vmax.f32 %v1530_v47, 0.0  ;;  %v2051_v38 = vrot.slane %v13189_v19, 1  ;;  %v11980_v47 = vld [vmem:[%s15115_s2 + $0x80] sm:$0xff]   ;;  %v11981_v31 = vld [vmem:[%s15115_s2 + $0x88] sm:$0xff]  }
 0x234   : > { %v3530_v44 = vsel %vm1669_vm8, %v3525_v51, %v3529_v17  ;;  %10488 = vmatpush3.bf16.msra.mxu0 %v11976_v46  ;;  %10829 = vmatprep.subr.bf16.mxu1 %v15139_v54  ;;  %v3533_v30 = vor.u32 %v3531_v24, %v3529_v17  ;;  %v2050_v46 = vsel %vm2037_vm9, %v2047_v9, %v2049_v63  ;;  %v11982_v19 = vld [vmem:[%s15115_s2 + $0x90] sm:$0xff]   ;;  %v12169_v51 = vld [vmem:[#allocation2 + $0x8] sm:$0xff]  ;;  %v11983_v17 = vld [vmem:[%s15115_s2 + $0x98] sm:$0xff]  }
 0x235   : > { %v1598_v18 = vor.u32 %v1596_v12, %v1595_v25  ;;  %v1545_v50 = vmax.f32 %v1531_v15, 0.0  ;;  %10462 = vmatmul.mubr.bf16.gmra.mrb[68].mxu0 %v2046_v32  ;;  %10774 = vmatmul.mubr.bf16.gmra.mrb[184].mxu1 %v3530_v44  ;;  %v2052_v36 = vsel %vm2037_vm9, %v2049_v63, %v2051_v38  ;;  %v11985_v12 = vld [vmem:[%s15115_s2 + $0xa0] sm:$0xff]   ;;  %v11987_v15 = vld [vmem:[%s15115_s2 + $0x110] sm:$0xff]   ;;  %v11988_v20 = vld [vmem:[%s15115_s2 + $0xa8] sm:$0xff]  }
 0x236   : > { %10465 = vmatprep.mubr.msk.bf16.mxu0 %vm12417_vm6, %v15139_v54  ;;  %10777 = vmatprep.mubr.msk.bf16.mxu1 %vm12417_vm6, %v15139_v54  ;;  %v11991_v32 = vld [vmem:[%s15115_s2 + $0xb0] sm:$0xff]   ;;  %v11990_v44 = vld [vmem:[%s15115_s2 + $0x120] sm:$0xff]  }
 0x237   : > { %v13454_v48 = vsel %vm38_vm1, %v1587_v21, %v1598_v18  ;;  %v1552_v29 = vpack.c.bf16 %v1545_v50, %v1544_v34  ;;  %10489 = vmatprep.subr.bf16.mxu0 %v15139_v54  ;;  %v1625_v21 = vld [vmem:[#allocation2 + $0x78] sm:$0x1]  ;;  %v11993_v18 = vld [vmem:[%s15115_s2 + $0x130] sm:$0xff]   ;;  %v3823_v50 = vld [vmem:[#allocation2 + $0x38] sm:$0xfe] }
 0x238   : > { %1623 = vst [vmem:[#allocation2 + $0x68] sm:$0xff] %v13454_v48  ;;  %v3535_v27 = vshll.u32 %v13454_v48, 16  ;;  %10490 = vmatpush3.bf16.msra.mxu0 %v11977_v22  ;;  %v3539_v52 = vshrl.u32 %v13454_v48, 16  ;;  %v11994_v22 = vld [vmem:[%s15115_s2 + $0xb8] sm:$0xff]   ;;  %v3847_v24 = vrot.slane %v3823_v50, 1  ;;  %v3858_v50 = vrot.slane %v13454_v48, 1 }
 0x239   : > { %v1601_v23 = vshrl.u32 %v1552_v29, 16  ;;  %10491 = vmatprep.subr.bf16.mxu0 %v15139_v54  ;;  %v1604_v33 = vshll.u32 %v1552_v29, 16  ;;  %v11995_v34 = vld [vmem:[%s15115_s2 + $0x138] sm:$0xff]   ;;  %v3848_v29 = vrot.slane %v13293_v58, 1 }
 0x23a   : > { %v3537_v60 = vrot.slane %v3535_v27, 1  ;;  %v11996_v27 = vld [vmem:[%s15115_s2 + $0xc0] sm:$0xff]  }
 0x23b   : > { %v1603_v41 = vrot.slane %v1601_v23, 7 }
 0x23c   : > { %v3538_v45 = vsel %vm1669_vm8, %v3533_v30, %v3537_v60  ;;  %10492 = vmatpush3.bf16.msra.mxu0 %v11979_v14  ;;  %v3541_v26 = vor.u32 %v3539_v52, %v3537_v60  ;;  %v13591_v14 = vld [vmem:[#allocation2 + $0x38] sm:$0xff]  ;;  %v3850_v30 = vrot.slane %v13311_v11, 1  ;;  %v12003_v52 = vld [vmem:[%s15115_s2 + $0x150] sm:$0xff]  }
 0x23d   : > { %v1606_v13 = vor.u32 %v1604_v33, %v1603_v41  ;;  %v1626_v56 = vsel %vm12487_vm2, %v1603_v41, %v1625_v21  ;;  %10466 = vmatmul.mubr.bf16.gmra.mrb[72].mxu0 %v2048_v43  ;;  %10778 = vmatmul.mubr.bf16.gmra.mrb[188].mxu1 %v3538_v45  ;;  %v11998_v41 = vld [vmem:[%s15115_s2 + $0xd0] sm:$0xff]   ;;  %v12000_v45 = vld [vmem:[%s15115_s2 + $0x140] sm:$0xff]  }
 0x23e   : > { %1627 = vst [vmem:[#allocation2 + $0x78] sm:$0x1] %v1626_v56  ;;  %10469 = vmatprep.mubr.msk.bf16.mxu0 %vm12417_vm6, %v15139_v54  ;;  %10781 = vmatprep.mubr.msk.bf16.mxu1 %vm12417_vm6, %v15139_v54  ;;  %v3851_v43 = vsel %vm2037_vm9, %v3848_v29, %v3850_v30  ;;  %v13626_v56 = vld [vmem:[#allocation2 + $0x20] sm:$0xff] }
 0x23f   : > { %v1607_v40 = vsel %vm38_vm1, %v1595_v25, %v1606_v13  ;;  %10521 = vmatprep.subr.bf16.mxu0 %v15139_v54  ;;  %v11986_v25 = vld [vmem:[%s15115_s2 + $0x108] sm:$0xff]   ;;  %v2429_v63 = vshll.u32 %v13626_v56, 16 }
 0x240   : > { %1624 = vst [vmem:[#allocation2 + $0x70] sm:$0xff] %v1607_v40  ;;  %v12002_v13 = vld [vmem:[%s15115_s2 + $0x148] sm:$0xff]   ;;  %v12001_v40 = vld [vmem:[%s15115_s2 + $0xe0] sm:$0xff]  }
 0x245   : > { %10470 = vmatmul.mubr.bf16.gmra.mrb[76].mxu0 %v2050_v46  ;;  %10782 = vmatmul.mubr.bf16.gmra.mrb[192].mxu1 %v3541_v26  ;;  %v12004_v26 = vld [vmem:[%s15115_s2 + $0xe8] sm:$0xff]   ;;  %v13647_v46 = vld [vmem:[#allocation2 + $0x18] sm:$0xff] }
 0x246   : > { %10473 = vmatprep.mubr.msk.bf16.mxu0 %vm12417_vm6, %v15139_v54  ;;  %10801 = vmatprep.mubr.msk.bf16.mxu1 %vm12417_vm6, %v15139_v54  ;;  %v2425_v38 = vshrl.u32 %v13647_v46, 16 }
 0x24d   : > { %10474 = vmatmul.mubr.bf16.gmra.mrb[80].mxu0 %v2052_v36  ;;  %10802 = vmatmul.mubr.bf16.vlgmr.msra.gmra.mrb[168].mxu1 %v13178_v61  ;;  %v11984_v61 = vld [vmem:[%s15115_s2 + $0x100] sm:$0xff]   ;;  %v3854_v36 = vrot.slane %v13384_v55, 1 }
 0x24e   : > { %10493 = vmatprep.mubr.msk.bf16.mxu0 %vm12417_vm6, %v15139_v54  ;;  %10830 = vmatpush3.bf16.msra.mxu1 %v11980_v47  ;;  %v2431_v47 = vrot.slane %v2429_v63, 1 }
 0x24f   : > { %10831 = vmatprep.subr.bf16.mxu1 %v15139_v54  ;;  %10805 = vmatprep.mubr.msk.bf16.mxu1 %vm12417_vm6, %v15139_v54 }
 0x252   : > { %10832 = vmatpush3.bf16.msra.mxu1 %v11981_v31  ;;  %v12005_v31 = vld [vmem:[%s15115_s2 + $0x158] sm:$0xff]  }
 0x253   : > { %10833 = vmatprep.subr.bf16.mxu1 %v15139_v54 }
 0x255   : > { %10494 = vmatmul.mubr.bf16.vlgmr.msra.gmra.mrb[56].mxu0 %v12169_v51  ;;  %10806 = vmatmul.mubr.bf16.gmra.mrb[172].mxu1 %v13293_v58  ;;  %v11997_v58 = vld [vmem:[%s15115_s2 + $0xc8] sm:$0xff]   ;;  %v12007_v51 = vld [vmem:[%s15115_s2 + $0xf0] sm:$0xff]  }
 0x256   : > { %10497 = vmatprep.mubr.msk.bf16.mxu0 %vm12417_vm6, %v15139_v54  ;;  %10834 = vmatpush3.bf16.msra.mxu1 %v11982_v19  ;;  %v13655_v19 = vld [vmem:[#allocation2 + $0x28] sm:$0xff] }
 0x257   : > { %10809 = vmatprep.mubr.msk.bf16.mxu1 %vm12417_vm6, %v15139_v54  ;;  %10835 = vmatprep.subr.bf16.mxu1 %v15139_v54 }
 0x258   : > { %10522 = vmatpush3.bf16.msra.mxu0 %v11984_v61  ;;  %v2427_v61 = vor.u32 %v2425_v38, %v13133_v53  ;;  %v12010_v53 = vld [vmem:[%s15115_s2 + $0xf8] sm:$0xff]  }
 0x259   : > { %10523 = vmatprep.subr.bf16.mxu0 %v15139_v54  ;;  %v12015_v38 = vld [vmem:[%s15115_s2 + $0x118] sm:$0xff]  }
 0x25a   : > { %10836 = vmatpush3.bf16.msra.mxu1 %v11983_v17  ;;  %v2437_v17 = vshll.u32 %v13655_v19, 16 }
 0x25b   : > { %10837 = vmatprep.subr.bf16.mxu1 %v15139_v54 }
 0x25c   : > { %10524 = vmatpush3.bf16.msra.mxu0 %v11986_v25 }
 0x25d   : > { %10498 = vmatmul.mubr.bf16.gmra.mrb[60].mxu0 %v13080_v49  ;;  %10810 = vmatmul.mubr.bf16.gmra.mrb[176].mxu1 %v13311_v11  ;;  %v11989_v49 = vld [vmem:[%s15115_s2 + $0x118] sm:$0xff]  }
 0x25e   : > { %10501 = vmatprep.mubr.msk.bf16.mxu0 %vm12417_vm6, %v15139_v54  ;;  %10813 = vmatprep.mubr.msk.bf16.mxu1 %vm12417_vm6, %v15139_v54  ;;  %v11999_v11 = vld [vmem:[%s15115_s2 + $0xd8] sm:$0xff]  }
 0x25f   : > { %10838 = vmatpush3.bf16.msra.mxu1 %v11985_v12  ;;  %10525 = vmatprep.subr.bf16.mxu0 %v15139_v54  ;;  %v12006_v12 = vld [vmem:[%s15115_s2 + $0x160] sm:$0xff]  }
 0x260   : > { %10526 = vmatpush3.bf16.msra.mxu0 %v11987_v15  ;;  %10839 = vmatprep.subr.bf16.mxu1 %v15139_v54  ;;  %v2433_v15 = vshrl.u32 %v13626_v56, 16 }
 0x261   : > { %10527 = vmatprep.subr.bf16.mxu0 %v15139_v54 }
 0x263   : > { %10840 = vmatpush3.bf16.msra.mxu1 %v11988_v20  ;;  %v2439_v20 = vrot.slane %v2437_v17, 1  ;;  %v2654_v17 = vrot.slane %v13626_v56, 1 }
 0x264   : > { %10528 = vmatpush3.bf16.msra.mxu0 %v11989_v49  ;;  %10841 = vmatprep.subr.bf16.mxu1 %v15139_v54  ;;  %v3856_v49 = vrot.slane %v13426_v5, 1 }
 0x265   : > { %10502 = vmatmul.mubr.bf16.gmra.mrb[64].mxu0 %v13099_v42  ;;  %10814 = vmatmul.mubr.bf16.gmra.mrb[180].mxu1 %v13346_v7  ;;  %v11992_v42 = vld [vmem:[%s15115_s2 + $0x128] sm:$0xff]  }
 0x266   : > { %10505 = vmatprep.mubr.msk.bf16.mxu0 %vm12417_vm6, %v15139_v54  ;;  %10817 = vmatprep.mubr.msk.bf16.mxu1 %vm12417_vm6, %v15139_v54 }
 0x267   : > { %10529 = vmatprep.subr.bf16.mxu0 %v15139_v54  ;;  %10842 = vmatpush3.bf16.msra.mxu1 %v11991_v32  ;;  %v12008_v32 = vld [vmem:[%s15115_s2 + $0x168] sm:$0xff]  }
 0x268   : > { %10530 = vmatpush3.bf16.msra.mxu0 %v11990_v44  ;;  %10843 = vmatprep.subr.bf16.mxu1 %v15139_v54  ;;  %v13686_v44 = vld [vmem:[#allocation2 + $0x30] sm:$0xff] }
 0x269   : > { %10531 = vmatprep.subr.bf16.mxu0 %v15139_v54  ;;  %v2449_v48 = vshrl.u32 %v13686_v44, 16 }
 0x26b   : > { %10844 = vmatpush3.bf16.msra.mxu1 %v11994_v22  ;;  %v2435_v22 = vor.u32 %v2433_v15, %v2431_v47  ;;  %v13805_v15 = vld [vmem:[#allocation2 + $0x58] sm:$0xff] }
 0x26c   : > { %10532 = vmatpush3.bf16.msra.mxu0 %v11992_v42  ;;  %10873 = vmatprep.subr.bf16.mxu1 %v15139_v54 }
 0x26d   : > { %10506 = vmatmul.mubr.bf16.gmra.mrb[68].mxu0 %v13121_v57  ;;  %10818 = vmatmul.mubr.bf16.gmra.mrb[184].mxu1 %v13384_v55  ;;  %v3453_v57 = vld [vmem:[#allocation2 + $0x68] sm:$0x7f]  ;;  %v13663_v55 = vsel %vm1669_vm8, %v2427_v61, %v2431_v47  ;;  %v13690_v42 = vsel %vm1669_vm8, %v2435_v22, %v2439_v20  ;;  %v13768_v47 = vrot.slane %v13647_v46, 1  ;;  %v12019_v61 = vld [vmem:[%s15115_s2 + $0x190] sm:$0xff]  }
 0x26e   : > { %10509 = vmatprep.mubr.msk.bf16.mxu0 %vm12417_vm6, %v15139_v54  ;;  %10821 = vmatprep.mubr.msk.bf16.mxu1 %vm12417_vm6, %v15139_v54  ;;  %v12024_v22 = vld [vmem:[%s15115_s2 + $0x1a8] sm:$0xff]  }
 0x26f   : > { %10533 = vmatprep.subr.bf16.mxu0 %v15139_v54 }
 0x270   : > { %10534 = vmatpush3.bf16.msra.mxu0 %v11993_v18  ;;  %v2445_v18 = vshll.u32 %v13686_v44, 16 }
 0x271   : > { %10535 = vmatprep.subr.bf16.mxu0 %v15139_v54 }
 0x274   : > { %10536 = vmatpush3.bf16.msra.mxu0 %v11995_v34  ;;  %v12009_v34 = vld [vmem:[%s15115_s2 + $0x170] sm:$0xff]  }
 0x275   : > { %10510 = vmatmul.mubr.bf16.gmra.mrb[72].mxu0 %v13146_v10  ;;  %10822 = vmatmul.mubr.bf16.gmra.mrb[188].mxu1 %v13426_v5  ;;  %v2380_v10 = vld [vmem:[#allocation2 + $0x8] sm:$0xff]  ;;  %v3857_v5 = vsel %vm2037_vm9, %v3854_v36, %v3856_v49 }
 0x276   : > { %10513 = vmatprep.mubr.msk.bf16.mxu0 %vm12417_vm6, %v15139_v54  ;;  %10825 = vmatprep.mubr.msk.bf16.mxu1 %vm12417_vm6, %v15139_v54  ;;  %v2408_v9 = vshll.u32 %v2380_v10, 16  ;;  %v2406_v21 = vshrl.u32 %v2380_v10, 16  ;;  %v2447_v10 = vrot.slane %v2445_v18, 1 }
 0x277   : > { %10565 = vmatprep.subr.bf16.mxu0 %v15139_v54 }
 0x278   : > { %v2410_v23 = vrot.slane %v2408_v9, 1 }
 0x27a   : > { %v2411_v60 = vor.u32 %v2410_v23, %v2406_v21  ;;  %v13724_v21 = vor.u32 %v2449_v48, %v2447_v10 }
 0x27c   : > { %v2416_v33 = vsel %vm1669_vm8, %v2411_v60, %v13109_v37  ;;  %v3852_v37 = vrot.slane %v13346_v7, 1 }
 0x27d   : > { %10514 = vmatmul.mubr.bf16.gmra.mrb[76].mxu0 %v13159_v59  ;;  %10826 = vmatmul.mubr.bf16.gmra.mrb[192].mxu1 %v3453_v57  ;;  %v3849_v59 = vsel %vm2037_vm9, %v3847_v24, %v3848_v29  ;;  %v2441_v57 = vshrl.u32 %v13655_v19, 16  ;;  %v12011_v29 = vld [vmem:[%s15115_s2 + $0x178] sm:$0xff]  }
 0x27e   : > { %10517 = vmatprep.mubr.msk.bf16.mxu0 %vm12417_vm6, %v15139_v54  ;;  %10845 = vmatprep.mubr.msk.bf16.mxu1 %vm12417_vm6, %v15139_v54  ;;  %v3853_v7 = vsel %vm2037_vm9, %v3850_v30, %v3852_v37  ;;  %v3855_v25 = vsel %vm2037_vm9, %v3852_v37, %v3854_v36  ;;  %v12013_v37 = vld [vmem:[%s15115_s2 + $0x108] sm:$0xff]   ;;  %v12017_v36 = vld [vmem:[%s15115_s2 + $0x120] sm:$0xff]  }
 0x27f   : > { %v2443_v9 = vor.u32 %v2441_v57, %v2439_v20  ;;  %v12022_v20 = vld [vmem:[%s15115_s2 + $0x1a0] sm:$0xff]   ;;  %v13844_v57 = vrot.slane %v13686_v44, 1 }
 0x281   : > { %v13711_v24 = vsel %vm1669_vm8, %v2443_v9, %v2447_v10  ;;  %v12027_v10 = vld [vmem:[%s15115_s2 + $0x1b8] sm:$0xff]   ;;  %v2660_v9 = vrot.slane %v13591_v14, 1 }
 0x285   : > { %10518 = vmatmul.mubr.bf16.gmra.mrb[80].mxu0 %v13591_v14  ;;  %10846 = vmatmul.mubr.bf16.vlgmr.msra.gmra.mrb[168].mxu1 %v3849_v59  ;;  %v3859_v59 = vsel %vm2037_vm9, %v3856_v49, %v3858_v50  ;;  %v12026_v49 = vld [vmem:[%s15115_s2 + $0x138] sm:$0xff]  }
 0x286   : > { %10537 = vmatprep.mubr.msk.bf16.mxu0 %vm12417_vm6, %v15139_v54  ;;  %10874 = vmatpush3.bf16.msra.mxu1 %v11996_v27  ;;  %v2453_v27 = vshll.u32 %v13591_v14, 16 }
 0x287   : > { %10875 = vmatprep.subr.bf16.mxu1 %v15139_v54  ;;  %10849 = vmatprep.mubr.msk.bf16.mxu1 %vm12417_vm6, %v15139_v54 }
 0x288   : > { %v2455_v23 = vrot.slane %v2453_v27, 1  ;;  %v2661_v27 = vsel %vm2037_vm9, %v13844_v57, %v2660_v9 }
 0x28a   : > { %10876 = vmatpush3.bf16.msra.mxu1 %v11997_v58  ;;  %v13722_v58 = vld [vmem:[#allocation2 + $0x40] sm:$0x1]  ;;  %v2456_v30 = vsel %vm1669_vm8, %v13724_v21, %v2455_v23 }
 0x28b   : > { %10877 = vmatprep.subr.bf16.mxu1 %v15139_v54  ;;  %v2461_v60 = vshll.u32 %v13722_v58, 16  ;;  %v2662_v48 = vrot.slane %v13722_v58, 1  ;;  %v12029_v58 = vld [vmem:[%s15115_s2 + $0x148] sm:$0xff]  }
 0x28d   : > { %10538 = vmatmul.mubr.bf16.vlgmr.msra.gmra.mrb[56].mxu0 %v2416_v33  ;;  %10850 = vmatmul.mubr.bf16.gmra.mrb[172].mxu1 %v3851_v43  ;;  %v2463_v33 = vrot.slane %v2461_v60, 1  ;;  %v4220_v60 = vsel %vm1669_vm8, %v13343_v62, %v13363_v4  ;;  %v12030_v4 = vld [vmem:[%s15115_s2 + $0x150] sm:$0xff]  }
 0x28e   : > { %10541 = vmatprep.mubr.msk.bf16.mxu0 %vm12417_vm6, %v15139_v54  ;;  %10878 = vmatpush3.bf16.msra.mxu1 %v11998_v41  ;;  %v2457_v41 = vshrl.u32 %v13591_v14, 16 }
 0x28f   : > { %10853 = vmatprep.mubr.msk.bf16.mxu1 %vm12417_vm6, %v15139_v54  ;;  %10879 = vmatprep.subr.bf16.mxu1 %v15139_v54 }
 0x290   : > { %10566 = vmatpush3.bf16.msra.mxu0 %v12000_v45  ;;  %v2459_v43 = vor.u32 %v2457_v41, %v2455_v23  ;;  %v12012_v45 = vld [vmem:[%s15115_s2 + $0x100] sm:$0xff]   ;;  %v4233_v41 = vshll.u32 %v13805_v15, 16 }
 0x291   : > { %10567 = vmatprep.subr.bf16.mxu0 %v15139_v54  ;;  %v12028_v23 = vld [vmem:[%s15115_s2 + $0x140] sm:$0xff]  }
 0x292   : > { %10880 = vmatpush3.bf16.msra.mxu1 %v11999_v11  ;;  %v2464_v11 = vsel %vm1669_vm8, %v2459_v43, %v2463_v33  ;;  %v12032_v33 = vld [vmem:[%s15115_s2 + $0x1c0] sm:$0xff]   ;;  %v12031_v43 = vld [vmem:[%s15115_s2 + $0x158] sm:$0xff]  }
 0x293   : > { %10881 = vmatprep.subr.bf16.mxu1 %v15139_v54 }
 0x294   : > { %10568 = vmatpush3.bf16.msra.mxu0 %v12002_v13  ;;  %v2623_v13 = vld [vmem:[#allocation2 + $0x8] sm:$0xfe] }
 0x295   : > { %10542 = vmatmul.mubr.bf16.gmra.mrb[60].mxu0 %v13143_v35  ;;  %10854 = vmatmul.mubr.bf16.gmra.mrb[176].mxu1 %v3853_v7  ;;  %v2649_v7 = vrot.slane %v2623_v13, 1 }
 0x296   : > { %10545 = vmatprep.mubr.msk.bf16.mxu0 %vm12417_vm6, %v15139_v54  ;;  %10857 = vmatprep.mubr.msk.bf16.mxu1 %vm12417_vm6, %v15139_v54 }
 0x297   : > { %10882 = vmatpush3.bf16.msra.mxu1 %v12001_v40  ;;  %10569 = vmatprep.subr.bf16.mxu0 %v15139_v54  ;;  %v13747_v40 = vld [vmem:[#allocation2 + $0x10] sm:$0xff] }
 0x298   : > { %10570 = vmatpush3.bf16.msra.mxu0 %v12003_v52  ;;  %10883 = vmatprep.subr.bf16.mxu1 %v15139_v54  ;;  %v2650_v63 = vrot.slane %v13747_v40, 1 }
 0x299   : > { %10571 = vmatprep.subr.bf16.mxu0 %v15139_v54 }
 0x29a   : > { %v2651_v52 = vsel %vm2037_vm9, %v2649_v7, %v2650_v63  ;;  %v12035_v7 = vld [vmem:[%s15115_s2 + $0x1d0] sm:$0xff]  }
 0x29b   : > { %10884 = vmatpush3.bf16.msra.mxu1 %v12004_v26  ;;  %v12016_v26 = vld [vmem:[%s15115_s2 + $0x180] sm:$0xff]  }
 0x29c   : > { %10572 = vmatpush3.bf16.msra.mxu0 %v12005_v31  ;;  %10885 = vmatprep.subr.bf16.mxu1 %v15139_v54  ;;  %v2653_v31 = vsel %vm2037_vm9, %v2650_v63, %v13768_v47 }
 0x29d   : > { %10546 = vmatmul.mubr.bf16.gmra.mrb[64].mxu0 %v13663_v55  ;;  %10858 = vmatmul.mubr.bf16.gmra.mrb[180].mxu1 %v3855_v25  ;;  %v12021_v25 = vld [vmem:[%s15115_s2 + $0x198] sm:$0xff]  }
 0x29e   : > { %10549 = vmatprep.mubr.msk.bf16.mxu0 %vm12417_vm6, %v15139_v54  ;;  %10861 = vmatprep.mubr.msk.bf16.mxu1 %vm12417_vm6, %v15139_v54 }
 0x29f   : > { %10573 = vmatprep.subr.bf16.mxu0 %v15139_v54  ;;  %10886 = vmatpush3.bf16.msra.mxu1 %v12007_v51  ;;  %v12020_v51 = vld [vmem:[%s15115_s2 + $0x128] sm:$0xff]  }
 0x2a0   : > { %10574 = vmatpush3.bf16.msra.mxu0 %v12006_v12  ;;  %10887 = vmatprep.subr.bf16.mxu1 %v15139_v54  ;;  %v12023_v12 = vld [vmem:[%s15115_s2 + $0x130] sm:$0xff]  }
 0x2a1   : > { %10575 = vmatprep.subr.bf16.mxu0 %v15139_v54 }
 0x2a3   : > { %10888 = vmatpush3.bf16.msra.mxu1 %v12010_v53  ;;  %v13803_v53 = vsel %vm2037_vm9, %v13768_v47, %v2654_v17 }
 0x2a4   : > { %10576 = vmatpush3.bf16.msra.mxu0 %v12008_v32  ;;  %10917 = vmatprep.subr.bf16.mxu1 %v15139_v54  ;;  %v2656_v32 = vrot.slane %v13655_v19, 1 }
 0x2a5   : > { %10550 = vmatmul.mubr.bf16.gmra.mrb[68].mxu0 %v13690_v42  ;;  %10862 = vmatmul.mubr.bf16.gmra.mrb[184].mxu1 %v3857_v5  ;;  %v13830_v5 = vld [vmem:[#allocation2 + $0x60] sm:$0xff] }
 0x2a6   : > { %10553 = vmatprep.mubr.msk.bf16.mxu0 %vm12417_vm6, %v15139_v54  ;;  %10865 = vmatprep.mubr.msk.bf16.mxu1 %vm12417_vm6, %v15139_v54  ;;  %v13828_v18 = vsel %vm2037_vm9, %v2654_v17, %v2656_v32 }
 0x2a7   : > { %10577 = vmatprep.subr.bf16.mxu0 %v15139_v54 }
 0x2a8   : > { %10578 = vmatpush3.bf16.msra.mxu0 %v12009_v34  ;;  %v12025_v34 = vld [vmem:[%s15115_s2 + $0x1b0] sm:$0xff]  }
 0x2a9   : > { %10579 = vmatprep.subr.bf16.mxu0 %v15139_v54 }
 0x2ac   : > { %10580 = vmatpush3.bf16.msra.mxu0 %v12011_v29  ;;  %v13854_v29 = vld [vmem:[#allocation2 + $0x68] sm:$0xff] }
 0x2ad   : > { %10554 = vmatmul.mubr.bf16.gmra.mrb[72].mxu0 %v13711_v24  ;;  %10866 = vmatmul.mubr.bf16.gmra.mrb[188].mxu1 %v3859_v59  ;;  %v4024_v59 = vld [vmem:[#allocation2 + $0x70] sm:$0x7f] }
 0x2ae   : > { %10557 = vmatprep.mubr.msk.bf16.mxu0 %vm12417_vm6, %v15139_v54  ;;  %10869 = vmatprep.mubr.msk.bf16.mxu1 %vm12417_vm6, %v15139_v54 }
 0x2af   : > { %10609 = vmatprep.subr.bf16.mxu0 %v15139_v54 }
 0x2b5   : > { %10558 = vmatmul.mubr.bf16.gmra.mrb[76].mxu0 %v2456_v30  ;;  %10870 = vmatmul.mubr.bf16.gmra.mrb[192].mxu1 %v3858_v50  ;;  %v13852_v50 = vsel %vm2037_vm9, %v2656_v32, %v13844_v57  ;;  %v2663_v30 = vsel %vm2037_vm9, %v2660_v9, %v2662_v48  ;;  %v12041_v32 = vld [vmem:[%s15115_s2 + $0x1f0] sm:$0xff]   ;;  %v14005_v48 = vld [vmem:[#allocation2 + $0x48] sm:$0xff] }
 0x2b6   : > { %10561 = vmatprep.mubr.msk.bf16.mxu0 %vm12417_vm6, %v15139_v54  ;;  %10889 = vmatprep.mubr.msk.bf16.mxu1 %vm12417_vm6, %v15139_v54 }
 0x2bd   : > { %10562 = vmatmul.mubr.bf16.gmra.mrb[80].mxu0 %v2464_v11  ;;  %10890 = vmatmul.mubr.bf16.vlgmr.msra.gmra.mrb[168].mxu1 %v13316_v28  ;;  %v12014_v28 = vld [vmem:[%s15115_s2 + $0x110] sm:$0xff]   ;;  %v4235_v11 = vrot.slane %v4233_v41, 1 }
 0x2be   : > { %10581 = vmatprep.mubr.msk.bf16.mxu0 %vm12417_vm6, %v15139_v54  ;;  %10918 = vmatpush3.bf16.msra.mxu1 %v12012_v45  ;;  %v4229_v45 = vshrl.u32 %v13390_v1, 16  ;;  %v14023_v41 = vld [vmem:[#allocation2 + $0x50] sm:$0xff] }
 0x2bf   : > { %10919 = vmatprep.subr.bf16.mxu1 %v15139_v54  ;;  %10893 = vmatprep.mubr.msk.bf16.mxu1 %vm12417_vm6, %v15139_v54 }
 0x2c0   : > { %v4231_v13 = vor.u32 %v4229_v45, %v13407_v16  ;;  %v12036_v16 = vld [vmem:[%s15115_s2 + $0x168] sm:$0xff]  }
 0x2c2   : > { %10920 = vmatpush3.bf16.msra.mxu1 %v12013_v37  ;;  %v12034_v37 = vld [vmem:[%s15115_s2 + $0x1c8] sm:$0xff]   ;;  %v13915_v63 = vsel %vm1669_vm8, %v4231_v13, %v4235_v11  ;;  %v4451_v13 = vrot.slane %v13805_v15, 1 }
 0x2c3   : > { %10921 = vmatprep.subr.bf16.mxu1 %v15139_v54 }
 0x2c5   : > { %10582 = vmatmul.mubr.bf16.vlgmr.msra.gmra.mrb[56].mxu0 %v2651_v52  ;;  %10894 = vmatmul.mubr.bf16.gmra.mrb[172].mxu1 %v13351_v0  ;;  %v12018_v0 = vld [vmem:[%s15115_s2 + $0x188] sm:$0xff]  }
 0x2c6   : > { %10585 = vmatprep.mubr.msk.bf16.mxu0 %vm12417_vm6, %v15139_v54  ;;  %10922 = vmatpush3.bf16.msra.mxu1 %v12014_v28  ;;  %v4237_v28 = vshrl.u32 %v13805_v15, 16 }
 0x2c7   : > { %10897 = vmatprep.mubr.msk.bf16.mxu1 %vm12417_vm6, %v15139_v54  ;;  %10923 = vmatprep.subr.bf16.mxu1 %v15139_v54 }
 0x2c8   : > { %10610 = vmatpush3.bf16.msra.mxu0 %v12016_v26  ;;  %v4239_v26 = vor.u32 %v4237_v28, %v4235_v11  ;;  %v12048_v11 = vld [vmem:[%s15115_s2 + $0x200] sm:$0xff]   ;;  %v4453_v28 = vrot.slane %v13830_v5, 1 }
 0x2c9   : > { %10611 = vmatprep.subr.bf16.mxu0 %v15139_v54 }
 0x2ca   : > { %10924 = vmatpush3.bf16.msra.mxu1 %v12015_v38  ;;  %v12039_v38 = vld [vmem:[%s15115_s2 + $0x170] sm:$0xff]  }
 0x2cb   : > { %10925 = vmatprep.subr.bf16.mxu1 %v15139_v54 }
 0x2cc   : > { %10612 = vmatpush3.bf16.msra.mxu0 %v12018_v0 }
 0x2cd   : > { %10586 = vmatmul.mubr.bf16.gmra.mrb[60].mxu0 %v2653_v31  ;;  %10898 = vmatmul.mubr.bf16.gmra.mrb[176].mxu1 %v13390_v1  ;;  %v4241_v1 = vshll.u32 %v13830_v5, 16  ;;  %v12038_v31 = vld [vmem:[%s15115_s2 + $0x1e0] sm:$0xff]  }
 0x2ce   : > { %10589 = vmatprep.mubr.msk.bf16.mxu0 %vm12417_vm6, %v15139_v54  ;;  %10901 = vmatprep.mubr.msk.bf16.mxu1 %vm12417_vm6, %v15139_v54 }
 0x2cf   : > { %10926 = vmatpush3.bf16.msra.mxu1 %v12017_v36  ;;  %10613 = vmatprep.subr.bf16.mxu0 %v15139_v54  ;;  %v4243_v52 = vrot.slane %v4241_v1, 1  ;;  %v4249_v36 = vshll.u32 %v13854_v29, 16 }
 0x2d0   : > { %10614 = vmatpush3.bf16.msra.mxu0 %v12019_v61  ;;  %10927 = vmatprep.subr.bf16.mxu1 %v15139_v54  ;;  %v12042_v61 = vld [vmem:[%s15115_s2 + $0x178] sm:$0xff]  }
 0x2d1   : > { %10615 = vmatprep.subr.bf16.mxu0 %v15139_v54  ;;  %v13941_v0 = vsel %vm1669_vm8, %v4239_v26, %v4243_v52  ;;  %v4251_v17 = vrot.slane %v4249_v36, 1  ;;  %v12054_v26 = vld [vmem:[%s15115_s2 + $0x220] sm:$0xff]   ;;  %v4455_v36 = vrot.slane %v13854_v29, 1 }
 0x2d3   : > { %10928 = vmatpush3.bf16.msra.mxu1 %v12020_v51  ;;  %v4245_v51 = vshrl.u32 %v13830_v5, 16 }
 0x2d4   : > { %10616 = vmatpush3.bf16.msra.mxu0 %v12021_v25  ;;  %10929 = vmatprep.subr.bf16.mxu1 %v15139_v54  ;;  %v13963_v25 = vld [vmem:[#allocation2 + $0x70] sm:$0xff] }
 0x2d5   : > { %10590 = vmatmul.mubr.bf16.gmra.mrb[64].mxu0 %v13803_v53  ;;  %10902 = vmatmul.mubr.bf16.gmra.mrb[180].mxu1 %v13805_v15 }
 0x2d6   : > { %10593 = vmatprep.mubr.msk.bf16.mxu0 %vm12417_vm6, %v15139_v54  ;;  %10905 = vmatprep.mubr.msk.bf16.mxu1 %vm12417_vm6, %v15139_v54 }
 0x2d7   : > { %10617 = vmatprep.subr.bf16.mxu0 %v15139_v54  ;;  %10930 = vmatpush3.bf16.msra.mxu1 %v12023_v12  ;;  %v4247_v12 = vor.u32 %v4245_v51, %v4243_v52  ;;  %v12055_v52 = vld [vmem:[%s15115_s2 + $0x1b0] sm:$0xff]   ;;  %v14108_v51 = vsel %vm2037_vm9, %v4453_v28, %v4455_v36 }
 0x2d8   : > { %10618 = vmatpush3.bf16.msra.mxu0 %v12022_v20  ;;  %10931 = vmatprep.subr.bf16.mxu1 %v15139_v54 }
 0x2d9   : > { %10619 = vmatprep.subr.bf16.mxu0 %v15139_v54  ;;  %v13967_v20 = vsel %vm1669_vm8, %v4247_v12, %v4251_v17  ;;  %v14122_v12 = vrot.slane %v13963_v25, 1 }
 0x2db   : > { %10932 = vmatpush3.bf16.msra.mxu1 %v12026_v49  ;;  %v4257_v49 = vshll.u32 %v13963_v25, 16 }
 0x2dc   : > { %10620 = vmatpush3.bf16.msra.mxu0 %v12024_v22  ;;  %10961 = vmatprep.subr.bf16.mxu1 %v15139_v54  ;;  %v4253_v22 = vshrl.u32 %v13854_v29, 16 }
 0x2dd   : > { %10594 = vmatmul.mubr.bf16.gmra.mrb[68].mxu0 %v13828_v18  ;;  %10906 = vmatmul.mubr.bf16.gmra.mrb[184].mxu1 %v13830_v5 }
 0x2de   : > { %10597 = vmatprep.mubr.msk.bf16.mxu0 %vm12417_vm6, %v15139_v54  ;;  %10909 = vmatprep.mubr.msk.bf16.mxu1 %vm12417_vm6, %v15139_v54 }
 0x2df   : > { %10621 = vmatprep.subr.bf16.mxu0 %v15139_v54 }
 0x2e0   : > { %10622 = vmatpush3.bf16.msra.mxu0 %v12025_v34  ;;  %v4259_v34 = vrot.slane %v4257_v49, 1  ;;  %v12059_v49 = vld [vmem:[%s15115_s2 + $0x238] sm:$0xff]  }
 0x2e1   : > { %10623 = vmatprep.subr.bf16.mxu0 %v15139_v54 }
 0x2e4   : > { %10624 = vmatpush3.bf16.msra.mxu0 %v12027_v10  ;;  %v12043_v10 = vld [vmem:[%s15115_s2 + $0x1f8] sm:$0xff]  }
 0x2e5   : > { %10598 = vmatmul.mubr.bf16.gmra.mrb[72].mxu0 %v13852_v50  ;;  %10910 = vmatmul.mubr.bf16.gmra.mrb[188].mxu1 %v13854_v29 }
 0x2e6   : > { %10601 = vmatprep.mubr.msk.bf16.mxu0 %vm12417_vm6, %v15139_v54  ;;  %10913 = vmatprep.mubr.msk.bf16.mxu1 %vm12417_vm6, %v15139_v54 }
 0x2e7   : > { %10653 = vmatprep.subr.bf16.mxu0 %v15139_v54 }
 0x2ed   : > { %10602 = vmatmul.mubr.bf16.gmra.mrb[76].mxu0 %v2661_v27  ;;  %10914 = vmatmul.mubr.bf16.gmra.mrb[192].mxu1 %v4024_v59  ;;  %v4261_v27 = vshrl.u32 %v13963_v25, 16 }
 0x2ee   : > { %10605 = vmatprep.mubr.msk.bf16.mxu0 %vm12417_vm6, %v15139_v54  ;;  %10933 = vmatprep.mubr.msk.bf16.mxu1 %vm12417_vm6, %v15139_v54 }
 0x2ef   : > { %v13997_v59 = vor.u32 %v4261_v27, %v4259_v34 }
 0x2f5   : > { %10606 = vmatmul.mubr.bf16.gmra.mrb[80].mxu0 %v2663_v30  ;;  %10934 = vmatmul.mubr.bf16.vlgmr.msra.gmra.mrb[168].mxu1 %v4220_v60  ;;  %v12044_v60 = vld [vmem:[%s15115_s2 + $0x180] sm:$0xff]  }
 0x2f6   : > { %10625 = vmatprep.mubr.msk.bf16.mxu0 %vm12417_vm6, %v15139_v54  ;;  %10962 = vmatpush3.bf16.msra.mxu1 %v12028_v23  ;;  %v4447_v23 = vrot.slane %v14005_v48, 1 }
 0x2f7   : > { %10963 = vmatprep.subr.bf16.mxu1 %v15139_v54  ;;  %10937 = vmatprep.mubr.msk.bf16.mxu1 %vm12417_vm6, %v15139_v54 }
 0x2fa   : > { %10964 = vmatpush3.bf16.msra.mxu1 %v12029_v58  ;;  %v14012_v58 = vld [vmem:[#allocation2 + $0x40] sm:$0xff] }
 0x2fb   : > { %10965 = vmatprep.subr.bf16.mxu1 %v15139_v54 }
 0x2fd   : > { %10626 = vmatmul.mubr.bf16.vlgmr.msra.gmra.mrb[56].mxu0 %v13747_v40  ;;  %10938 = vmatmul.mubr.bf16.gmra.mrb[172].mxu1 %v13423_v39  ;;  %v12033_v40 = vld [vmem:[%s15115_s2 + $0x160] sm:$0xff]  }
 0x2fe   : > { %10629 = vmatprep.mubr.msk.bf16.mxu0 %vm12417_vm6, %v15139_v54  ;;  %10966 = vmatpush3.bf16.msra.mxu1 %v12030_v4  ;;  %v12045_v4 = vld [vmem:[%s15115_s2 + $0x188] sm:$0xff]  }
 0x2ff   : > { %10941 = vmatprep.mubr.msk.bf16.mxu1 %vm12417_vm6, %v15139_v54  ;;  %10967 = vmatprep.subr.bf16.mxu1 %v15139_v54 }
 0x300   : > { %10654 = vmatpush3.bf16.msra.mxu0 %v12032_v33  ;;  %v14026_v33 = vrot.slane %v14023_v41, 1 }
 0x301   : > { %10655 = vmatprep.subr.bf16.mxu0 %v15139_v54 }
 0x302   : > { %10968 = vmatpush3.bf16.msra.mxu1 %v12031_v43  ;;  %v12046_v43 = vld [vmem:[%s15115_s2 + $0x190] sm:$0xff]   ;;  %v4450_v45 = vsel %vm2037_vm9, %v4447_v23, %v14026_v33  ;;  %v14057_v1 = vsel %vm2037_vm9, %v14026_v33, %v4451_v13 }
 0x303   : > { %10969 = vmatprep.subr.bf16.mxu1 %v15139_v54 }
 0x304   : > { %10656 = vmatpush3.bf16.msra.mxu0 %v12034_v37  ;;  %v12047_v37 = vld [vmem:[%s15115_s2 + $0x198] sm:$0xff]  }
 0x305   : > { %10630 = vmatmul.mubr.bf16.gmra.mrb[60].mxu0 %v13647_v46  ;;  %10942 = vmatmul.mubr.bf16.gmra.mrb[176].mxu1 %v13915_v63  ;;  %v12037_v46 = vld [vmem:[%s15115_s2 + $0x1d8] sm:$0xff]  }
 0x306   : > { %10633 = vmatprep.mubr.msk.bf16.mxu0 %vm12417_vm6, %v15139_v54  ;;  %10945 = vmatprep.mubr.msk.bf16.mxu1 %vm12417_vm6, %v15139_v54 }
 0x307   : > { %10970 = vmatpush3.bf16.msra.mxu1 %v12033_v40  ;;  %10657 = vmatprep.subr.bf16.mxu0 %v15139_v54  ;;  %v12049_v40 = vld [vmem:[%s15115_s2 + $0x1a0] sm:$0xff]  }
 0x308   : > { %10658 = vmatpush3.bf16.msra.mxu0 %v12035_v7  ;;  %10971 = vmatprep.subr.bf16.mxu1 %v15139_v54  ;;  %v12051_v7 = vld [vmem:[%s15115_s2 + $0x210] sm:$0xff]  }
 0x309   : > { %10659 = vmatprep.subr.bf16.mxu0 %v15139_v54 }
 0x30b   : > { %10972 = vmatpush3.bf16.msra.mxu1 %v12036_v16  ;;  %v12052_v16 = vld [vmem:[%s15115_s2 + $0x1a8] sm:$0xff]  }
 0x30c   : > { %10660 = vmatpush3.bf16.msra.mxu0 %v12037_v46  ;;  %10973 = vmatprep.subr.bf16.mxu1 %v15139_v54  ;;  %v14082_v46 = vsel %vm2037_vm9, %v4451_v13, %v4453_v28  ;;  %v4791_v13 = vld [vmem:[#allocation2 + $0x78] sm:$0xff]  ;;  %v5021_v28 = vld [vmem:[#allocation2 + $0x48] sm:$0xfe] }
 0x30d   : > { %10634 = vmatmul.mubr.bf16.gmra.mrb[64].mxu0 %v13626_v56  ;;  %10946 = vmatmul.mubr.bf16.gmra.mrb[180].mxu1 %v13941_v0  ;;  %v12040_v56 = vld [vmem:[%s15115_s2 + $0x1e8] sm:$0xff]  }
 0x30e   : > { %10637 = vmatprep.mubr.msk.bf16.mxu0 %vm12417_vm6, %v15139_v54  ;;  %10949 = vmatprep.mubr.msk.bf16.mxu1 %vm12417_vm6, %v15139_v54 }
 0x30f   : > { %10661 = vmatprep.subr.bf16.mxu0 %v15139_v54  ;;  %10974 = vmatpush3.bf16.msra.mxu1 %v12039_v38  ;;  %v12058_v38 = vld [vmem:[%s15115_s2 + $0x1b8] sm:$0xff]  }
 0x310   : > { %10662 = vmatpush3.bf16.msra.mxu0 %v12038_v31  ;;  %10975 = vmatprep.subr.bf16.mxu1 %v15139_v54  ;;  %v14103_v31 = vld [vmem:[#allocation2 + $0x38] sm:$0xff] }
 0x311   : > { %10663 = vmatprep.subr.bf16.mxu0 %v15139_v54 }
 0x313   : > { %10976 = vmatpush3.bf16.msra.mxu1 %v12042_v61  ;;  %v3056_v61 = vshll.u32 %v14103_v31, 16 }
 0x314   : > { %10664 = vmatpush3.bf16.msra.mxu0 %v12040_v56  ;;  %11005 = vmatprep.subr.bf16.mxu1 %v15139_v54 }
 0x315   : > { %10638 = vmatmul.mubr.bf16.gmra.mrb[68].mxu0 %v13655_v19  ;;  %10950 = vmatmul.mubr.bf16.gmra.mrb[184].mxu1 %v13967_v20  ;;  %v4255_v19 = vor.u32 %v4253_v22, %v4251_v17  ;;  %v12057_v17 = vld [vmem:[%s15115_s2 + $0x230] sm:$0xff]   ;;  %v3058_v56 = vrot.slane %v3056_v61, 1  ;;  %v3060_v22 = vshrl.u32 %v14103_v31, 16 }
 0x316   : > { %10641 = vmatprep.mubr.msk.bf16.mxu0 %vm12417_vm6, %v15139_v54  ;;  %10953 = vmatprep.mubr.msk.bf16.mxu1 %vm12417_vm6, %v15139_v54 }
 0x317   : > { %10665 = vmatprep.subr.bf16.mxu0 %v15139_v54  ;;  %v13987_v9 = vsel %vm1669_vm8, %v4255_v19, %v4259_v34  ;;  %v14140_v34 = vld [vmem:[#allocation2 + $0x48] sm:$0x1] }
 0x318   : > { %10666 = vmatpush3.bf16.msra.mxu0 %v12041_v32  ;;  %v14132_v32 = vsel %vm2037_vm9, %v4455_v36, %v14122_v12  ;;  %v3072_v19 = vshll.u32 %v14140_v34, 16  ;;  %v12083_v36 = vld [vmem:[%s15117_s4 + $0x28] sm:$0xff]  }
 0x319   : > { %10667 = vmatprep.subr.bf16.mxu0 %v15139_v54 }
 0x31a   : > { %v3074_v27 = vrot.slane %v3072_v19, 1 }
 0x31c   : > { %10668 = vmatpush3.bf16.msra.mxu0 %v12043_v10  ;;  %v3062_v10 = vor.u32 %v3060_v22, %v3058_v56 }
 0x31d   : > { %10642 = vmatmul.mubr.bf16.gmra.mrb[72].mxu0 %v13686_v44  ;;  %10954 = vmatmul.mubr.bf16.gmra.mrb[188].mxu1 %v13987_v9  ;;  %v4422_v44 = vld [vmem:[#allocation2 + $0x40] sm:$0xfe] }
 0x31e   : > { %10645 = vmatprep.mubr.msk.bf16.mxu0 %vm12417_vm6, %v15139_v54  ;;  %10957 = vmatprep.mubr.msk.bf16.mxu1 %vm12417_vm6, %v15139_v54  ;;  %v4446_v30 = vrot.slane %v4422_v44, 1  ;;  %v12060_v44 = vld [vmem:[%s15115_s2 + $0x1c0] sm:$0xff]  }
 0x31f   : > { %10697 = vmatprep.subr.bf16.mxu0 %v15139_v54 }
 0x325   : > { %10646 = vmatmul.mubr.bf16.gmra.mrb[76].mxu0 %v13591_v14  ;;  %10958 = vmatmul.mubr.bf16.gmra.mrb[192].mxu1 %v13997_v59  ;;  %v4448_v14 = vsel %vm2037_vm9, %v4446_v30, %v4447_v23  ;;  %v3075_v23 = vsel %vm1669_vm8, %v13343_v62, %v3074_v27  ;;  %v3234_v30 = vld [vmem:[#allocation2 + $0x10] sm:$0xfe] }
 0x326   : > { %10649 = vmatprep.mubr.msk.bf16.mxu0 %vm12417_vm6, %v15139_v54  ;;  %10977 = vmatprep.mubr.msk.bf16.mxu1 %vm12417_vm6, %v15139_v54  ;;  %v12062_v62 = vld [vmem:[%s15115_s2 + $0x1d0] sm:$0xff]  }
 0x32d   : > { %10650 = vmatmul.mubr.bf16.gmra.mrb[80].mxu0 %v14012_v58  ;;  %10978 = vmatmul.mubr.bf16.vlgmr.msra.gmra.mrb[168].mxu1 %v4448_v14  ;;  %v12063_v14 = vld [vmem:[%s15115_s2 + $0x1d8] sm:$0xff]  }
 0x32e   : > { %10669 = vmatprep.mubr.msk.bf16.mxu0 %vm12417_vm6, %v15139_v54  ;;  %11006 = vmatpush3.bf16.msra.mxu1 %v12044_v60  ;;  %v3260_v60 = vrot.slane %v3234_v30, 1 }
 0x32f   : > { %11007 = vmatprep.subr.bf16.mxu1 %v15139_v54  ;;  %10981 = vmatprep.mubr.msk.bf16.mxu1 %vm12417_vm6, %v15139_v54 }
 0x332   : > { %11008 = vmatpush3.bf16.msra.mxu1 %v12045_v4  ;;  %v12065_v4 = vld [vmem:[%s15115_s2 + $0x1e8] sm:$0xff]  }
 0x333   : > { %11009 = vmatprep.subr.bf16.mxu1 %v15139_v54 }
 0x335   : > { %10670 = vmatmul.mubr.bf16.vlgmr.msra.gmra.mrb[56].mxu0 %v13143_v35  ;;  %10982 = vmatmul.mubr.bf16.gmra.mrb[172].mxu1 %v4450_v45  ;;  %v12050_v35 = vld [vmem:[%s15115_s2 + $0x208] sm:$0xff]   ;;  %v12070_v45 = vld [vmem:[%s15115_s2 + $0x210] sm:$0xff]  }
 0x336   : > { %10673 = vmatprep.mubr.msk.bf16.mxu0 %vm12417_vm6, %v15139_v54  ;;  %11010 = vmatpush3.bf16.msra.mxu1 %v12046_v43 }
 0x337   : > { %10985 = vmatprep.mubr.msk.bf16.mxu1 %vm12417_vm6, %v15139_v54  ;;  %11011 = vmatprep.subr.bf16.mxu1 %v15139_v54 }
 0x338   : > { %10698 = vmatpush3.bf16.msra.mxu0 %v12048_v11  ;;  %v12072_v11 = vld [vmem:[%s15115_s2 + $0x220] sm:$0xff]  }
 0x339   : > { %10699 = vmatprep.subr.bf16.mxu0 %v15139_v54 }
 0x33a   : > { %11012 = vmatpush3.bf16.msra.mxu1 %v12047_v37  ;;  %v12074_v37 = vld [vmem:[%s15115_s2 + $0x230] sm:$0xff]  }
 0x33b   : > { %11013 = vmatprep.subr.bf16.mxu1 %v15139_v54 }
 0x33c   : > { %10700 = vmatpush3.bf16.msra.mxu0 %v12050_v35  ;;  %v4856_v35 = vshll.u32 %v4791_v13, 16 }
 0x33d   : > { %10674 = vmatmul.mubr.bf16.gmra.mrb[60].mxu0 %v13663_v55  ;;  %10986 = vmatmul.mubr.bf16.gmra.mrb[176].mxu1 %v14057_v1  ;;  %v12053_v55 = vld [vmem:[%s15115_s2 + $0x218] sm:$0xff]  }
 0x33e   : > { %10677 = vmatprep.mubr.msk.bf16.mxu0 %vm12417_vm6, %v15139_v54  ;;  %10989 = vmatprep.mubr.msk.bf16.mxu1 %vm12417_vm6, %v15139_v54 }
 0x33f   : > { %11014 = vmatpush3.bf16.msra.mxu1 %v12049_v40  ;;  %10701 = vmatprep.subr.bf16.mxu0 %v15139_v54  ;;  %v4858_v40 = vrot.slane %v4856_v35, 1 }
 0x340   : > { %10702 = vmatpush3.bf16.msra.mxu0 %v12051_v7  ;;  %11015 = vmatprep.subr.bf16.mxu1 %v15139_v54  ;;  %v4860_v7 = vshrl.u32 %v4791_v13, 16 }
 0x341   : > { %10703 = vmatprep.subr.bf16.mxu0 %v15139_v54 }
 0x343   : > { %11016 = vmatpush3.bf16.msra.mxu1 %v12052_v16  ;;  %v4862_v16 = vor.u32 %v4860_v7, %v4858_v40 }
 0x344   : > { %10704 = vmatpush3.bf16.msra.mxu0 %v12053_v55  ;;  %11017 = vmatprep.subr.bf16.mxu1 %v15139_v54 }
 0x345   : > { %10678 = vmatmul.mubr.bf16.gmra.mrb[64].mxu0 %v13690_v42  ;;  %10990 = vmatmul.mubr.bf16.gmra.mrb[180].mxu1 %v14082_v46  ;;  %v12056_v42 = vld [vmem:[%s15115_s2 + $0x228] sm:$0xff]  }
 0x346   : > { %10681 = vmatprep.mubr.msk.bf16.mxu0 %vm12417_vm6, %v15139_v54  ;;  %10993 = vmatprep.mubr.msk.bf16.mxu1 %vm12417_vm6, %v15139_v54 }
 0x347   : > { %10705 = vmatprep.subr.bf16.mxu0 %v15139_v54  ;;  %11018 = vmatpush3.bf16.msra.mxu1 %v12055_v52  ;;  %v12080_v52 = vld [vmem:[%s15117_s4 + $0x10] sm:$0xff]  }
 0x348   : > { %10706 = vmatpush3.bf16.msra.mxu0 %v12054_v26  ;;  %11019 = vmatprep.subr.bf16.mxu1 %v15139_v54  ;;  %v12081_v26 = vld [vmem:[%s15117_s4 + $0x18] sm:$0xff]  }
 0x349   : > { %10707 = vmatprep.subr.bf16.mxu0 %v15139_v54 }
 0x34b   : > { %11020 = vmatpush3.bf16.msra.mxu1 %v12058_v38  ;;  %v12082_v38 = vld [vmem:[%s15117_s4 + $0x20] sm:$0xff]  }
 0x34c   : > { %10708 = vmatpush3.bf16.msra.mxu0 %v12056_v42  ;;  %11049 = vmatprep.subr.bf16.mxu1 %v15139_v54  ;;  %v12085_v42 = vld [vmem:[%s15117_s4 + $0x38] sm:$0xff]  }
 0x34d   : > { %10682 = vmatmul.mubr.bf16.gmra.mrb[68].mxu0 %v13711_v24  ;;  %10994 = vmatmul.mubr.bf16.gmra.mrb[184].mxu1 %v14108_v51  ;;  %v3059_v24 = vsel %vm1669_vm8, %v13724_v21, %v3058_v56  ;;  %v3067_v21 = vsel %vm1669_vm8, %v3062_v10, %v13335_v3  ;;  %v12061_v3 = vld [vmem:[%s15115_s2 + $0x1c8] sm:$0xff]   ;;  %v12087_v56 = vld [vmem:[%s15117_s4 + $0x40] sm:$0xff]  }
 0x34e   : > { %10685 = vmatprep.mubr.msk.bf16.mxu0 %vm12417_vm6, %v15139_v54  ;;  %10997 = vmatprep.mubr.msk.bf16.mxu1 %vm12417_vm6, %v15139_v54 }
 0x34f   : > { %10709 = vmatprep.subr.bf16.mxu0 %v15139_v54 }
 0x350   : > { %10710 = vmatpush3.bf16.msra.mxu0 %v12057_v17 }
 0x351   : > { %10711 = vmatprep.subr.bf16.mxu0 %v15139_v54 }
 0x354   : > { %10712 = vmatpush3.bf16.msra.mxu0 %v12059_v49 }
 0x355   : > { %10686 = vmatmul.mubr.bf16.gmra.mrb[72].mxu0 %v3059_v24  ;;  %10998 = vmatmul.mubr.bf16.gmra.mrb[188].mxu1 %v14132_v32 }
 0x356   : > { %10689 = vmatprep.mubr.msk.bf16.mxu0 %vm12417_vm6, %v15139_v54  ;;  %11001 = vmatprep.mubr.msk.bf16.mxu1 %vm12417_vm6, %v15139_v54 }
 0x35d   : > { %10690 = vmatmul.mubr.bf16.gmra.mrb[76].mxu0 %v3067_v21  ;;  %11002 = vmatmul.mubr.bf16.gmra.mrb[192].mxu1 %v14122_v12 }
 0x35e   : > { %10693 = vmatprep.mubr.msk.bf16.mxu0 %vm12417_vm6, %v15139_v54  ;;  %11021 = vmatprep.mubr.msk.bf16.mxu1 %vm12417_vm6, %v15139_v54 }
 0x365   : > { %10694 = vmatmul.mubr.bf16.gmra.mrb[80].mxu0 %v3075_v23  ;;  %11022 = vmatmul.mubr.bf16.vlgmr.msra.gmra.mrb[168].mxu1 %v14005_v48  ;;  %v3262_v48 = vsel %vm2037_vm9, %v3260_v60, %v13768_v47  ;;  %v12064_v47 = vld [vmem:[%s15115_s2 + $0x1e0] sm:$0xff]  }
 0x366   : > { %10713 = vmatprep.mubr.msk.bf16.mxu0 %vm12417_vm6, %v15139_v54  ;;  %11050 = vmatpush3.bf16.msra.mxu1 %v12060_v44 }
 0x367   : > { %11051 = vmatprep.subr.bf16.mxu1 %v15139_v54  ;;  %11025 = vmatprep.mubr.msk.bf16.mxu1 %vm12417_vm6, %v15139_v54 }
 0x36a   : > { %11052 = vmatpush3.bf16.msra.mxu1 %v12061_v3 }
 0x36b   : > { %11053 = vmatprep.subr.bf16.mxu1 %v15139_v54 }
 0x36d   : > { %10714 = vmatmul.mubr.bf16.vlgmr.msra.gmra.mrb[56].mxu0 %v3262_v48  ;;  %11026 = vmatmul.mubr.bf16.gmra.mrb[172].mxu1 %v14023_v41  ;;  %v4623_v41 = vld [vmem:[#allocation2 + $0x78] sm:$0x7f] }
 0x36e   : > { %10717 = vmatprep.mubr.msk.bf16.mxu0 %vm12417_vm6, %v15139_v54  ;;  %11054 = vmatpush3.bf16.msra.mxu1 %v12062_v62  ;;  %v12090_v48 = vld [vmem:[%s15117_s4 + $0x58] sm:$0xff]  }
 0x36f   : > { %11029 = vmatprep.mubr.msk.bf16.mxu1 %vm12417_vm6, %v15139_v54  ;;  %11055 = vmatprep.subr.bf16.mxu1 %v15139_v54 }
 0x372   : > { %11056 = vmatpush3.bf16.msra.mxu1 %v12063_v14 }
 0x373   : > { %11057 = vmatprep.subr.bf16.mxu1 %v15139_v54 }
 0x375   : > { %10718 = vmatmul.mubr.bf16.gmra.mrb[60].mxu0 %v13803_v53  ;;  %11030 = vmatmul.mubr.bf16.gmra.mrb[176].mxu1 %v13805_v15  ;;  %v12066_v53 = vld [vmem:[%s15115_s2 + $0x1f0] sm:$0xff]   ;;  %v12067_v15 = vld [vmem:[%s15115_s2 + $0x1f8] sm:$0xff]  }
 0x376   : > { %10721 = vmatprep.mubr.msk.bf16.mxu0 %vm12417_vm6, %v15139_v54  ;;  %11033 = vmatprep.mubr.msk.bf16.mxu1 %vm12417_vm6, %v15139_v54 }
 0x377   : > { %11058 = vmatpush3.bf16.msra.mxu1 %v12064_v47  ;;  %v12091_v47 = vld [vmem:[%s15117_s4 + $0x60] sm:$0xff]  }
 0x378   : > { %11059 = vmatprep.subr.bf16.mxu1 %v15139_v54 }
 0x37b   : > { %11060 = vmatpush3.bf16.msra.mxu1 %v12065_v4 }
 0x37c   : > { %11061 = vmatprep.subr.bf16.mxu1 %v15139_v54 }
 0x37d   : > { %10722 = vmatmul.mubr.bf16.gmra.mrb[64].mxu0 %v13828_v18  ;;  %11034 = vmatmul.mubr.bf16.gmra.mrb[180].mxu1 %v13830_v5  ;;  %v3269_v18 = vrot.slane %v14103_v31, 1 }
 0x37e   : > { %10725 = vmatprep.mubr.msk.bf16.mxu0 %vm12417_vm6, %v15139_v54  ;;  %11037 = vmatprep.mubr.msk.bf16.mxu1 %vm12417_vm6, %v15139_v54 }
 0x37f   : > { %11062 = vmatpush3.bf16.msra.mxu1 %v12066_v53  ;;  %v3270_v5 = vsel %vm2037_vm9, %v13844_v57, %v3269_v18  ;;  %v3273_v57 = vrot.slane %v14140_v34, 1  ;;  %v12089_v34 = vld [vmem:[%s15117_s4 + $0x50] sm:$0xff]  }
 0x380   : > { %11063 = vmatprep.subr.bf16.mxu1 %v15139_v54 }
 0x383   : > { %11064 = vmatpush3.bf16.msra.mxu1 %v12067_v15 }
 0x384   : > { %11093 = vmatprep.subr.bf16.mxu1 %v15139_v54 }
 0x385   : > { %10726 = vmatmul.mubr.bf16.gmra.mrb[68].mxu0 %v13852_v50  ;;  %11038 = vmatmul.mubr.bf16.gmra.mrb[184].mxu1 %v13854_v29  ;;  %v3271_v50 = vrot.slane %v14012_v58, 1  ;;  %v12069_v58 = vld [vmem:[%s15115_s2 + $0x208] sm:$0xff]  }
 0x386   : > { %10729 = vmatprep.mubr.msk.bf16.mxu0 %vm12417_vm6, %v15139_v54  ;;  %11041 = vmatprep.mubr.msk.bf16.mxu1 %vm12417_vm6, %v15139_v54 }
 0x387   : > { %v3272_v29 = vsel %vm2037_vm9, %v3269_v18, %v3271_v50  ;;  %v3274_v43 = vsel %vm2037_vm9, %v3271_v50, %v3273_v57 }
 0x38d   : > { %10730 = vmatmul.mubr.bf16.gmra.mrb[72].mxu0 %v3270_v5  ;;  %11042 = vmatmul.mubr.bf16.gmra.mrb[188].mxu1 %v13963_v25  ;;  %v12068_v25 = vld [vmem:[%s15115_s2 + $0x200] sm:$0xff]  }
 0x38e   : > { %10733 = vmatprep.mubr.msk.bf16.mxu0 %vm12417_vm6, %v15139_v54  ;;  %11045 = vmatprep.mubr.msk.bf16.mxu1 %vm12417_vm6, %v15139_v54 }
 0x395   : > { %10734 = vmatmul.mubr.bf16.gmra.mrb[76].mxu0 %v3272_v29  ;;  %11046 = vmatmul.mubr.bf16.gmra.mrb[192].mxu1 %v4623_v41  ;;  %v12092_v29 = vld [vmem:[%s15117_s4 + $0x68] sm:$0xff]  }
 0x396   : > { %10737 = vmatprep.mubr.msk.bf16.mxu0 %vm12417_vm6, %v15139_v54  ;;  %11065 = vmatprep.mubr.msk.bf16.mxu1 %vm12417_vm6, %v15139_v54 }
 0x39d   : > { %10738 = vmatmul.mubr.bf16.gmra.mrb[80].mxu0 %v3274_v43  ;;  %11066 = vmatmul.mubr.bf16.vlgmr.msra.gmra.mrb[168].mxu1 %v13423_v39  ;;  %v12071_v39 = vld [vmem:[%s15115_s2 + $0x218] sm:$0xff]  }
 0x39e   : > { %11094 = vmatpush3.bf16.msra.mxu1 %v12068_v25  ;;  %11069 = vmatprep.mubr.msk.bf16.mxu1 %vm12417_vm6, %v15139_v54  ;;  %v5257_v25 = vld [vmem:[#allocation4 + $0x8] sm:$0x1] }
 0x39f   : > { %11095 = vmatprep.subr.bf16.mxu1 %v15139_v54 }
 0x3a2   : > { %11096 = vmatpush3.bf16.msra.mxu1 %v12069_v58  ;;  %v12093_v58 = vld [vmem:[%s15117_s4 + $0x70] sm:$0xff]  }
 0x3a3   : > { %11097 = vmatprep.subr.bf16.mxu1 %v15139_v54 }
 0x3a5   : > { %11070 = vmatmul.mubr.bf16.gmra.mrb[172].mxu1 %v13915_v63  ;;  %v12073_v63 = vld [vmem:[%s15115_s2 + $0x228] sm:$0xff]  }
 0x3a6   : > { %11098 = vmatpush3.bf16.msra.mxu1 %v12070_v45  ;;  %11073 = vmatprep.mubr.msk.bf16.mxu1 %vm12417_vm6, %v15139_v54  ;;  %v14351_v45 = vld [vmem:[%s15117_s4 + $0x80] sm:$0xff]  }
 0x3a7   : > { %11099 = vmatprep.subr.bf16.mxu1 %v15139_v54 }
 0x3aa   : > { %11100 = vmatpush3.bf16.msra.mxu1 %v12071_v39 }
 0x3ab   : > { %11101 = vmatprep.subr.bf16.mxu1 %v15139_v54 }
 0x3ad   : > { %11074 = vmatmul.mubr.bf16.gmra.mrb[176].mxu1 %v13941_v0  ;;  %v12075_v0 = vld [vmem:[%s15115_s2 + $0x238] sm:$0xff]  }
 0x3ae   : > { %11077 = vmatprep.mubr.msk.bf16.mxu1 %vm12417_vm6, %v15139_v54  ;;  %11102 = vmatpush3.bf16.msra.mxu1 %v12072_v11 }
 0x3af   : > { %11103 = vmatprep.subr.bf16.mxu1 %v15139_v54 }
 0x3b2   : > { %11104 = vmatpush3.bf16.msra.mxu1 %v12073_v63 }
 0x3b3   : > { %11105 = vmatprep.subr.bf16.mxu1 %v15139_v54 }
 0x3b5   : > { %11078 = vmatmul.mubr.bf16.gmra.mrb[180].mxu1 %v13967_v20  ;;  %v4859_v20 = vsel %vm1669_vm8, %v13997_v59, %v4858_v40  ;;  %v12076_v59 = vld [vmem:[%s15117_s4] sm:$0xff]  }
 0x3b6   : > { %11081 = vmatprep.mubr.msk.bf16.mxu1 %vm12417_vm6, %v15139_v54  ;;  %11106 = vmatpush3.bf16.msra.mxu1 %v12074_v37 }
 0x3b7   : > { %11107 = vmatprep.subr.bf16.mxu1 %v15139_v54  ;;  %11161 = vmatprep.subr.bf16.mxu0 %v12076_v59 }
 0x3b8   : > { %11162 = vmatpush3.bf16.msra.mxu0 %v12076_v59 }
 0x3ba   : > { %11108 = vmatpush3.bf16.msra.mxu1 %v12075_v0 }
 0x3bb   : > { %11137 = vmatprep.subr.bf16.mxu1 %v12087_v56 }
 0x3bd   : > { %11082 = vmatmul.mubr.bf16.gmra.mrb[184].mxu1 %v13987_v9  ;;  %v5045_v9 = vrot.slane %v5021_v28, 1 }
 0x3be   : > { %11085 = vmatprep.mubr.msk.bf16.mxu1 %vm12417_vm6, %v15139_v54 }
 0x3bf   : > { %v5047_v55 = vsel %vm2037_vm9, %v5045_v9, %v14026_v33  ;;  %v12079_v33 = vld [vmem:[%s15117_s4 + $0x8] sm:$0xff]  }
 0x3c0   : > { %11163 = vmatprep.subr.bf16.mxu0 %v12079_v33 }
 0x3c1   : > { %11164 = vmatpush3.bf16.msra.mxu0 %v12079_v33 }
 0x3c2   : > { %11165 = vmatprep.subr.bf16.mxu0 %v12080_v52 }
 0x3c5   : > { %11086 = vmatmul.mubr.bf16.gmra.mrb[188].mxu1 %v4859_v20  ;;  %11166 = vmatpush3.bf16.msra.mxu0 %v12080_v52 }
 0x3c6   : > { %11089 = vmatprep.mubr.msk.bf16.mxu1 %vm12417_vm6, %v15139_v54  ;;  %11167 = vmatprep.subr.bf16.mxu0 %v12081_v26 }
 0x3c9   : > { %11168 = vmatpush3.bf16.msra.mxu0 %v12081_v26 }
 0x3ca   : > { %11169 = vmatprep.subr.bf16.mxu0 %v12082_v38 }
 0x3cd   : > { %11090 = vmatmul.mubr.bf16.gmra.mrb[192].mxu1 %v4862_v16  ;;  %11170 = vmatpush3.bf16.msra.mxu0 %v12082_v38  ;;  %v12096_v16 = vld [vmem:[%s15117_s4 + $0x78] sm:$0xff]  }
 0x3ce   : > { %11109 = vmatprep.mubr.msk.bf16.mxu1 %vm12417_vm6, %v15139_v54  ;;  %11171 = vmatprep.subr.bf16.mxu0 %v12083_v36 }
 0x3d1   : > { %11172 = vmatpush3.bf16.msra.mxu0 %v12083_v36 }
 0x3d5   : > { %11110 = vmatmul.mubr.bf16.vlgmr.msra.gmra.mrb[168].mxu1 %v5047_v55  ;;  %v5441_v55 = vld [vmem:[#allocation4] sm:$0xf] }
 0x3d6   : > { %11113 = vmatprep.mubr.msk.bf16.mxu1 %vm12417_vm6, %v15139_v54  ;;  %11138 = vmatpush3.bf16.msra.mxu1 %v12087_v56 }
 0x3dd   : > { %11114 = vmatmul.mubr.bf16.gmra.mrb[172].mxu1 %v14057_v1  ;;  %v5056_v1 = vrot.slane %v4791_v13, 1 }
 0x3de   : > { %11117 = vmatprep.mubr.msk.bf16.mxu1 %vm12417_vm6, %v15139_v54 }
 0x3e5   : > { %11118 = vmatmul.mubr.bf16.gmra.mrb[176].mxu1 %v14082_v46  ;;  %v5057_v46 = vsel %vm2037_vm9, %v14122_v12, %v5056_v1 }
 0x3e6   : > { %11121 = vmatprep.mubr.msk.bf16.mxu1 %vm12417_vm6, %v15139_v54 }
 0x3ed   : > { %11122 = vmatmul.mubr.bf16.gmra.mrb[180].mxu1 %v14108_v51 }
 0x3ee   : > { %11125 = vmatprep.mubr.msk.bf16.mxu1 %vm12417_vm6, %v15139_v54 }
 0x3f5   : > { %11126 = vmatmul.mubr.bf16.gmra.mrb[184].mxu1 %v14132_v32  ;;  %v12088_v32 = vld [vmem:[%s15117_s4 + $0x48] sm:$0xff]  }
 0x3f6   : > { %11129 = vmatprep.mubr.msk.bf16.mxu1 %vm12417_vm6, %v15139_v54  ;;  %11139 = vmatprep.subr.bf16.mxu1 %v12088_v32 }
 0x3f7   : > { %11140 = vmatpush3.bf16.msra.mxu1 %v12088_v32 }
 0x3f8   : > { %11141 = vmatprep.subr.bf16.mxu1 %v12089_v34 }
 0x3fb   : > { %11142 = vmatpush3.bf16.msra.mxu1 %v12089_v34 }
 0x3fc   : > { %11143 = vmatprep.subr.bf16.mxu1 %v12090_v48 }
 0x3fd   : > { %11130 = vmatmul.mubr.bf16.gmra.mrb[188].mxu1 %v5057_v46 }
 0x3fe   : > { %11133 = vmatprep.mubr.msk.bf16.mxu1 %vm12417_vm6, %v15139_v54  ;;  %v12084_v54 = vld [vmem:[%s15117_s4 + $0x30] sm:$0xff]   ;;  %vm5380_vm6 = vcmask 1042432  }
 0x3ff   : > { %11173 = vmatprep.subr.bf16.mxu0 %v12084_v54  ;;  %11144 = vmatpush3.bf16.msra.mxu1 %v12090_v48  ;;  %vm5382_vm10 = vmand %vm5380_vm6, %vm5381_vm7 }
 0x400   : > { %11174 = vmatpush3.bf16.msra.mxu0 %v12084_v54  ;;  %11145 = vmatprep.subr.bf16.mxu1 %v12091_v47 }
 0x401   : > { %11175 = vmatprep.subr.bf16.mxu0 %v12085_v42 }
 0x403   : > { %11146 = vmatpush3.bf16.msra.mxu1 %v12091_v47 }
 0x404   : > { %11176 = vmatpush3.bf16.msra.mxu0 %v12085_v42  ;;  %11147 = vmatprep.subr.bf16.mxu1 %v12092_v29 }
 0x405   : > { %11134 = vmatmul.mubr.bf16.gmra.mrb[192].mxu1 %v5056_v1  ;;  %11185 = vmatprep.subr.bf16.mxu0 %v14351_v45 }
 0x407   : > { %11148 = vmatpush3.bf16.msra.mxu1 %v12092_v29 }
 0x408   : > { %11149 = vmatprep.subr.bf16.mxu1 %v12093_v58 }
 0x40b   : > { %11150 = vmatpush3.bf16.msra.mxu1 %v12093_v58 }
 0x40c   : > { %11151 = vmatprep.subr.bf16.mxu1 %v12096_v16 }
 0x40f   : > { %11152 = vmatpush3.bf16.msra.mxu1 %v12096_v16  ;;  %v14400_v16 = vld [vmem:[%s15117_s4 + $0xc0] sm:$0xff]  }
 0x440   : > { %v3364_v31 = vpop.f32.mrb[56].mxu0 }
 0x441   : > { %3433 = vst [vmem:[#allocation3] sm:$0xff] %v3364_v31  ;;  %v10715_v61 = vpop.f32.mrb[57].mxu0 }
 0x442   : > { %v3367_v51 = vpop.f32.mrb[58].mxu0 }
 0x443   : > { %3434 = vst [vmem:[#allocation3 + $0x8] sm:$0xff] %v3367_v51  ;;  %v10716_v17 = vpop.f32.mrb[59].mxu0 }
 0x448   : > { %v3372_v12 = vpop.f32.mrb[60].mxu0 }
 0x449   : > { %3435 = vst [vmem:[#allocation3 + $0x10] sm:$0xff] %v3372_v12  ;;  %v10719_v49 = vpop.f32.mrb[61].mxu0 }
 0x44a   : > { %v3375_v24 = vpop.f32.mrb[62].mxu0  ;;  %v5230_v10 = vld [vmem:[#allocation3] ss:$2 sm:$0x7f] }
 0x44b   : > { %3436 = vst [vmem:[#allocation3 + $0x18] sm:$0xff] %v3375_v24  ;;  %v10720_v22 = vpop.f32.mrb[63].mxu0  ;;  %v5232_v19 = vld [vmem:[#allocation3 + $0x1] ss:$2 sm:$0x7f] }
 0x44c   : > { %v5237_v30 = vmax.f32 %v5230_v10, %v5232_v19  ;;  %v5291_v49 = vld [vmem:[#allocation4 + $0x8] sm:$0xe] }
 0x450   : > { %v3380_v21 = vpop.f32.mrb[64].mxu0 }
 0x451   : > { %3437 = vst [vmem:[#allocation3 + $0x20] sm:$0xff] %v3380_v21  ;;  %v10723_v27 = vpop.f32.mrb[65].mxu0 }
 0x452   : > { %v3383_v44 = vpop.f32.mrb[66].mxu0  ;;  %v5234_v23 = vld [vmem:[#allocation3 + $0x10] ss:$2 sm:$0x7f] }
 0x453   : > { %v5236_v3 = vld [vmem:[#allocation3 + $0x11] ss:$2 sm:$0x7f]  ;;  %3438 = vst [vmem:[#allocation3 + $0x28] sm:$0xff] %v3383_v44  ;;  %v10724_v62 = vpop.f32.mrb[67].mxu0 }
 0x454   : > { %v5238_v60 = vmax.f32 %v5234_v23, %v5236_v3 }
 0x456   : > { %v5239_v14 = vmax.f32 %v5237_v30, %v5238_v60 }
 0x458   : > { %v5246_v4 = vadd.f32 %v12510_v8, %v5239_v14  ;;  %v3388_v53 = vpop.f32.mrb[68].mxu0  ;;  %v5320_v14 = vld [vmem:[#allocation4 + $0x10] sm:$0x3] }
 0x459   : > { %3439 = vst [vmem:[#allocation3 + $0x30] sm:$0xff] %v3388_v53  ;;  %v10727_v15 = vpop.f32.mrb[69].mxu0 }
 0x45a   : > { %v5247_v18 = vmax.f32 %v5246_v4, 0.0  ;;  %v3391_v5 = vpop.f32.mrb[70].mxu0  ;;  %v5261_v43 = vld [vmem:[#allocation3 + $0x20] ss:$2 sm:$0x7f] }
 0x45b   : > { %3440 = vst [vmem:[#allocation3 + $0x38] sm:$0xff] %v3391_v5  ;;  %v10728_v50 = vpop.f32.mrb[71].mxu0  ;;  %v5263_v11 = vld [vmem:[#allocation3 + $0x21] ss:$2 sm:$0x7f] }
 0x45c   : > { %v9635_v41 = vpack.c.bf16 %v5247_v18, %v5247_v18  ;;  %v5268_v40 = vmax.f32 %v5261_v43, %v5263_v11  ;;  %v5767_v4 = vld [vmem:[#allocation4] sm:$0xe]  ;;  %v12097_v5 = vld [vmem:[%s15117_s4 + $0x88] sm:$0xff]  }
 0x45e   : > { %v5252_v57 = vrot.slane %v9635_v41, 7 }
 0x460   : > { %v5253_v39 = vrot.slane %v5252_v57, 4  ;;  %5256 = vst [vmem:[#allocation4 + $0x4] sm:$0xe] %v5252_v57  ;;  %v3396_v63 = vpop.f32.mrb[72].mxu0 }
 0x461   : > { %3441 = vst [vmem:[#allocation3 + $0x40] sm:$0xff] %v3396_v63  ;;  %v10731_v37 = vpop.f32.mrb[73].mxu0  ;;  %v12098_v63 = vld [vmem:[%s15117_s4 + $0x90] sm:$0xff]  }
 0x462   : > { %v5258_v0 = vsel %vm12487_vm2, %v5253_v39, %v5257_v25  ;;  %v5265_v13 = vld [vmem:[#allocation3 + $0x30] ss:$2 sm:$0x7f]  ;;  %v5267_v35 = vld [vmem:[#allocation3 + $0x31] ss:$2 sm:$0x7f] }
 0x463   : > { %5259 = vst [vmem:[#allocation4 + $0x8] sm:$0x1] %v5258_v0  ;;  %v5269_v20 = vmax.f32 %v5265_v13, %v5267_v35  ;;  %v3399_v7 = vpop.f32.mrb[74].mxu0  ;;  %v12100_v35 = vld [vmem:[%s15117_s4 + $0xa0] sm:$0xff]  }
 0x464   : > { %3442 = vst [vmem:[#allocation3 + $0x48] sm:$0xff] %v3399_v7  ;;  %v10732_v28 = vpop.f32.mrb[75].mxu0  ;;  %v12105_v7 = vld [vmem:[%s15117_s4 + $0xb8] sm:$0xff]  }
 0x465   : > { %v5270_v9 = vmax.f32 %v5268_v40, %v5269_v20  ;;  %v12101_v40 = vld [vmem:[%s15117_s4 + $0xa8] sm:$0xff]   ;;  %v12102_v20 = vld [vmem:[%s15117_s4 + $0xb0] sm:$0xff]  }
 0x467   : > { %v5271_v59 = vadd.f32 %v12510_v8, %v5270_v9  ;;  %v5442_v33 = vld [vmem:[#allocation4 + $0x4] sm:$0xf] }
 0x468   : > { %v3404_v1 = vpop.f32.mrb[76].mxu0  ;;  %v9134_v52 = vcombine.low %v5441_v55, %v5442_v33  ;;  %v9170_v18 = vcombine.low %v5767_v4, %v5442_v33 }
 0x469   : > { %v5272_v46 = vmax.f32 %v5271_v59, 0.0  ;;  %3443 = vst [vmem:[#allocation3 + $0x50] sm:$0xff] %v3404_v1  ;;  %v10735_v26 = vpop.f32.mrb[77].mxu0 }
 0x46a   : > { %11177 = vmatprep.mubr.bf16.mxu0 %v9134_v52  ;;  %v3407_v38 = vpop.f32.mrb[78].mxu0  ;;  %v5505_v15 = vshll.u32 %v9134_v52, 16  ;;  %v5503_v41 = vshrl.u32 %v9134_v52, 16  ;;  %v5792_v25 = vrot.slane %v9170_v18, 1 }
 0x46b   : > { %v9636_v36 = vpack.c.bf16 %v5272_v46, %v5272_v46  ;;  %3444 = vst [vmem:[#allocation3 + $0x58] sm:$0xff] %v3407_v38  ;;  %v10736_v54 = vpop.f32.mrb[79].mxu0  ;;  %v5296_v17 = vld [vmem:[#allocation3 + $0x40] ss:$2 sm:$0x7f] }
 0x46c   : > { %v5298_v56 = vld [vmem:[#allocation3 + $0x41] ss:$2 sm:$0x7f]  ;;  %v5507_v29 = vrot.slane %v5505_v15, 1 }
 0x46d   : > { %v5278_v42 = vshrl.u32 %v9636_v36, 16  ;;  %v5281_v31 = vshll.u32 %v9636_v36, 16  ;;  %v5303_v21 = vmax.f32 %v5296_v17, %v5298_v56 }
 0x46e   : > { %v5508_v58 = vor.u32 %v5507_v29, %v5503_v41 }
 0x46f   : > { %v5280_v61 = vrot.slane %v5278_v42, 6  ;;  %v5283_v51 = vrot.slane %v5281_v31, 7 }
 0x470   : > { %v3412_v12 = vpop.f32.mrb[80].mxu0 }
 0x471   : > { %v5284_v24 = vor.u32 %v5283_v51, %v5280_v61  ;;  %3445 = vst [vmem:[#allocation3 + $0x60] sm:$0xff] %v3412_v12  ;;  %v10739_v32 = vpop.f32.mrb[81].mxu0 }
 0x472   : > { %v5300_v22 = vld [vmem:[#allocation3 + $0x50] ss:$2 sm:$0x7f]  ;;  %v5302_v34 = vld [vmem:[#allocation3 + $0x51] ss:$2 sm:$0x7f] }
 0x473   : > { %v5285_v10 = vrot.slane %v5284_v24, 4  ;;  %v5304_v19 = vmax.f32 %v5300_v22, %v5302_v34  ;;  %v3415_v27 = vpop.f32.mrb[82].mxu0  ;;  %v5292_v44 = vsel %vm5290_vm12, %v5284_v24, %v5291_v49  ;;  %vm5415_vm12 = vsmask.f32 7950 }
 0x474   : > { %3446 = vst [vmem:[#allocation3 + $0x68] sm:$0xff] %v3415_v27  ;;  %v10740_v23 = vpop.f32.mrb[83].mxu0  ;;  %5293 = vst [vmem:[#allocation4 + $0x8] sm:$0xe] %v5292_v44 }
 0x475   : > { %5294 = vst [vmem:[#allocation4 + $0xc] sm:$0x1] %v5285_v10  ;;  %v5305_v3 = vmax.f32 %v5303_v21, %v5304_v19  ;;  %v5354_v23 = vld [vmem:[#allocation4 + $0x10] sm:$0xc]  ;;  %vm5416_vm13 = vmand %vm5414_vm11, %vm5415_vm12 }
 0x477   : > { %v5306_v30 = vadd.f32 %v12510_v8, %v5305_v3 }
 0x479   : > { %v5307_v60 = vmax.f32 %v5306_v30, 0.0 }
 0x47b   : > { %v9637_v62 = vpack.c.bf16 %v5307_v60, %v5307_v60  ;;  %v5324_v33 = vld [vmem:[#allocation3 + $0x60] ss:$2 sm:$0x7f]  ;;  %v5326_v1 = vld [vmem:[#allocation3 + $0x61] ss:$2 sm:$0x7f] }
 0x47c   : > { %v5331_v36 = vmax.f32 %v5324_v33, %v5326_v1 }
 0x47d   : > { %v5312_v48 = vrot.slane %v9637_v62, 6 }
 0x47f   : > { %v5313_v47 = vrot.slane %v5312_v48, 4  ;;  %5316 = vst [vmem:[#allocation4 + $0xc] sm:$0xc] %v5312_v48 }
 0x481   : > { %v5321_v53 = vsel %vm5319_vm15, %v5313_v47, %v5320_v14  ;;  %vm5436_vm15 = vsmask.f32 3328 }
 0x482   : > { %5322 = vst [vmem:[#allocation4 + $0x10] sm:$0x3] %v5321_v53  ;;  %vm5437_vm0 = vmand %vm5435_vm14, %vm5436_vm15 }
 0x486   : > { %v14364_v50 = vld [vmem:[#allocation4 + $0x8] sm:$0xff]  }
 0x487   : > { %11178 = vmatmul.mubr.bf16.vlgmr.msra.gmra.mrb[84].mxu0 %v14364_v50  ;;  %v5510_v57 = vshll.u32 %v14364_v50, 16  ;;  %v5793_v43 = vrot.slane %v14364_v50, 1  ;;  %v5514_v11 = vshrl.u32 %v14364_v50, 16 }
 0x488   : > { %11186 = vmatpush3.bf16.msra.mxu0 %v14351_v45  ;;  %v12099_v45 = vld [vmem:[%s15117_s4 + $0x98] sm:$0xff]  }
 0x489   : > { %v5512_v39 = vrot.slane %v5510_v57, 1  ;;  %11187 = vmatprep.subr.bf16.mxu0 %v12097_v5  ;;  %v14377_v37 = vsel %vm2037_vm9, %v5792_v25, %v5793_v43 }
 0x48b   : > { %v5513_v0 = vsel %vm1669_vm8, %v5508_v58, %v5512_v39  ;;  %v14380_v13 = vor.u32 %v5514_v11, %v5512_v39 }
 0x48c   : > { %11153 = vmatprep.mubr.bf16.mxu1 %v5513_v0  ;;  %11188 = vmatpush3.bf16.msra.mxu0 %v12097_v5 }
 0x48d   : > { %11189 = vmatprep.subr.bf16.mxu0 %v12098_v63 }
 0x490   : > { %11190 = vmatpush3.bf16.msra.mxu0 %v12098_v63  ;;  %v5383_v63 = vld [vmem:[#allocation4 + $0x18] sm:$0x7] }
 0x491   : > { %11191 = vmatprep.subr.bf16.mxu0 %v12099_v45 }
 0x494   : > { %11192 = vmatpush3.bf16.msra.mxu0 %v12099_v45 }
 0x495   : > { %11193 = vmatprep.subr.bf16.mxu0 %v12100_v35 }
 0x498   : > { %11194 = vmatpush3.bf16.msra.mxu0 %v12100_v35 }
 0x499   : > { %11195 = vmatprep.subr.bf16.mxu0 %v12101_v40 }
 0x49c   : > { %11196 = vmatpush3.bf16.msra.mxu0 %v12101_v40 }
 0x49d   : > { %11197 = vmatprep.subr.bf16.mxu0 %v12102_v20 }
 0x4a0   : > { %11198 = vmatpush3.bf16.msra.mxu0 %v12102_v20 }
 0x4a1   : > { %11199 = vmatprep.subr.bf16.mxu0 %v12105_v7 }
 0x4a4   : > { %11200 = vmatpush3.bf16.msra.mxu0 %v12105_v7 }
 0x4a5   : > { %11209 = vmatprep.subr.bf16.mxu0 %v14400_v16 }
 0x4a8   : > { %v5147_v28 = vpop.f32.mrb[168].mxu1 }
 0x4a9   : > { %5216 = vst [vmem:[#allocation3 + $0x70] sm:$0xff] %v5147_v28  ;;  %v11111_v9 = vpop.f32.mrb[169].mxu1 }
 0x4aa   : > { %v5150_v55 = vpop.f32.mrb[170].mxu1 }
 0x4ab   : > { %5217 = vst [vmem:[#allocation3 + $0x78] sm:$0xff] %v5150_v55  ;;  %v11112_v59 = vpop.f32.mrb[171].mxu1 }
 0x4b0   : > { %v5155_v52 = vpop.f32.mrb[172].mxu1 }
 0x4b1   : > { %5218 = vst [vmem:[#allocation3 + $0x80] sm:$0xff] %v5155_v52  ;;  %v11115_v46 = vpop.f32.mrb[173].mxu1 }
 0x4b2   : > { %v5328_v26 = vld [vmem:[#allocation3 + $0x70] ss:$2 sm:$0x7f]  ;;  %v5330_v38 = vld [vmem:[#allocation3 + $0x71] ss:$2 sm:$0x7f] }
 0x4b3   : > { %v5332_v54 = vmax.f32 %v5328_v26, %v5330_v38  ;;  %v5158_v42 = vpop.f32.mrb[174].mxu1 }
 0x4b4   : > { %5219 = vst [vmem:[#allocation3 + $0x88] sm:$0xff] %v5158_v42  ;;  %v11116_v31 = vpop.f32.mrb[175].mxu1 }
 0x4b5   : > { %v5333_v61 = vmax.f32 %v5331_v36, %v5332_v54 }
 0x4b7   : > { %v5334_v51 = vadd.f32 %v12510_v8, %v5333_v61 }
 0x4b8   : > { %v5163_v17 = vpop.f32.mrb[176].mxu1 }
 0x4b9   : > { %v5335_v56 = vmax.f32 %v5334_v51, 0.0  ;;  %5220 = vst [vmem:[#allocation3 + $0x90] sm:$0xff] %v5163_v17  ;;  %v11119_v12 = vpop.f32.mrb[177].mxu1 }
 0x4ba   : > { %v5166_v49 = vpop.f32.mrb[178].mxu1 }
 0x4bb   : > { %v9638_v24 = vpack.c.bf16 %v5335_v56, %v5335_v56  ;;  %5221 = vst [vmem:[#allocation3 + $0x98] sm:$0xff] %v5166_v49  ;;  %v11120_v32 = vpop.f32.mrb[179].mxu1  ;;  %v5359_v19 = vld [vmem:[#allocation3 + $0x80] ss:$2 sm:$0x7f] }
 0x4bc   : > { %v5361_v27 = vld [vmem:[#allocation3 + $0x81] ss:$2 sm:$0x7f] }
 0x4bd   : > { %v5341_v22 = vshrl.u32 %v9638_v24, 16  ;;  %v5344_v34 = vshll.u32 %v9638_v24, 16  ;;  %v5366_v48 = vmax.f32 %v5359_v19, %v5361_v27  ;;  %v5417_v24 = vld [vmem:[#allocation4 + $0x18] sm:$0x8] }
 0x4bf   : > { %v5343_v10 = vrot.slane %v5341_v22, 5  ;;  %v5346_v21 = vrot.slane %v5344_v34, 6 }
 0x4c0   : > { %v5171_v44 = vpop.f32.mrb[180].mxu1 }
 0x4c1   : > { %v5347_v3 = vor.u32 %v5346_v21, %v5343_v10  ;;  %5222 = vst [vmem:[#allocation3 + $0xa0] sm:$0xff] %v5171_v44  ;;  %v11123_v30 = vpop.f32.mrb[181].mxu1 }
 0x4c2   : > { %v5363_v60 = vld [vmem:[#allocation3 + $0x90] ss:$2 sm:$0x7f]  ;;  %v5365_v62 = vld [vmem:[#allocation3 + $0x91] ss:$2 sm:$0x7f] }
 0x4c3   : > { %v5367_v14 = vmax.f32 %v5363_v60, %v5365_v62  ;;  %v5174_v47 = vpop.f32.mrb[182].mxu1  ;;  %v5348_v4 = vrot.slane %v5347_v3, 4  ;;  %v5355_v53 = vsel %vm5353_vm4, %v5347_v3, %v5354_v23 }
 0x4c4   : > { %5223 = vst [vmem:[#allocation3 + $0xa8] sm:$0xff] %v5174_v47  ;;  %v11124_v15 = vpop.f32.mrb[183].mxu1  ;;  %5356 = vst [vmem:[#allocation4 + $0x10] sm:$0xc] %v5355_v53 }
 0x4c5   : > { %v5368_v18 = vmax.f32 %v5366_v48, %v5367_v14  ;;  %5357 = vst [vmem:[#allocation4 + $0x14] sm:$0x3] %v5348_v4  ;;  %v5438_v48 = vld [vmem:[#allocation4 + $0x20] sm:$0xf] }
 0x4c7   : > { %v5369_v5 = vadd.f32 %v12510_v8, %v5368_v18 }
 0x4c8   : > { %v5179_v29 = vpop.f32.mrb[184].mxu1 }
 0x4c9   : > { %v5370_v41 = vmax.f32 %v5369_v5, 0.0  ;;  %5224 = vst [vmem:[#allocation3 + $0xb0] sm:$0xff] %v5179_v29  ;;  %v11127_v57 = vpop.f32.mrb[185].mxu1  ;;  %v14413_v5 = vld [vmem:[#allocation4 + $0x8] sm:$0xf] }
 0x4ca   : > { %v5182_v25 = vpop.f32.mrb[186].mxu1 }
 0x4cb   : > { %v9639_v58 = vpack.c.bf16 %v5370_v41, %v5370_v41  ;;  %5225 = vst [vmem:[#allocation3 + $0xb8] sm:$0xff] %v5182_v25  ;;  %v11128_v39 = vpop.f32.mrb[187].mxu1  ;;  %v5387_v45 = vld [vmem:[#allocation3 + $0xa0] ss:$2 sm:$0x7f] }
 0x4cc   : > { %v5389_v35 = vld [vmem:[#allocation3 + $0xa1] ss:$2 sm:$0x7f] }
 0x4cd   : > { %v5375_v11 = vrot.slane %v9639_v58, 5  ;;  %v5394_v55 = vmax.f32 %v5387_v45, %v5389_v35  ;;  %v5924_v25 = vld [vmem:[#allocation4 + $0x4] sm:$0xf] }
 0x4cf   : > { %v5376_v0 = vrot.slane %v5375_v11, 4  ;;  %5379 = vst [vmem:[#allocation4 + $0x14] sm:$0x8] %v5375_v11 }
 0x4d0   : > { %v5187_v40 = vpop.f32.mrb[188].mxu1 }
 0x4d1   : > { %5226 = vst [vmem:[#allocation3 + $0xc0] sm:$0xff] %v5187_v40  ;;  %v11131_v20 = vpop.f32.mrb[189].mxu1  ;;  %v5384_v7 = vsel %vm5382_vm10, %v5376_v0, %v5383_v63  ;;  %v9196_v63 = vcombine.low %v5924_v25, %v14413_v5 }
 0x4d2   : > { %v5391_v28 = vld [vmem:[#allocation3 + $0xb0] ss:$2 sm:$0x7f]  ;;  %v5393_v9 = vld [vmem:[#allocation3 + $0xb1] ss:$2 sm:$0x7f] }
 0x4d3   : > { %5385 = vst [vmem:[#allocation4 + $0x18] sm:$0x7] %v5384_v7  ;;  %v5395_v59 = vmax.f32 %v5391_v28, %v5393_v9  ;;  %v5190_v33 = vpop.f32.mrb[190].mxu1  ;;  %v14420_v20 = vld [vmem:[#allocation4 + $0xc] sm:$0xff]   ;;  %v5972_v7 = vshll.u32 %v9196_v63, 16 }
 0x4d4   : > { %5227 = vst [vmem:[#allocation3 + $0xc8] sm:$0xff] %v5190_v33  ;;  %v11132_v1 = vpop.f32.mrb[191].mxu1 }
 0x4d5   : > { %v5396_v52 = vmax.f32 %v5394_v55, %v5395_v59  ;;  %v5977_v55 = vshll.u32 %v14420_v20, 16  ;;  %v12108_v59 = vld [vmem:[%s15117_s4 + $0xd0] sm:$0xff]   ;;  %v5974_v33 = vrot.slane %v5972_v7, 1  ;;  %v5970_v1 = vshrl.u32 %v9196_v63, 16 }
 0x4d6   : > { %v14405_v46 = vld [vmem:[#allocation4 + $0x10] sm:$0xff]  }
 0x4d7   : > { %v5397_v26 = vadd.f32 %v12510_v8, %v5396_v52  ;;  %11181 = vmatprep.mubr.bf16.mxu0 %v14405_v46  ;;  %v5518_v36 = vshll.u32 %v14405_v46, 16  ;;  %v5522_v41 = vshrl.u32 %v14405_v46, 16  ;;  %v5795_v0 = vrot.slane %v14405_v46, 1  ;;  %v12111_v52 = vld [vmem:[%s15117_s4 + $0xd8] sm:$0xff]   ;;  %v12112_v46 = vld [vmem:[%s15117_s4 + $0xe0] sm:$0xff]  }
 0x4d8   : > { %v5195_v38 = vpop.f32.mrb[192].mxu1  ;;  %v5979_v50 = vrot.slane %v5977_v55, 1 }
 0x4d9   : > { %v5398_v54 = vmax.f32 %v5397_v26, 0.0  ;;  %5228 = vst [vmem:[#allocation3 + $0xd0] sm:$0xff] %v5195_v38  ;;  %v11135_v42 = vpop.f32.mrb[193].mxu1  ;;  %v5520_v61 = vrot.slane %v5518_v36, 1  ;;  %v5796_v28 = vsel %vm2037_vm9, %v5793_v43, %v5795_v0  ;;  %v5975_v43 = vor.u32 %v5974_v33, %v5970_v1  ;;  %v12113_v26 = vld [vmem:[%s15117_s4 + $0xe8] sm:$0xff]   ;;  %v12114_v36 = vld [vmem:[%s15117_s4 + $0xf0] sm:$0xff]  }
 0x4da   : > { %v5198_v31 = vpop.f32.mrb[194].mxu1 }
 0x4db   : > { %v9640_v51 = vpack.c.bf16 %v5398_v54, %v5398_v54  ;;  %5229 = vst [vmem:[#allocation3 + $0xd8] sm:$0x3f] %v5198_v31  ;;  %v11136_v17 = vpop.f32.mrb[195].mxu1  ;;  %v5521_v56 = vsel %vm1669_vm8, %v14380_v13, %v5520_v61  ;;  %v5422_v34 = vld [vmem:[#allocation3 + $0xc0] ss:$2 sm:$0x7f]  ;;  %v5524_v58 = vor.u32 %v5522_v41, %v5520_v61 }
 0x4dc   : > { %11154 = vmatmul.mubr.bf16.vlgmr.msra.gmra.mrb[196].mxu1 %v5521_v56  ;;  %v5424_v10 = vld [vmem:[#allocation3 + $0xc1] ss:$2 sm:$0x7f]  ;;  %v12115_v61 = vld [vmem:[%s15117_s4 + $0xf8] sm:$0xff]  }
 0x4dd   : > { %v5404_v12 = vshll.u32 %v9640_v51, 16  ;;  %v5407_v49 = vshrl.u32 %v9640_v51, 16  ;;  %v5429_v23 = vmax.f32 %v5422_v34, %v5424_v10  ;;  %v12119_v10 = vld [vmem:[%s15117_s4 + $0x108] sm:$0xff]  }
 0x4df   : > { %v5406_v32 = vrot.slane %v5404_v12, 5  ;;  %v5409_v22 = vrot.slane %v5407_v49, 4  ;;  %v12117_v12 = vld [vmem:[%s15117_s4 + $0x100] sm:$0xff]   ;;  %v5981_v49 = vshrl.u32 %v14420_v20, 16 }
 0x4e1   : > { %v5410_v21 = vor.u32 %v5409_v22, %v5406_v32  ;;  %v5418_v19 = vsel %vm5416_vm13, %v5406_v32, %v5417_v24  ;;  %v5983_v22 = vor.u32 %v5981_v49, %v5979_v50  ;;  %v6308_v63 = vrot.slane %v5981_v49, 1  ;;  %v12141_v49 = vld [vmem:[%s15117_s4 + $0x198] sm:$0xff]  }
 0x4e2   : > { %v5426_v27 = vld [vmem:[#allocation3 + $0xd0] ss:$2 sm:$0x7f]  ;;  %v5428_v44 = vld [vmem:[#allocation3 + $0xd1] ss:$2 sm:$0x7f] }
 0x4e3   : > { %5419 = vst [vmem:[#allocation4 + $0x18] sm:$0x8] %v5418_v19  ;;  %v5430_v3 = vmax.f32 %v5426_v27, %v5428_v44  ;;  %v5411_v30 = vrot.slane %v5410_v21, 4  ;;  %v6125_v27 = vld [vmem:[#allocation4 + $0x4] sm:$0xe]  ;;  %v12120_v44 = vld [vmem:[%s15117_s4 + $0x110] sm:$0xff]  }
 0x4e5   : > { %v5431_v60 = vmax.f32 %v5429_v23, %v5430_v3  ;;  %5420 = vst [vmem:[#allocation4 + $0x1c] sm:$0x7] %v5411_v30  ;;  %v9224_v23 = vcombine.low %v6125_v27, %v14413_v5  ;;  %v6151_v30 = vrot.slane %v14420_v20, 1  ;;  %v12127_v5 = vld [vmem:[%s15117_s4 + $0x140] sm:$0xff]  }
 0x4e6   : > { %v12147_v27 = vld [vmem:[%s15117_s4 + $0x1c0] sm:$0xff]  }
 0x4e7   : > { %v5432_v13 = vadd.f32 %v12510_v8, %v5431_v60  ;;  %v6301_v25 = vshrl.u32 %v9224_v23, 16  ;;  %v12183_v8 = vld [vmem:[%s15119_s6 + $0x14] ss:$8 sps:$4 sm:$0xff] (%p66_p0)  }
 0x4e9   : > { %v5433_v62 = vmax.f32 %v5432_v13, 0.0  ;;  %v6150_v13 = vrot.slane %v9224_v23, 1 }
 0x4ea   : > { %v5447_v47 = vld [vmem:[#allocation4 + $0x18] sm:$0xf] }
 0x4eb   : > { %v5434_v14 = vpack.c.bf16 %v5433_v62, %v5433_v62  ;;  %v14449_v54 = vld [vmem:[#allocation4 + $0x14] sm:$0xff]  }
 0x4ec   : > { %v5448_v4 = vld [vmem:[#allocation4 + $0x1c] sm:$0x7]  ;;  %v5985_v51 = vshll.u32 %v14449_v54, 16  ;;  %v5989_v24 = vshrl.u32 %v14449_v54, 16 }
 0x4ed   : > { %v5768_v53 = vld [vmem:[#allocation4 + $0x1c] sm:$0xf]  ;;  %v5439_v15 = vsel %vm5437_vm0, %v5434_v14, %v5438_v48  ;;  %v9137_v18 = vcombine.low %v5447_v47, %v5448_v4  ;;  %v6152_v48 = vsel %vm2037_vm9, %v6150_v13, %v6151_v30  ;;  %v12123_v14 = vld [vmem:[%s15117_s4 + $0x120] sm:$0xff]   ;;  %v12125_v4 = vld [vmem:[%s15117_s4 + $0x130] sm:$0xff]  }
 0x4ee   : > { %5440 = vst [vmem:[#allocation4 + $0x20] sm:$0xf] %v5439_v15  ;;  %v9171_v29 = vcombine.low %v5447_v47, %v5768_v53  ;;  %v5930_v42 = vld [vmem:[#allocation4 + $0x1c] sm:$0xf]  ;;  %v5987_v56 = vrot.slane %v5985_v51, 1  ;;  %v12124_v47 = vld [vmem:[%s15117_s4 + $0x128] sm:$0xff]  }
 0x4ef   : > { %11182 = vmatmul.mubr.bf16.gmra.mrb[88].mxu0 %v9137_v18  ;;  %v5526_v57 = vshll.u32 %v9137_v18, 16  ;;  %v5530_v11 = vshrl.u32 %v9137_v18, 16  ;;  %v12122_v62 = vld [vmem:[%s15117_s4 + $0x118] sm:$0xff]  }
 0x4f0   : > { %11201 = vmatprep.mubr.bf16.mxu0 %v14377_v37  ;;  %v5797_v40 = vrot.slane %v9171_v29, 1  ;;  %v12107_v37 = vld [vmem:[%s15117_s4 + $0xc8] sm:$0xff]   ;;  %v5991_v34 = vor.u32 %v5989_v24, %v5987_v56  ;;  %v5988_v21 = vsel %vm1669_vm8, %v5983_v22, %v5987_v56  ;;  %v12126_v15 = vld [vmem:[%s15117_s4 + $0x138] sm:$0xff]   ;;  %v6153_v29 = vrot.slane %v14449_v54, 1 }
 0x4f1   : > { %v5528_v39 = vrot.slane %v5526_v57, 1  ;;  %v12129_v57 = vld [vmem:[%s15117_s4 + $0x148] sm:$0xff]  }
 0x4f2   : > { %v5798_v9 = vsel %vm2037_vm9, %v5795_v0, %v5797_v40  ;;  %v6309_v0 = vrot.slane %v5977_v55, 2  ;;  %v12133_v55 = vld [vmem:[%s15117_s4 + $0x168] sm:$0xff]  }
 0x4f3   : > { %v5529_v45 = vsel %vm1669_vm8, %v5524_v58, %v5528_v39  ;;  %v5532_v35 = vor.u32 %v5530_v11, %v5528_v39  ;;  %v6304_v58 = vshll.u32 %v9224_v23, 16  ;;  %v6154_v39 = vsel %vm2037_vm9, %v6151_v30, %v6153_v29  ;;  %v12143_v22 = vld [vmem:[%s15117_s4 + $0x1a8] sm:$0xff]  }
 0x4f4   : > { %11157 = vmatprep.mubr.bf16.mxu1 %v5529_v45  ;;  %v12130_v45 = vld [vmem:[%s15117_s4 + $0x150] sm:$0xff]  }
 0x4f5   : > { %11158 = vmatmul.mubr.bf16.gmra.mrb[200].mxu1 %v5532_v35  ;;  %v5931_v38 = vld [vmem:[#allocation4 + $0x20] sm:$0x7]  ;;  %v6303_v35 = vrot.slane %v6301_v25, 1 }
 0x4f6   : > { %v9199_v31 = vcombine.low %v5930_v42, %v5931_v38  ;;  %v6126_v53 = vld [vmem:[#allocation4 + $0x20] sm:$0xf] }
 0x4f7   : > { %11202 = vmatmul.mubr.bf16.vlgmr.msra.gmra.mrb[84].mxu0 %v5796_v28  ;;  %v9225_v18 = vcombine.low %v5930_v42, %v6126_v53  ;;  %v12131_v28 = vld [vmem:[%s15117_s4 + $0x158] sm:$0xff]   ;;  %v12137_v42 = vld [vmem:[%s15117_s4 + $0x188] sm:$0xff]   ;;  %v12150_v53 = vld [vmem:[%s15117_s4 + $0x1d0] sm:$0xff]  }
 0x4f8   : > { %11210 = vmatpush3.bf16.msra.mxu0 %v14400_v16  ;;  %11205 = vmatprep.mubr.bf16.mxu0 %v5798_v9  ;;  %v5980_v16 = vsel %vm1669_vm8, %v5975_v43, %v5979_v50  ;;  %v5993_v17 = vshll.u32 %v9199_v31, 16  ;;  %v5997_v3 = vshrl.u32 %v9199_v31, 16  ;;  %v12132_v9 = vld [vmem:[%s15117_s4 + $0x160] sm:$0xff]   ;;  %v12135_v50 = vld [vmem:[%s15117_s4 + $0x178] sm:$0xff]   ;;  %v6312_v43 = vrot.slane %v5989_v24, 1 }
 0x4f9   : > { %11211 = vmatprep.subr.bf16.mxu0 %v12107_v37  ;;  %v6155_v41 = vrot.slane %v9225_v18, 1  ;;  %v6317_v33 = vshrl.u32 %v9225_v18, 16  ;;  %v6320_v1 = vshll.u32 %v9225_v18, 16  ;;  %v12152_v25 = vld [vmem:[%s15117_s4 + $0x1e0] sm:$0xff]  }
 0x4fa   : > { %v5995_v32 = vrot.slane %v5993_v17, 1  ;;  %v12139_v17 = vld [vmem:[#allocation4 + $0x8] sm:$0xfe]  }
 0x4fb   : > { %v6156_v11 = vsel %vm2037_vm9, %v6153_v29, %v6155_v41  ;;  %v6645_v13 = vshrl.u32 %v12139_v17, 16 }
 0x4fc   : > { %11212 = vmatpush3.bf16.msra.mxu0 %v12107_v37  ;;  %v5996_v19 = vsel %vm1669_vm8, %v5991_v34, %v5995_v32  ;;  %v5999_v60 = vor.u32 %v5997_v3, %v5995_v32  ;;  %v6310_v37 = vor.u32 %v6309_v0, %v6308_v63  ;;  %vm6299_vm8 = vsmask.f32 6400  ;;  %v12142_v32 = vld [vmem:[%s15117_s4 + $0x1a0] sm:$0xff]   ;;  %v12144_v34 = vld [vmem:[%s15117_s4 + $0x1b0] sm:$0xff]  }
 0x4fd   : > { %11213 = vmatprep.subr.bf16.mxu0 %v12108_v59 }
 0x4ff   : > { %11206 = vmatmul.mubr.bf16.gmra.mrb[88].mxu0 %v5797_v40  ;;  %v6306_v40 = vrot.slane %v6304_v58, 2  ;;  %v12153_v58 = vld [vmem:[%s15117_s4 + $0x1e8] sm:$0xff]  }
 0x500   : > { %11214 = vmatpush3.bf16.msra.mxu0 %v12108_v59  ;;  %11225 = vmatprep.mubr.bf16.mxu0 %v5980_v16  ;;  %v12134_v59 = vld [vmem:[%s15117_s4 + $0x170] sm:$0xff]   ;;  %v6319_v16 = vrot.slane %v6317_v33, 1 }
 0x501   : > { %11215 = vmatprep.subr.bf16.mxu0 %v12111_v52  ;;  %v6307_v7 = vor.u32 %v6306_v40, %v6303_v35  ;;  %v12155_v35 = vld [vmem:[%s15117_s4 + $0x1f8] sm:$0xff]  }
 0x503   : > { %v6311_v20 = vsel %vm6299_vm8, %v6307_v7, %v6310_v37 }
 0x504   : > { %11216 = vmatpush3.bf16.msra.mxu0 %v12111_v52  ;;  %v6313_v52 = vrot.slane %v5985_v51, 2  ;;  %v12138_v51 = vld [vmem:[%s15117_s4 + $0x190] sm:$0xff]  }
 0x505   : > { %11217 = vmatprep.subr.bf16.mxu0 %v12112_v46 }
 0x506   : > { %v6314_v38 = vor.u32 %v6313_v52, %v6312_v43  ;;  %v12158_v43 = vld [vmem:[%s15117_s4 + $0x210] sm:$0xff]   ;;  %v12159_v52 = vld [vmem:[#allocation4 + $0x8] sm:$0xfc]  }
 0x508   : > { %11218 = vmatpush3.bf16.msra.mxu0 %v12112_v46  ;;  %v6322_v46 = vrot.slane %v6320_v1, 2  ;;  %v6315_v31 = vsel %vm6299_vm8, %v6310_v37, %v6314_v38 }
 0x509   : > { %11219 = vmatprep.subr.bf16.mxu0 %v12113_v26 }
 0x50c   : > { %11220 = vmatpush3.bf16.msra.mxu0 %v12113_v26  ;;  %v12136_v26 = vld [vmem:[%s15117_s4 + $0x180] sm:$0xff]  }
 0x50d   : > { %11221 = vmatprep.subr.bf16.mxu0 %v12114_v36 }
 0x510   : > { %11222 = vmatpush3.bf16.msra.mxu0 %v12114_v36  ;;  %v6323_v36 = vor.u32 %v6322_v46, %v6319_v16  ;;  %v6854_v46 = vrot.slane %v12159_v52, 2 }
 0x511   : > { %11223 = vmatprep.subr.bf16.mxu0 %v12115_v61 }
 0x512   : > { %v6324_v54 = vsel %vm6299_vm8, %v6314_v38, %v6323_v36 }
 0x514   : > { %11224 = vmatpush3.bf16.msra.mxu0 %v12115_v61  ;;  %v12140_v61 = vld [vmem:[#allocation4 + $0x10] sm:$0xff]  }
 0x515   : > { %11233 = vmatprep.subr.bf16.mxu0 %v12117_v12  ;;  %v6496_v56 = vrot.slane %v12140_v61, 1  ;;  %v6653_v3 = vshrl.u32 %v12140_v61, 16  ;;  %v6656_v30 = vshll.u32 %v12140_v61, 16  ;;  %v12166_v61 = vld [vmem:[#allocation4 + $0x18] sm:$0xff]  }
 0x517   : > { %11226 = vmatmul.mubr.bf16.vlgmr.msra.gmra.mrb[84].mxu0 %v5988_v21  ;;  %v12146_v21 = vld [vmem:[#allocation4 + $0x18] sm:$0xff]  }
 0x518   : > { %11229 = vmatprep.mubr.bf16.mxu0 %v5996_v19  ;;  %11234 = vmatpush3.bf16.msra.mxu0 %v12117_v12  ;;  %v6495_v12 = vrot.slane %v12139_v17, 1  ;;  %v12148_v19 = vld [vmem:[#allocation4 + $0x20] sm:$0xff]   ;;  %v6665_v63 = vshll.u32 %v12146_v21, 16 }
 0x519   : > { %11235 = vmatprep.subr.bf16.mxu0 %v12119_v10  ;;  %v6500_v23 = vrot.slane %v12148_v19, 1  ;;  %v6671_v0 = vshrl.u32 %v12148_v19, 16 }
 0x51a   : > { %v6497_v24 = vsel %vm2037_vm9, %v6495_v12, %v6496_v56  ;;  %v6667_v37 = vrot.slane %v6665_v63, 2 }
 0x51b   : > { %v6673_v7 = vrot.slane %v6671_v0, 1 }
 0x51c   : > { %11236 = vmatpush3.bf16.msra.mxu0 %v12119_v10  ;;  %v12145_v10 = vld [vmem:[%s15117_s4 + $0x1b8] sm:$0xff]  }
 0x51d   : > { %11237 = vmatprep.subr.bf16.mxu0 %v12120_v44 }
 0x51f   : > { %11230 = vmatmul.mubr.bf16.gmra.mrb[88].mxu0 %v5999_v60  ;;  %v12149_v60 = vld [vmem:[%s15117_s4 + $0x1c8] sm:$0xff]  }
 0x520   : > { %11238 = vmatpush3.bf16.msra.mxu0 %v12120_v44  ;;  %11249 = vmatprep.mubr.bf16.mxu0 %v6152_v48  ;;  %v6498_v44 = vrot.slane %v12146_v21, 1 }
 0x521   : > { %11239 = vmatprep.subr.bf16.mxu0 %v12122_v62 }
 0x522   : > { %v6499_v48 = vsel %vm2037_vm9, %v6496_v56, %v6498_v44 }
 0x524   : > { %11240 = vmatpush3.bf16.msra.mxu0 %v12122_v62  ;;  %v6648_v62 = vshll.u32 %v12139_v17, 16 }
 0x525   : > { %11241 = vmatprep.subr.bf16.mxu0 %v12123_v14 }
 0x526   : > { %v6650_v18 = vrot.slane %v6648_v62, 2 }
 0x528   : > { %11242 = vmatpush3.bf16.msra.mxu0 %v12123_v14  ;;  %v6501_v14 = vsel %vm2037_vm9, %v6498_v44, %v6500_v23  ;;  %vm6853_vm9 = vcmask 1045504  }
 0x529   : > { %11243 = vmatprep.subr.bf16.mxu0 %v12124_v47 }
 0x52c   : > { %11244 = vmatpush3.bf16.msra.mxu0 %v12124_v47  ;;  %v6655_v47 = vrot.slane %v6653_v3, 1 }
 0x52d   : > { %11245 = vmatprep.subr.bf16.mxu0 %v12125_v4 }
 0x530   : > { %11246 = vmatpush3.bf16.msra.mxu0 %v12125_v4  ;;  %v6658_v4 = vrot.slane %v6656_v30, 2 }
 0x531   : > { %11247 = vmatprep.subr.bf16.mxu0 %v12126_v15 }
 0x534   : > { %11248 = vmatpush3.bf16.msra.mxu0 %v12126_v15  ;;  %v6647_v15 = vrot.slane %v6645_v13, 1 }
 0x535   : > { %11257 = vmatprep.subr.bf16.mxu0 %v12127_v5 }
 0x536   : > { %v6651_v29 = vor.u32 %v6650_v18, %v6647_v15 }
 0x537   : > { %11250 = vmatmul.mubr.bf16.vlgmr.msra.gmra.mrb[84].mxu0 %v6154_v39  ;;  %v12154_v39 = vld [vmem:[%s15117_s4 + $0x1f0] sm:$0xff]  }
 0x538   : > { %11253 = vmatprep.mubr.bf16.mxu0 %v6156_v11  ;;  %11258 = vmatpush3.bf16.msra.mxu0 %v12127_v5  ;;  %v6659_v5 = vor.u32 %v6658_v4, %v6655_v47  ;;  %v6662_v11 = vshrl.u32 %v12146_v21, 16 }
 0x539   : > { %11259 = vmatprep.subr.bf16.mxu0 %v12129_v57 }
 0x53a   : > { %v6664_v40 = vrot.slane %v6662_v11, 1 }
 0x53c   : > { %11260 = vmatpush3.bf16.msra.mxu0 %v12129_v57  ;;  %v6660_v57 = vsel %vm6299_vm8, %v6651_v29, %v6659_v5 }
 0x53d   : > { %11261 = vmatprep.subr.bf16.mxu0 %v12130_v45 }
 0x53f   : > { %11254 = vmatmul.mubr.bf16.gmra.mrb[88].mxu0 %v6155_v41  ;;  %v12151_v41 = vld [vmem:[%s15117_s4 + $0x1d8] sm:$0xff]  }
 0x540   : > { %11262 = vmatpush3.bf16.msra.mxu0 %v12130_v45  ;;  %11273 = vmatprep.mubr.bf16.mxu0 %v6311_v20  ;;  %v6674_v45 = vshll.u32 %v12148_v19, 16  ;;  %v12156_v20 = vld [vmem:[%s15117_s4 + $0x200] sm:$0xff]  }
 0x541   : > { %11263 = vmatprep.subr.bf16.mxu0 %v12131_v28 }
 0x544   : > { %11264 = vmatpush3.bf16.msra.mxu0 %v12131_v28  ;;  %v6676_v28 = vrot.slane %v6674_v45, 2 }
 0x545   : > { %11265 = vmatprep.subr.bf16.mxu0 %v12132_v9 }
 0x548   : > { %11266 = vmatpush3.bf16.msra.mxu0 %v12132_v9  ;;  %v6668_v9 = vor.u32 %v6667_v37, %v6664_v40  ;;  %v15152_v37 = vld [vmem:[#allocation9_spill] sm:$0xff] }
 0x549   : > { %11267 = vmatprep.subr.bf16.mxu0 %v12133_v55 }
 0x54a   : > { %v6669_v33 = vsel %vm6299_vm8, %v6659_v5, %v6668_v9 }
 0x54c   : > { %11268 = vmatpush3.bf16.msra.mxu0 %v12133_v55  ;;  %v6677_v55 = vor.u32 %v6676_v28, %v6673_v7 }
 0x54d   : > { %11269 = vmatprep.subr.bf16.mxu0 %v12134_v59 }
 0x54e   : > { %v6678_v1 = vsel %vm6299_vm8, %v6668_v9, %v6677_v55 }
 0x550   : > { %11270 = vmatpush3.bf16.msra.mxu0 %v12134_v59  ;;  %v12157_v59 = vld [vmem:[%s15117_s4 + $0x208] sm:$0xff]  }
 0x551   : > { %11271 = vmatprep.subr.bf16.mxu0 %v12135_v50 }
 0x554   : > { %11272 = vmatpush3.bf16.msra.mxu0 %v12135_v50  ;;  %v12160_v50 = vld [vmem:[#allocation4 + $0x10] sm:$0xff]  }
 0x555   : > { %11281 = vmatprep.subr.bf16.mxu0 %v12136_v26  ;;  %v6855_v16 = vrot.slane %v12160_v50, 2 }
 0x557   : > { %11274 = vmatmul.mubr.bf16.vlgmr.msra.gmra.mrb[84].mxu0 %v6315_v31  ;;  %v6856_v38 = vsel %vm6853_vm9, %v6854_v46, %v6855_v16  ;;  %v12164_v31 = vld [vmem:[%s15117_s4 + $0x230] sm:$0xff]  }
 0x558   : > { %11277 = vmatprep.mubr.bf16.mxu0 %v6324_v54  ;;  %11282 = vmatpush3.bf16.msra.mxu0 %v12136_v26  ;;  %v12161_v26 = vld [vmem:[%s15117_s4 + $0x218] sm:$0xff]  }
 0x559   : > { %11283 = vmatprep.subr.bf16.mxu0 %v12137_v42  ;;  %v12165_v54 = vld [vmem:[%s15117_s4 + $0x238] sm:$0xff]  }
 0x55c   : > { %11284 = vmatpush3.bf16.msra.mxu0 %v12137_v42  ;;  %v12163_v42 = vld [vmem:[%s15117_s4 + $0x228] sm:$0xff]  }
 0x55d   : > { %11285 = vmatprep.subr.bf16.mxu0 %v12138_v51 }
 0x55f   : > { %11278 = vmatmul.mubr.bf16.gmra.mrb[88].mxu0 %v6323_v36  ;;  %v12162_v36 = vld [vmem:[%s15117_s4 + $0x220] sm:$0xff]  }
 0x560   : > { %11286 = vmatpush3.bf16.msra.mxu0 %v12138_v51  ;;  %11297 = vmatprep.mubr.bf16.mxu0 %v6497_v24  ;;  %v12167_v51 = vld [vmem:[#allocation4 + $0x20] sm:$0xff]  }
 0x561   : > { %11287 = vmatprep.subr.bf16.mxu0 %v12141_v49 }
 0x564   : > { %11288 = vmatpush3.bf16.msra.mxu0 %v12141_v49  ;;  %v6857_v49 = vrot.slane %v12166_v61, 2  ;;  %v15153_v61 = vmov (%p66_p0), 0  }
 0x565   : > { %11289 = vmatprep.subr.bf16.mxu0 %v12142_v32  ;;  %7332 = vmatprep.mubr.bf16.mxu1 (%p66_p0), %v15153_v61 }
 0x568   : > { %11290 = vmatpush3.bf16.msra.mxu0 %v12142_v32  ;;  %v6859_v32 = vrot.slane %v12167_v51, 2  ;;  %v12177_v51 = vld [vmem:[%s15119_s6 + $0x4] ss:$8 sps:$4 sm:$0xff] (%p66_p0)  }
 0x569   : > { %11291 = vmatprep.subr.bf16.mxu0 %v12143_v22  ;;  %7300 = vmatprep.subr.bf16.mxu1 (%p66_p0), %v12177_v51  ;;  %v12249_v51 = vld [vmem:[%s15119_s6 + $0x144] ss:$8 sps:$4 sm:$0xff] (%p66_p0)  }
 0x56a   :  { %7301 = vmatpush1.bf16.msra.mxu1 (%p66_p0), %v12180_v2  ;;  %v12247_v2 = vld [vmem:[%s15119_s6 + $0x140] ss:$8 sps:$4 sm:$0xff] (%p66_p0)  }
 0x56b   :  { %7302 = vmatprep.subr.bf16.mxu1 (%p66_p0), %v12183_v8 }
 0x56c   : > { %11292 = vmatpush3.bf16.msra.mxu0 %v12143_v22  ;;  %v6858_v22 = vsel %vm6853_vm9, %v6855_v16, %v6857_v49 }
 0x56d   : > { %11293 = vmatprep.subr.bf16.mxu0 %v12144_v34 }
 0x570   : > { %11294 = vmatpush3.bf16.msra.mxu0 %v12144_v34  ;;  %v12168_v34 = vld [vmem:[#allocation4 + $0x28] ss:$0 sps:$4 sm:$0x11]  }
 0x571   : > { %11295 = vmatprep.subr.bf16.mxu0 %v12145_v10  ;;  %v6861_v21 = vrot.slane %v12168_v34, 2  ;;  %v12193_v34 = vld [vmem:[%s15119_s6 + $0xb4] ss:$8 sps:$4 sm:$0xff] (%p66_p0)  }
 0x573   : > { %v6862_v19 = vsel %vm6853_vm9, %v6859_v32, %v6861_v21  ;;  %v12197_v21 = vld [vmem:[%s15119_s6 + $0xb0] ss:$8 sps:$4 sm:$0xff] (%p66_p0)  }
 0x574   : > { %11296 = vmatpush3.bf16.msra.mxu0 %v12145_v10  ;;  %v6860_v10 = vsel %vm6853_vm9, %v6857_v49, %v6859_v32  ;;  %v12187_v49 = vld [vmem:[%s15119_s6 + $0xa4] ss:$8 sps:$4 sm:$0xff] (%p66_p0)   ;;  %v12191_v32 = vld [vmem:[%s15119_s6 + $0xa0] ss:$8 sps:$4 sm:$0xff] (%p66_p0)  }
 0x575   : > { %11305 = vmatprep.subr.bf16.mxu0 %v12147_v27 }
 0x577   : > { %11298 = vmatmul.mubr.bf16.vlgmr.msra.gmra.mrb[84].mxu0 %v6499_v48 }
 0x578   : > { %11301 = vmatprep.mubr.bf16.mxu0 %v6501_v14  ;;  %11306 = vmatpush3.bf16.msra.mxu0 %v12147_v27 }
 0x579   : > { %11307 = vmatprep.subr.bf16.mxu0 %v12149_v60 }
 0x57c   : > { %11308 = vmatpush3.bf16.msra.mxu0 %v12149_v60 }
 0x57d   : > { %11309 = vmatprep.subr.bf16.mxu0 %v12150_v53 }
 0x57f   : > { %11302 = vmatmul.mubr.bf16.gmra.mrb[88].mxu0 %v6500_v23 }
 0x580   : > { %11310 = vmatpush3.bf16.msra.mxu0 %v12150_v53  ;;  %11321 = vmatprep.mubr.bf16.mxu0 %v6660_v57 }
 0x581   : > { %11311 = vmatprep.subr.bf16.mxu0 %v12151_v41 }
 0x584   : > { %11312 = vmatpush3.bf16.msra.mxu0 %v12151_v41 }
 0x585   : > { %11313 = vmatprep.subr.bf16.mxu0 %v12152_v25 }
 0x588   : > { %11314 = vmatpush3.bf16.msra.mxu0 %v12152_v25 }
 0x589   : > { %11315 = vmatprep.subr.bf16.mxu0 %v12153_v58 }
 0x58c   : > { %11316 = vmatpush3.bf16.msra.mxu0 %v12153_v58 }
 0x58d   : > { %11317 = vmatprep.subr.bf16.mxu0 %v12154_v39 }
 0x590   : > { %11318 = vmatpush3.bf16.msra.mxu0 %v12154_v39 }
 0x591   : > { %11319 = vmatprep.subr.bf16.mxu0 %v12155_v35 }
 0x594   : > { %11320 = vmatpush3.bf16.msra.mxu0 %v12155_v35 }
 0x595   : > { %11329 = vmatprep.subr.bf16.mxu0 %v12156_v20 }
 0x597   : > { %11322 = vmatmul.mubr.bf16.vlgmr.msra.gmra.mrb[84].mxu0 %v6669_v33 }
 0x598   : > { %11325 = vmatprep.mubr.bf16.mxu0 %v6678_v1  ;;  %11330 = vmatpush3.bf16.msra.mxu0 %v12156_v20 }
 0x599   : > { %11331 = vmatprep.subr.bf16.mxu0 %v12157_v59 }
 0x59c   : > { %11332 = vmatpush3.bf16.msra.mxu0 %v12157_v59 }
 0x59d   : > { %11333 = vmatprep.subr.bf16.mxu0 %v12158_v43 }
 0x59f   : > { %11326 = vmatmul.mubr.bf16.gmra.mrb[88].mxu0 %v6677_v55 }
 0x5a0   : > { %11334 = vmatpush3.bf16.msra.mxu0 %v12158_v43  ;;  %11345 = vmatprep.mubr.bf16.mxu0 %v6856_v38 }
 0x5a1   : > { %11335 = vmatprep.subr.bf16.mxu0 %v12161_v26 }
 0x5a4   : > { %11336 = vmatpush3.bf16.msra.mxu0 %v12161_v26 }
 0x5a5   : > { %11337 = vmatprep.subr.bf16.mxu0 %v12162_v36 }
 0x5a8   : > { %11338 = vmatpush3.bf16.msra.mxu0 %v12162_v36 }
 0x5a9   : > { %11339 = vmatprep.subr.bf16.mxu0 %v12163_v42 }
 0x5ac   : > { %11340 = vmatpush3.bf16.msra.mxu0 %v12163_v42 }
 0x5ad   : > { %11341 = vmatprep.subr.bf16.mxu0 %v12164_v31 }
 0x5af   : > { %v11155_v17 = vpop.f32.mrb[196].mxu1 }
 0x5b0   : > { %11342 = vmatpush3.bf16.msra.mxu0 %v12164_v31  ;;  %v5619_v56 = vpop.f32.mrb[197].mxu1 }
 0x5b1   : > { %11343 = vmatprep.subr.bf16.mxu0 %v12165_v54  ;;  %v11156_v12 = vpop.f32.mrb[198].mxu1 }
 0x5b2   : > { %v5622_v24 = vpop.f32.mrb[199].mxu1 }
 0x5b4   : > { %11344 = vmatpush3.bf16.msra.mxu0 %v12165_v54  ;;  %v12175_v54 = vld [vmem:[%s15119_s6 + $0x84] ss:$8 sps:$4 sm:$0xff] (%p66_p0)  }
 0x5b5   :  { %7179 = vmatprep.subr.bf16.mxu0 (%p66_p0), %v12175_v54  ;;  %v12244_v54 = vld [vmem:[%s15119_s6 + $0x1b0] ss:$8 sps:$4 sm:$0xff] (%p66_p0)  }
 0x5b7   : > { %11346 = vmatmul.mubr.bf16.vlgmr.msra.gmra.mrb[84].mxu0 %v6858_v22  ;;  %v12192_v22 = vld [vmem:[%s15119_s6 + $0x20] ss:$8 sps:$4 sm:$0xff] (%p66_p0)  }
 0x5b8   : > { %11349 = vmatprep.mubr.bf16.mxu0 %v6860_v10  ;;  %v12195_v10 = vld [vmem:[%s15119_s6 + $0x34] ss:$8 sps:$4 sm:$0xff] (%p66_p0)  }
 0x5bf   : > { %11350 = vmatmul.mubr.bf16.gmra.mrb[88].mxu0 %v6862_v19  ;;  %v12198_v19 = vld [vmem:[%s15119_s6 + $0x30] ss:$8 sps:$4 sm:$0xff] (%p66_p0)  }
 0x5c0   :  { %7211 = vmatprep.mubr.bf16.mxu0 (%p66_p0), %v15153_v61 }
 0x5c8   : > { %v11159_v27 = vpop.f32.mrb[200].mxu1 }
 0x5c9   : > { %v5635_v44 = vpop.f32.mrb[201].mxu1 }
 0x5ca   : > { %v11160_v23 = vpop.f32.mrb[202].mxu1 }
 0x5cb   : > { %v5638_v3 = vpop.f32.mrb[203].mxu1  ;;  %v12203_v23 = vld [vmem:[%s15119_s6 + $0xc0] ss:$8 sps:$4 sm:$0xff] (%p66_p0)  }
 0x68a   : > { %v11347_v30 = vpop.f32.mrb[84].mxu0 }
 0x68b   : > { %v11353_v60 = vadd.f32 %v11347_v30, %v11155_v17  ;;  %v6949_v13 = vpop.f32.mrb[85].mxu0  ;;  %v12179_v17 = vld [vmem:[%s15119_s6 + $0x80] ss:$8 sps:$4 sm:$0xff] (%p66_p0)   ;;  %v12205_v30 = vld [vmem:[%s15119_s6 + $0xd4] ss:$8 sps:$4 sm:$0xff] (%p66_p0)  }
 0x68c   : > { %v11354_v62 = vadd.f32 %v6949_v13, %v5619_v56  ;;  %v11348_v48 = vpop.f32.mrb[86].mxu0  ;;  %7180 = vmatpush1.bf16.msra.mxu0 (%p66_p0), %v12179_v17  ;;  %v12185_v56 = vld [vmem:[%s15119_s6 + $0x90] ss:$8 sps:$4 sm:$0xff] (%p66_p0)   ;;  %v12252_v17 = vld [vmem:[%s15119_s6 + $0x1c4] ss:$8 sps:$4 sm:$0xff] (%p66_p0)  }
 0x68d   : > { %6990 = vst [vmem:[#allocation5 + $0x10] sm:$0xff] %v11353_v60  ;;  %v11355_v14 = vadd.f32 %v11348_v48, %v11156_v12  ;;  %v6952_v47 = vpop.f32.mrb[87].mxu0  ;;  %7181 = vmatprep.subr.bf16.mxu0 (%p66_p0), %v12181_v6  ;;  %v12186_v12 = vld [vmem:[%s15119_s6 + $0x10] ss:$8 sps:$4 sm:$0xff] (%p66_p0)   ;;  %v12207_v60 = vld [vmem:[%s15119_s6 + $0x54] ss:$8 sps:$4 sm:$0xff] (%p66_p0)  }
 0x68e   : > { %6988 = vst [vmem:[#allocation5] sm:$0xff] %v11354_v62  ;;  %v11356_v4 = vadd.f32 %v6952_v47, %v5622_v24  ;;  %v12189_v24 = vld [vmem:[%s15119_s6 + $0x24] ss:$8 sps:$4 sm:$0xff] (%p66_p0)   ;;  %7303 = vmatpush1.bf16.msra.mxu1 (%p66_p0), %v12186_v12  ;;  %v12209_v13 = vld [vmem:[%s15119_s6 + $0xd0] ss:$8 sps:$4 sm:$0xff] (%p66_p0)  }
 0x68f   : > { %6991 = vst [vmem:[#allocation5 + $0x18] sm:$0xff] %v11355_v14  ;;  %7304 = vmatprep.subr.bf16.mxu1 (%p66_p0), %v12189_v24  ;;  %v12210_v62 = vld [vmem:[%s15119_s6 + $0x50] ss:$8 sps:$4 sm:$0xff] (%p66_p0)   ;;  %v12211_v48 = vld [vmem:[%s15119_s6 + $0xe4] ss:$8 sps:$4 sm:$0xff] (%p66_p0)  }
 0x690   : > { %6989 = vst [vmem:[#allocation5 + $0x8] sm:$0xff] %v11356_v4  ;;  %7182 = vmatpush1.bf16.msra.mxu0 (%p66_p0), %v12185_v56  ;;  %v12213_v14 = vld [vmem:[%s15119_s6 + $0x64] ss:$8 sps:$4 sm:$0xff] (%p66_p0)   ;;  %v12215_v4 = vld [vmem:[%s15119_s6 + $0xe0] ss:$8 sps:$4 sm:$0xff] (%p66_p0)  }
 0x691   :  { %7183 = vmatprep.subr.bf16.mxu0 (%p66_p0), %v12187_v49  ;;  %v12250_v6 = vld [vmem:[%s15119_s6 + $0x1c0] ss:$8 sps:$4 sm:$0xff] (%p66_p0)   ;;  %v12255_v56 = vld [vmem:[%s15119_s6 + $0x154] ss:$8 sps:$4 sm:$0xff] (%p66_p0)  }
 0x692   : > { %v11351_v53 = vpop.f32.mrb[88].mxu0  ;;  %7305 = vmatpush1.bf16.msra.mxu1 (%p66_p0), %v12192_v22  ;;  %v12258_v49 = vld [vmem:[%s15119_s6 + $0x1d4] ss:$8 sps:$4 sm:$0xff] (%p66_p0)  }
 0x693   : > { %v11357_v15 = vadd.f32 %v11351_v53, %v11159_v27  ;;  %v6965_v18 = vpop.f32.mrb[89].mxu0  ;;  %v12199_v27 = vld [vmem:[%s15119_s6 + $0xc4] ss:$8 sps:$4 sm:$0xff] (%p66_p0)   ;;  %7306 = vmatprep.subr.bf16.mxu1 (%p66_p0), %v12195_v10  ;;  %v12216_v53 = vld [vmem:[%s15119_s6 + $0x60] ss:$8 sps:$4 sm:$0xff] (%p66_p0)  }
 0x694   : > { %v11358_v5 = vadd.f32 %v6965_v18, %v5635_v44  ;;  %v11352_v57 = vpop.f32.mrb[90].mxu0  ;;  %v7018_v35 = vld [vmem:[#allocation5 + $0x12] ss:$2 sm:$0x7]  ;;  %7184 = vmatpush1.bf16.msra.mxu0 (%p66_p0), %v12191_v32  ;;  %v12201_v44 = vld [vmem:[%s15119_s6 + $0x44] ss:$8 sps:$4 sm:$0xff] (%p66_p0)  }
 0x695   : > { %v6997_v29 = vld [vmem:[#allocation5] ss:$2 sm:$0x7]  ;;  %v6999_v41 = vld [vmem:[#allocation5 + $0x1] ss:$2 sm:$0x7]  ;;  %7185 = vmatprep.subr.bf16.mxu0 (%p66_p0), %v12193_v34 }
 0x696   : > { %6994 = vst [vmem:[#allocation5 + $0x30] sm:$0xff] %v11357_v15  ;;  %6992 = vst [vmem:[#allocation5 + $0x20] sm:$0xff] %v11358_v5  ;;  %v7004_v39 = vmax.f32 %v6997_v29, %v6999_v41  ;;  %v6968_v63 = vpop.f32.mrb[91].mxu0  ;;  %v7020_v40 = vld [vmem:[#allocation5 + $0x13] ss:$2 sm:$0x7]  ;;  %7307 = vmatpush1.bf16.msra.mxu1 (%p66_p0), %v12198_v19 }
 0x697   : > { %v7001_v25 = vld [vmem:[#allocation5 + $0x9] ss:$2 sm:$0x7]  ;;  %v7003_v58 = vld [vmem:[#allocation5 + $0xa] ss:$2 sm:$0x7]  ;;  %v11360_v0 = vadd.f32 %v6968_v63, %v5638_v3  ;;  %v7025_v9 = vmax.f32 %v7018_v35, %v7020_v40  ;;  %7308 = vmatprep.subr.bf16.mxu1 (%p66_p0), %v12201_v44 }
 0x698   : > { %v7005_v11 = vmax.f32 %v7001_v25, %v7003_v58  ;;  %v7022_v28 = vld [vmem:[#allocation5 + $0x1b] ss:$2 sm:$0x7]  ;;  %7186 = vmatpush1.bf16.msra.mxu0 (%p66_p0), %v12197_v21  ;;  %v12217_v58 = vld [vmem:[%s15119_s6 + $0xf4] ss:$8 sps:$4 sm:$0xff] (%p66_p0)  }
 0x699   : > { %6993 = vst [vmem:[#allocation5 + $0x28] sm:$0xff] %v11360_v0  ;;  %v12204_v3 = vld [vmem:[%s15119_s6 + $0x40] ss:$8 sps:$4 sm:$0xff] (%p66_p0)   ;;  %7187 = vmatprep.subr.bf16.mxu0 (%p66_p0), %v12199_v27  ;;  %v12253_v32 = vld [vmem:[%s15119_s6 + $0x150] ss:$8 sps:$4 sm:$0xff] (%p66_p0)  }
 0x69a   : > { %v7006_v45 = vmax.f32 %v7004_v39, %v7005_v11  ;;  %7309 = vmatpush1.bf16.msra.mxu1 (%p66_p0), %v12204_v3  ;;  %v12219_v39 = vld [vmem:[%s15119_s6 + $0x74] ss:$8 sps:$4 sm:$0xff] (%p66_p0)   ;;  %v12256_v34 = vld [vmem:[%s15119_s6 + $0x1d0] ss:$8 sps:$4 sm:$0xff] (%p66_p0)   ;;  %v12261_v44 = vld [vmem:[%s15119_s6 + $0x164] ss:$8 sps:$4 sm:$0xff] (%p66_p0)  }
 0x69b   :  { %7310 = vmatprep.subr.bf16.mxu1 (%p66_p0), %v12207_v60  ;;  %v12259_v3 = vld [vmem:[%s15119_s6 + $0x160] ss:$8 sps:$4 sm:$0xff] (%p66_p0)  }
 0x69c   : > { %v7013_v7 = vadd.f32 %v15152_v37, %v7006_v45  ;;  %7188 = vmatpush1.bf16.msra.mxu0 (%p66_p0), %v12203_v23  ;;  %v12221_v45 = vld [vmem:[%s15119_s6 + $0xf0] ss:$8 sps:$4 sm:$0xff] (%p66_p0)   ;;  %v12264_v23 = vld [vmem:[%s15119_s6 + $0x1e4] ss:$8 sps:$4 sm:$0xff] (%p66_p0)  }
 0x69d   : > { %v7024_v20 = vld [vmem:[#allocation5 + $0x1c] ss:$2 sm:$0x7]  ;;  %7189 = vmatprep.subr.bf16.mxu0 (%p66_p0), %v12205_v30 }
 0x69e   : > { %v7014_v55 = vmax.f32 %v7013_v7, 0.0  ;;  %v7026_v59 = vmax.f32 %v7022_v28, %v7024_v20  ;;  %7311 = vmatpush1.bf16.msra.mxu1 (%p66_p0), %v12210_v62  ;;  %v12225_v7 = vld [vmem:[%s15119_s6 + $0x104] ss:$8 sps:$4 sm:$0xff] (%p66_p0)   ;;  %v12262_v30 = vld [vmem:[%s15119_s6 + $0x1e0] ss:$8 sps:$4 sm:$0xff] (%p66_p0)  }
 0x69f   :  { %7312 = vmatprep.subr.bf16.mxu1 (%p66_p0), %v12213_v14  ;;  %v12228_v20 = vld [vmem:[%s15119_s6 + $0x184] ss:$8 sps:$4 sm:$0xff] (%p66_p0)   ;;  %v12267_v14 = vld [vmem:[%s15119_s6 + $0x174] ss:$8 sps:$4 sm:$0xff] (%p66_p0)  }
 0x6a0   : > { %7016 = vst [vmem:[%s7015_s18] sm:$0x7] %v7014_v55  ;;  %v7027_v33 = vmax.f32 %v7025_v9, %v7026_v59  ;;  %v7034_v50 = vld [vmem:[#allocation5 + $0x24] ss:$2 sm:$0x7]  ;;  %7190 = vmatpush1.bf16.msra.mxu0 (%p66_p0), %v12209_v13  ;;  %v12223_v59 = vld [vmem:[%s15119_s6 + $0x100] ss:$8 sps:$4 sm:$0xff] (%p66_p0)  }
 0x6a1   : > { %v7036_v43 = vld [vmem:[#allocation5 + $0x25] ss:$2 sm:$0x7]  ;;  %v7038_v52 = vld [vmem:[#allocation5 + $0x2d] ss:$2 sm:$0x7]  ;;  %7191 = vmatprep.subr.bf16.mxu0 (%p66_p0), %v12211_v48 }
 0x6a2   : > { %v7028_v1 = vadd.f32 %v15152_v37, %v7027_v33  ;;  %v7040_v16 = vld [vmem:[#allocation5 + $0x2e] ss:$2 sm:$0x7]  ;;  %v7041_v46 = vmax.f32 %v7034_v50, %v7036_v43  ;;  %7313 = vmatpush1.bf16.msra.mxu1 (%p66_p0), %v12216_v53  ;;  %v12226_v33 = vld [vmem:[%s15119_s6 + $0x180] ss:$8 sps:$4 sm:$0xff] (%p66_p0)  }
 0x6a3   : > { %v7042_v38 = vmax.f32 %v7038_v52, %v7040_v16  ;;  %7314 = vmatprep.subr.bf16.mxu1 (%p66_p0), %v12219_v39  ;;  %v12234_v50 = vld [vmem:[%s15119_s6 + $0x194] ss:$8 sps:$4 sm:$0xff] (%p66_p0)   ;;  %v12229_v43 = vld [vmem:[%s15119_s6 + $0x110] ss:$8 sps:$4 sm:$0xff] (%p66_p0)   ;;  %v12237_v16 = vld [vmem:[%s15119_s6 + $0x124] ss:$8 sps:$4 sm:$0xff] (%p66_p0)  }
 0x6a4   : > { %v7029_v26 = vmax.f32 %v7028_v1, 0.0  ;;  %7192 = vmatpush1.bf16.msra.mxu0 (%p66_p0), %v12215_v4  ;;  %v12231_v1 = vld [vmem:[%s15119_s6 + $0x114] ss:$8 sps:$4 sm:$0xff] (%p66_p0)   ;;  %v12232_v52 = vld [vmem:[%s15119_s6 + $0x190] ss:$8 sps:$4 sm:$0xff] (%p66_p0)  }
 0x6a5   : > { %v7043_v36 = vmax.f32 %v7041_v46, %v7042_v38  ;;  %68 = sbr.rel (!%p66_p0) target bundleno = 11 (0xb), region = 141  ;;  %7193 = vmatprep.subr.bf16.mxu0 (%p66_p0), %v12217_v58  ;;  %v12240_v46 = vld [vmem:[%s15119_s6 + $0x1a4] ss:$8 sps:$4 sm:$0xff] (%p66_p0)   ;;  %v12238_v38 = vld [vmem:[%s15119_s6 + $0x1a0] ss:$8 sps:$4 sm:$0xff] (%p66_p0)  }
 0x6a6   : > { %9342 = vst [vmem:[%s7015_s18 + $0x3] sm:$0x7] %v7029_v26  ;;  %v12235_v26 = vld [vmem:[%s15119_s6 + $0x120] ss:$8 sps:$4 sm:$0xff] (%p66_p0)   ;;  %v12265_v4 = vld [vmem:[%s15119_s6 + $0x170] ss:$8 sps:$4 sm:$0xff] (%p66_p0)  }
 0x6a7   : > { %v7044_v42 = vadd.f32 %v15152_v37, %v7043_v36  ;;  %v12222_v37 = vld [vmem:[%s15119_s6 + $0x70] ss:$8 sps:$4 sm:$0xff] (%p66_p0)   ;;  %v12243_v36 = vld [vmem:[%s15119_s6 + $0x134] ss:$8 sps:$4 sm:$0xff] (%p66_p0)   ;;  %v12274_v58 = vld [vmem:[%s15119_s6 + $0x280] ss:$8 sps:$4 sm:$0xff] (%p66_p0)  }
 0x6a8   :  { %7194 = vmatpush1.bf16.msra.mxu0 (%p66_p0), %v12221_v45  ;;  %7315 = vmatpush1.bf16.msra.mxu1 (%p66_p0), %v12222_v37  ;;  %v12279_v39 = vld [vmem:[%s15119_s6 + $0x214] ss:$8 sps:$4 sm:$0xff] (%p66_p0)   ;;  %v12285_v45 = vld [vmem:[%s15119_s6 + $0x224] ss:$8 sps:$4 sm:$0xff] (%p66_p0)   ;;  %v12286_v37 = vld [vmem:[%s15119_s6 + $0x2a0] ss:$8 sps:$4 sm:$0xff] (%p66_p0)  }
 0x6a9   : > { %v7045_v31 = vmax.f32 %v7044_v42, 0.0  ;;  %7447 = vmatprep.subr.bf16.mxu0 (%p66_p0), %v12225_v7  ;;  %7596 = vmatprep.subr.bf16.mxu1 (%p66_p0), %v12228_v20  ;;  %v12246_v42 = vld [vmem:[%s15119_s6 + $0x1b4] ss:$8 sps:$4 sm:$0xff] (%p66_p0)   ;;  %v12289_v20 = vld [vmem:[%s15119_s6 + $0x230] ss:$8 sps:$4 sm:$0xff] (%p66_p0)  }
 0x6aa   :  { %v12291_v7 = vld [vmem:[%s15119_s6 + $0x234] ss:$8 sps:$4 sm:$0xff] (%p66_p0)  }
 0x6ab   : > { %9344 = vst [vmem:[%s7015_s18 + $0x6] sm:$0x7] %v7045_v31  ;;  %v12241_v31 = vld [vmem:[%s15119_s6 + $0x130] ss:$8 sps:$4 sm:$0xff] (%p66_p0)  }
 0x6b2   :  { %v7074_v47 = vld [vmem:[#allocation6 + $0x1] ss:$16 sm:$0x3]  ;;  %v7049_v41 = vld [vmem:[#allocation6] ss:$16 sm:$0x3] }
 0x6b3   :  { %v7075_v15 = vld [vmem:[#allocation6 + $0x1] ss:$16 sm:$0xc]  ;;  %v7050_v57 = vld [vmem:[#allocation6] ss:$16 sm:$0xc] }
 0x6b4   :  { %v7077_v18 = vld [vmem:[#allocation6 + $0x1] ss:$16 sm:$0x30]  ;;  %v7076_v5 = vor.u32 %v7075_v15, %v7074_v47  ;;  %v7052_v25 = vld [vmem:[#allocation6] ss:$16 sm:$0x30]  ;;  %v7051_v63 = vor.u32 %v7050_v57, %v7049_v41 }
 0x6b5   :  { %v7079_v29 = vld [vmem:[#allocation6 + $0x1] ss:$16 sm:$0xc0]  ;;  %v7054_v0 = vld [vmem:[#allocation6] ss:$16 sm:$0xc0] }
 0x6b6   :  { %v7078_v11 = vor.u32 %v7077_v18, %v7076_v5  ;;  %v7053_v40 = vor.u32 %v7052_v25, %v7051_v63  ;;  %v7342_v8 = vld [vmem:[#allocation6 + $0x2] ss:$16 sm:$0x3]  ;;  %v7491_v24 = vld [vmem:[#allocation6 + $0x3] ss:$16 sm:$0x3] }
 0x6b7   :  { %v7343_v12 = vld [vmem:[#allocation6 + $0x2] ss:$16 sm:$0xc]  ;;  %v7492_v22 = vld [vmem:[#allocation6 + $0x3] ss:$16 sm:$0xc] }
 0x6b8   :  { %v7080_v35 = vor.u32 %v7079_v29, %v7078_v11  ;;  %v7055_v28 = vor.u32 %v7054_v0, %v7053_v40  ;;  %v7344_v10 = vor.u32 %v7343_v12, %v7342_v8  ;;  %v7345_v21 = vld [vmem:[#allocation6 + $0x2] ss:$16 sm:$0x30]  ;;  %v7493_v19 = vor.u32 %v7492_v22, %v7491_v24  ;;  %v7494_v27 = vld [vmem:[#allocation6 + $0x3] ss:$16 sm:$0x30] }
 0x6b9   :  { %v7347_v13 = vld [vmem:[#allocation6 + $0x2] ss:$16 sm:$0xc0]  ;;  %v7496_v48 = vld [vmem:[#allocation6 + $0x3] ss:$16 sm:$0xc0] }
 0x6ba   :  { %v7081_v9 = vpack.c.bf16 %v7080_v35, %v7080_v35  ;;  %v7056_v55 = vpack.c.bf16 %v7055_v28, %v7055_v28  ;;  %v7346_v60 = vor.u32 %v7345_v21, %v7344_v10  ;;  %v7495_v62 = vor.u32 %v7494_v27, %v7493_v19  ;;  %v12270_v47 = vld [vmem:[%s15119_s6 + $0x1f4] ss:$8 sps:$4 sm:$0xff]   ;;  %v12268_v18 = vld [vmem:[%s15119_s6 + $0x1f0] ss:$8 sps:$4 sm:$0xff]   ;;  %v12273_v5 = vld [vmem:[%s15119_s6 + $0x204] ss:$8 sps:$4 sm:$0xff]  }
 0x6bb   :  { %v12276_v29 = vld [vmem:[%s15119_s6 + $0x284] ss:$8 sps:$4 sm:$0xff]   ;;  %v12271_v57 = vld [vmem:[%s15119_s6 + $0x200] ss:$8 sps:$4 sm:$0xff]   ;;  %v12282_v11 = vld [vmem:[%s15119_s6 + $0x294] ss:$8 sps:$4 sm:$0xff]  }
 0x6bc   :  { %7212 = vmatmul.mubr.bf16.vlgmr.msra.gmra.mrb[0].mxu0 %v7081_v9  ;;  %7333 = vmatmul.mubr.bf16.vlgmr.msra.gmra.mrb[0].mxu1 %v7056_v55  ;;  %v7348_v53 = vor.u32 %v7347_v13, %v7346_v60  ;;  %v7497_v15 = vor.u32 %v7496_v48, %v7495_v62  ;;  %v12277_v63 = vld [vmem:[%s15119_s6 + $0x210] ss:$8 sps:$4 sm:$0xff]   ;;  %v12288_v35 = vld [vmem:[%s15119_s6 + $0x2a4] ss:$8 sps:$4 sm:$0xff]   ;;  %v12283_v40 = vld [vmem:[%s15119_s6 + $0x220] ss:$8 sps:$4 sm:$0xff]  }
 0x6bd   :  { %7448 = vmatpush1.bf16.msra.mxu0 %v12223_v59  ;;  %7597 = vmatpush1.bf16.msra.mxu1 %v12226_v33  ;;  %v12280_v0 = vld [vmem:[%s15119_s6 + $0x290] ss:$8 sps:$4 sm:$0xff]   ;;  %v12294_v28 = vld [vmem:[%s15119_s6 + $0x2b4] ss:$8 sps:$4 sm:$0xff]   ;;  %v12297_v55 = vld [vmem:[%s15119_s6 + $0x244] ss:$8 sps:$4 sm:$0xff]  }
 0x6be   :  { %7449 = vmatprep.subr.bf16.mxu0 %v12231_v1  ;;  %7598 = vmatprep.subr.bf16.mxu1 %v12234_v50  ;;  %v7349_v41 = vpack.c.bf16 %v7348_v53, %v7348_v53  ;;  %v7498_v25 = vpack.c.bf16 %v7497_v15, %v7497_v15  ;;  %v12292_v9 = vld [vmem:[%s15119_s6 + $0x2b0] ss:$8 sps:$4 sm:$0xff]   ;;  %v12300_v59 = vld [vmem:[%s15119_s6 + $0x2c4] ss:$8 sps:$4 sm:$0xff]   ;;  %v12295_v33 = vld [vmem:[%s15119_s6 + $0x240] ss:$8 sps:$4 sm:$0xff]  }
 0x6bf   :  { %7479 = vmatprep.mubr.bf16.mxu0 %v15153_v61  ;;  %7628 = vmatprep.mubr.bf16.mxu1 %v15153_v61  ;;  %v12298_v1 = vld [vmem:[%s15119_s6 + $0x2c0] ss:$8 sps:$4 sm:$0xff]   ;;  %v12318_v22 = vld [vmem:[%s15119_s6 + $0x2f4] ss:$8 sps:$4 sm:$0xff]   ;;  %v12316_v10 = vld [vmem:[%s15119_s6 + $0x2f0] ss:$8 sps:$4 sm:$0xff]  }
 0x6c0   :  { %v7640_v50 = vld [vmem:[#allocation6 + $0x4] ss:$16 sm:$0x3]  ;;  %v12321_v27 = vld [vmem:[%s15119_s6 + $0x304] ss:$8 sps:$4 sm:$0xff]  }
 0x6c1   :  { %7450 = vmatpush1.bf16.msra.mxu0 %v12229_v43  ;;  %7599 = vmatpush1.bf16.msra.mxu1 %v12232_v52  ;;  %v7641_v43 = vld [vmem:[#allocation6 + $0x4] ss:$16 sm:$0xc]  ;;  %v12303_v52 = vld [vmem:[%s15119_s6 + $0x254] ss:$8 sps:$4 sm:$0xff]  }
 0x6c2   :  { %7451 = vmatprep.subr.bf16.mxu0 %v12237_v16  ;;  %7600 = vmatprep.subr.bf16.mxu1 %v12240_v46  ;;  %v7789_v16 = vld [vmem:[#allocation6 + $0x5] ss:$16 sm:$0x3]  ;;  %v12327_v13 = vld [vmem:[%s15119_s6 + $0x314] ss:$8 sps:$4 sm:$0xff]  }
 0x6c3   :  { %v7790_v46 = vld [vmem:[#allocation6 + $0x5] ss:$16 sm:$0xc]  ;;  %v12330_v62 = vld [vmem:[%s15119_s6 + $0x394] ss:$8 sps:$4 sm:$0xff]  }
 0x6c4   :  { %v12310_v8 = vld [vmem:[%s15119_s6 + $0x2e0] ss:$8 sps:$4 sm:$0xff]   ;;  %v12325_v48 = vld [vmem:[%s15119_s6 + $0x310] ss:$8 sps:$4 sm:$0xff]  }
 0x6c5   :  { %7452 = vmatpush1.bf16.msra.mxu0 %v12235_v26  ;;  %7601 = vmatpush1.bf16.msra.mxu1 %v12238_v38  ;;  %v12306_v26 = vld [vmem:[%s15119_s6 + $0x2d4] ss:$8 sps:$4 sm:$0xff]   ;;  %v12301_v38 = vld [vmem:[%s15119_s6 + $0x250] ss:$8 sps:$4 sm:$0xff]   ;;  %v12322_v60 = vld [vmem:[%s15119_s6 + $0x380] ss:$8 sps:$4 sm:$0xff]  }
 0x6c6   :  { %7453 = vmatprep.subr.bf16.mxu0 %v12243_v36  ;;  %7602 = vmatprep.subr.bf16.mxu1 %v12246_v42  ;;  %v12304_v36 = vld [vmem:[%s15119_s6 + $0x2d0] ss:$8 sps:$4 sm:$0xff]   ;;  %v12309_v42 = vld [vmem:[%s15119_s6 + $0x264] ss:$8 sps:$4 sm:$0xff]   ;;  %v12331_v53 = vld [vmem:[%s15119_s6 + $0x320] ss:$8 sps:$4 sm:$0xff]  }
 0x6c7   :  { %v12334_v15 = vld [vmem:[%s15119_s6 + $0x3a0] ss:$8 sps:$4 sm:$0xff]  }
 0x6c9   :  { %7454 = vmatpush1.bf16.msra.mxu0 %v12241_v31  ;;  %7603 = vmatpush1.bf16.msra.mxu1 %v12244_v54  ;;  %v7642_v31 = vor.u32 %v7641_v43, %v7640_v50  ;;  %v7643_v54 = vld [vmem:[#allocation6 + $0x4] ss:$16 sm:$0x30]  ;;  %v7943_v43 = vld [vmem:[#allocation6 + $0x6] ss:$16 sm:$0xc0] }
 0x6ca   :  { %7455 = vmatprep.subr.bf16.mxu0 %v12249_v51  ;;  %7604 = vmatprep.subr.bf16.mxu1 %v12252_v17  ;;  %v7791_v51 = vor.u32 %v7790_v46, %v7789_v16  ;;  %v7792_v17 = vld [vmem:[#allocation6 + $0x5] ss:$16 sm:$0x30]  ;;  %v12363_v16 = vld [vmem:[%s15119_s6 + $0x374] ss:$8 sps:$4 sm:$0xff]  }
 0x6cb   :  { %v7644_v12 = vor.u32 %v7643_v54, %v7642_v31  ;;  %v12358_v50 = vld [vmem:[%s15119_s6 + $0x3e0] ss:$8 sps:$4 sm:$0xff]   ;;  %v12366_v46 = vld [vmem:[%s15119_s6 + $0x3f4] ss:$8 sps:$4 sm:$0xff]   ;;  %v12361_v31 = vld [vmem:[%s15119_s6 + $0x370] ss:$8 sps:$4 sm:$0xff]  }
 0x6cc   :  { %v7793_v24 = vor.u32 %v7792_v17, %v7791_v51  ;;  %v12364_v54 = vld [vmem:[%s15119_s6 + $0x3f0] ss:$8 sps:$4 sm:$0xff]   ;;  %v12369_v51 = vld [vmem:[%s15119_s6 + $0x404] ss:$8 sps:$4 sm:$0xff]  }
 0x6cd   :  { %7456 = vmatpush1.bf16.msra.mxu0 %v12247_v2  ;;  %7605 = vmatpush1.bf16.msra.mxu1 %v12250_v6  ;;  %v12312_v2 = vld [vmem:[%s15119_s6 + $0x2e4] ss:$8 sps:$4 sm:$0xff]   ;;  %v12307_v6 = vld [vmem:[%s15119_s6 + $0x260] ss:$8 sps:$4 sm:$0xff]  }
 0x6ce   :  { %7457 = vmatprep.subr.bf16.mxu0 %v12255_v56  ;;  %7606 = vmatprep.subr.bf16.mxu1 %v12258_v49  ;;  %v12315_v56 = vld [vmem:[%s15119_s6 + $0x274] ss:$8 sps:$4 sm:$0xff]   ;;  %v7645_v49 = vld [vmem:[#allocation6 + $0x4] ss:$16 sm:$0xc0] }
 0x6cf   :  { %v7646_v21 = vor.u32 %v7645_v49, %v7644_v12  ;;  %v12375_v12 = vld [vmem:[%s15119_s6 + $0x424] ss:$8 sps:$4 sm:$0xff]   ;;  %v12373_v49 = vld [vmem:[%s15119_s6 + $0x420] ss:$8 sps:$4 sm:$0xff]  }
 0x6d1   :  { %7458 = vmatpush1.bf16.msra.mxu0 %v12253_v32  ;;  %7607 = vmatpush1.bf16.msra.mxu1 %v12256_v34  ;;  %v7794_v32 = vld [vmem:[#allocation6 + $0x5] ss:$16 sm:$0xc0] }
 0x6d2   :  { %7459 = vmatprep.subr.bf16.mxu0 %v12261_v44  ;;  %7608 = vmatprep.subr.bf16.mxu1 %v12264_v23  ;;  %v12313_v34 = vld [vmem:[%s15119_s6 + $0x270] ss:$8 sps:$4 sm:$0xff]   ;;  %v7795_v19 = vor.u32 %v7794_v32, %v7793_v24  ;;  %v12324_v44 = vld [vmem:[%s15119_s6 + $0x384] ss:$8 sps:$4 sm:$0xff]   ;;  %v7647_v23 = vpack.c.bf16 %v7646_v21, %v7646_v21  ;;  %v12378_v24 = vld [vmem:[%s15119_s6 + $0x434] ss:$8 sps:$4 sm:$0xff]  }
 0x6d3   :  { %v12381_v32 = vld [vmem:[%s15119_s6 + $0x444] ss:$8 sps:$4 sm:$0xff]   ;;  %v12384_v21 = vld [vmem:[%s15119_s6 + $0x454] ss:$8 sps:$4 sm:$0xff]  }
 0x6d5   :  { %7460 = vmatpush1.bf16.msra.mxu0 %v12259_v3  ;;  %7609 = vmatpush1.bf16.msra.mxu1 %v12262_v30  ;;  %v7796_v3 = vpack.c.bf16 %v7795_v19, %v7795_v19  ;;  %v12319_v30 = vld [vmem:[%s15119_s6 + $0x300] ss:$8 sps:$4 sm:$0xff]  }
 0x6d6   :  { %7461 = vmatprep.subr.bf16.mxu0 %v12267_v14  ;;  %7610 = vmatprep.subr.bf16.mxu1 %v12270_v47  ;;  %v12328_v14 = vld [vmem:[%s15119_s6 + $0x390] ss:$8 sps:$4 sm:$0xff]   ;;  %v12333_v47 = vld [vmem:[%s15119_s6 + $0x324] ss:$8 sps:$4 sm:$0xff]  }
 0x6d9   :  { %7462 = vmatpush1.bf16.msra.mxu0 %v12265_v4  ;;  %7611 = vmatpush1.bf16.msra.mxu1 %v12268_v18  ;;  %v12336_v4 = vld [vmem:[%s15119_s6 + $0x3a4] ss:$8 sps:$4 sm:$0xff]   ;;  %v12339_v18 = vld [vmem:[%s15119_s6 + $0x334] ss:$8 sps:$4 sm:$0xff]  }
 0x6da   :  { %7745 = vmatprep.subr.bf16.mxu0 %v12273_v5  ;;  %7894 = vmatprep.subr.bf16.mxu1 %v12276_v29  ;;  %v12342_v5 = vld [vmem:[%s15119_s6 + $0x3b4] ss:$8 sps:$4 sm:$0xff]   ;;  %v12337_v29 = vld [vmem:[%s15119_s6 + $0x330] ss:$8 sps:$4 sm:$0xff]  }
 0x6dc   :  { %7480 = vmatmul.mubr.bf16.vlgmr.msra.gmra.mrb[4].mxu0 %v7349_v41  ;;  %7629 = vmatmul.mubr.bf16.vlgmr.msra.gmra.mrb[4].mxu1 %v7498_v25  ;;  %v12340_v41 = vld [vmem:[%s15119_s6 + $0x3b0] ss:$8 sps:$4 sm:$0xff]   ;;  %v12348_v25 = vld [vmem:[%s15119_s6 + $0x3c4] ss:$8 sps:$4 sm:$0xff]  }
 0x6dd   :  { %7746 = vmatpush1.bf16.msra.mxu0 %v12271_v57  ;;  %7895 = vmatpush1.bf16.msra.mxu1 %v12274_v58  ;;  %v12345_v57 = vld [vmem:[%s15119_s6 + $0x344] ss:$8 sps:$4 sm:$0xff]   ;;  %v12343_v58 = vld [vmem:[%s15119_s6 + $0x340] ss:$8 sps:$4 sm:$0xff]  }
 0x6de   :  { %7747 = vmatprep.subr.bf16.mxu0 %v12279_v39  ;;  %7896 = vmatprep.subr.bf16.mxu1 %v12282_v11  ;;  %v12346_v39 = vld [vmem:[%s15119_s6 + $0x3c0] ss:$8 sps:$4 sm:$0xff]  }
 0x6df   :  { %7777 = vmatprep.mubr.bf16.mxu0 %v15153_v61  ;;  %7926 = vmatprep.mubr.bf16.mxu1 %v15153_v61  ;;  %v7938_v11 = vld [vmem:[#allocation6 + $0x6] ss:$16 sm:$0x3] }
 0x6e1   :  { %7748 = vmatpush1.bf16.msra.mxu0 %v12277_v63  ;;  %7897 = vmatpush1.bf16.msra.mxu1 %v12280_v0  ;;  %v12351_v63 = vld [vmem:[%s15119_s6 + $0x354] ss:$8 sps:$4 sm:$0xff]  }
 0x6e2   :  { %7749 = vmatprep.subr.bf16.mxu0 %v12285_v45  ;;  %7898 = vmatprep.subr.bf16.mxu1 %v12288_v35  ;;  %v12354_v0 = vld [vmem:[%s15119_s6 + $0x3d4] ss:$8 sps:$4 sm:$0xff]   ;;  %v7939_v45 = vld [vmem:[#allocation6 + $0x6] ss:$16 sm:$0xc] }
 0x6e3   :  { %v8087_v35 = vld [vmem:[#allocation6 + $0x7] ss:$16 sm:$0x3] }
 0x6e5   :  { %7750 = vmatpush1.bf16.msra.mxu0 %v12283_v40  ;;  %7899 = vmatpush1.bf16.msra.mxu1 %v12286_v37  ;;  %v8088_v40 = vld [vmem:[#allocation6 + $0x7] ss:$16 sm:$0xc] }
 0x6e6   :  { %7751 = vmatprep.subr.bf16.mxu0 %v12291_v7  ;;  %7900 = vmatprep.subr.bf16.mxu1 %v12294_v28  ;;  %v12349_v37 = vld [vmem:[%s15119_s6 + $0x350] ss:$8 sps:$4 sm:$0xff]  }
 0x6e7   :  { %v12352_v7 = vld [vmem:[%s15119_s6 + $0x3d0] ss:$8 sps:$4 sm:$0xff]  }
 0x6e8   :  { %v7941_v28 = vld [vmem:[#allocation6 + $0x6] ss:$16 sm:$0x30] }
 0x6e9   :  { %7752 = vmatpush1.bf16.msra.mxu0 %v12289_v20  ;;  %7901 = vmatpush1.bf16.msra.mxu1 %v12292_v9  ;;  %v8090_v20 = vld [vmem:[#allocation6 + $0x7] ss:$16 sm:$0x30]  ;;  %v12357_v9 = vld [vmem:[%s15119_s6 + $0x364] ss:$8 sps:$4 sm:$0xff]  }
 0x6ea   :  { %7753 = vmatprep.subr.bf16.mxu0 %v12297_v55  ;;  %7902 = vmatprep.subr.bf16.mxu1 %v12300_v59  ;;  %v12360_v55 = vld [vmem:[%s15119_s6 + $0x3e4] ss:$8 sps:$4 sm:$0xff]   ;;  %v7940_v59 = vor.u32 %v7939_v45, %v7938_v11 }
 0x6ed   :  { %7754 = vmatpush1.bf16.msra.mxu0 %v12295_v33  ;;  %7903 = vmatpush1.bf16.msra.mxu1 %v12298_v1  ;;  %v8089_v33 = vor.u32 %v8088_v40, %v8087_v35  ;;  %v12355_v1 = vld [vmem:[%s15119_s6 + $0x360] ss:$8 sps:$4 sm:$0xff]   ;;  %v12403_v40 = vld [vmem:[%s15121_s8 + $0x70] sm:$0xff]  }
 0x6ee   :  { %7755 = vmatprep.subr.bf16.mxu0 %v12303_v52  ;;  %7904 = vmatprep.subr.bf16.mxu1 %v12306_v26  ;;  %v8092_v52 = vld [vmem:[#allocation6 + $0x7] ss:$16 sm:$0xc0]  ;;  %v7942_v26 = vor.u32 %v7941_v28, %v7940_v59  ;;  %v12405_v59 = vld [vmem:[%s15121_s8 + $0x78] sm:$0xff]  }
 0x6f1   :  { %7756 = vmatpush1.bf16.msra.mxu0 %v12301_v38  ;;  %7905 = vmatpush1.bf16.msra.mxu1 %v12304_v36  ;;  %v8091_v38 = vor.u32 %v8090_v20, %v8089_v33  ;;  %v7944_v36 = vor.u32 %v7943_v43, %v7942_v26  ;;  %v12404_v20 = vld [vmem:[%s15121_s8 + $0x30] sm:$0xff]   ;;  %v12406_v33 = vld [vmem:[%s15121_s8 + $0x38] sm:$0xff]  }
 0x6f2   :  { %7757 = vmatprep.subr.bf16.mxu0 %v12309_v42  ;;  %7906 = vmatprep.subr.bf16.mxu1 %v12312_v2 }
 0x6f3   :  { %v8093_v42 = vor.u32 %v8092_v52, %v8091_v38  ;;  %v7945_v17 = vpack.c.bf16 %v7944_v36, %v7944_v36 }
 0x6f5   :  { %7758 = vmatpush1.bf16.msra.mxu0 %v12307_v6  ;;  %7907 = vmatpush1.bf16.msra.mxu1 %v12310_v8  ;;  %v8094_v2 = vpack.c.bf16 %v8093_v42, %v8093_v42  ;;  %v12367_v6 = vld [vmem:[%s15119_s6 + $0x400] ss:$8 sps:$4 sm:$0xff]   ;;  %v12372_v8 = vld [vmem:[%s15119_s6 + $0x414] ss:$8 sps:$4 sm:$0xff]  }
 0x6f6   :  { %7759 = vmatprep.subr.bf16.mxu0 %v12315_v56  ;;  %7908 = vmatprep.subr.bf16.mxu1 %v12318_v22  ;;  %v12370_v56 = vld [vmem:[%s15119_s6 + $0x410] ss:$8 sps:$4 sm:$0xff]   ;;  %v12379_v22 = vld [vmem:[%s15119_s6 + $0x440] ss:$8 sps:$4 sm:$0xff]  }
 0x6f9   :  { %7760 = vmatpush1.bf16.msra.mxu0 %v12313_v34  ;;  %7909 = vmatpush1.bf16.msra.mxu1 %v12316_v10  ;;  %v8236_v34 = vld [vmem:[#allocation6 + $0x8] ss:$16 sm:$0x3] }
 0x6fa   :  { %8043 = vmatprep.subr.bf16.mxu0 %v12321_v27  ;;  %8192 = vmatprep.subr.bf16.mxu1 %v12324_v44  ;;  %v8237_v10 = vld [vmem:[#allocation6 + $0x8] ss:$16 sm:$0xc]  ;;  %v12382_v27 = vld [vmem:[%s15119_s6 + $0x450] ss:$8 sps:$4 sm:$0xff]  }
 0x6fb   :  { %v8238_v19 = vor.u32 %v8237_v10, %v8236_v34  ;;  %v8239_v44 = vld [vmem:[#allocation6 + $0x8] ss:$16 sm:$0x30] }
 0x6fc   :  { %7778 = vmatmul.mubr.bf16.vlgmr.msra.gmra.mrb[8].mxu0 %v7647_v23  ;;  %7927 = vmatmul.mubr.bf16.vlgmr.msra.gmra.mrb[8].mxu1 %v7796_v3  ;;  %v12387_v23 = vld [vmem:[%s15119_s6 + $0x464] ss:$8 sps:$4 sm:$0xff]  }
 0x6fd   :  { %8044 = vmatpush1.bf16.msra.mxu0 %v12319_v30  ;;  %8193 = vmatpush1.bf16.msra.mxu1 %v12322_v60  ;;  %v8240_v3 = vor.u32 %v8239_v44, %v8238_v19  ;;  %v12385_v30 = vld [vmem:[%s15119_s6 + $0x460] ss:$8 sps:$4 sm:$0xff]   ;;  %v8241_v60 = vld [vmem:[#allocation6 + $0x8] ss:$16 sm:$0xc0] }
 0x6fe   :  { %8045 = vmatprep.subr.bf16.mxu0 %v12327_v13  ;;  %8194 = vmatprep.subr.bf16.mxu1 %v12330_v62  ;;  %v12390_v13 = vld [vmem:[%s15119_s6 + $0x474] ss:$8 sps:$4 sm:$0xff]  }
 0x6ff   :  { %8075 = vmatprep.mubr.bf16.mxu0 %v15153_v61  ;;  %8224 = vmatprep.mubr.bf16.mxu1 %v15153_v61  ;;  %v8242_v62 = vor.u32 %v8241_v60, %v8240_v3 }
 0x701   :  { %8046 = vmatpush1.bf16.msra.mxu0 %v12325_v48  ;;  %8195 = vmatpush1.bf16.msra.mxu1 %v12328_v14  ;;  %v12388_v48 = vld [vmem:[%s15119_s6 + $0x470] ss:$8 sps:$4 sm:$0xff]   ;;  %v8243_v14 = vpack.c.bf16 %v8242_v62, %v8242_v62 }
 0x702   :  { %8047 = vmatprep.subr.bf16.mxu0 %v12333_v47  ;;  %8196 = vmatprep.subr.bf16.mxu1 %v12336_v4  ;;  %v12391_v47 = vld [vmem:[%s15121_s8 + $0x40] sm:$0xff]  }
 0x703   :  { %v12392_v4 = vld [vmem:[%s15121_s8] sm:$0xff]  }
 0x705   :  { %8048 = vmatpush1.bf16.msra.mxu0 %v12331_v53  ;;  %8197 = vmatpush1.bf16.msra.mxu1 %v12334_v15  ;;  %v12393_v53 = vld [vmem:[%s15121_s8 + $0x48] sm:$0xff]  }
 0x706   :  { %8049 = vmatprep.subr.bf16.mxu0 %v12339_v18  ;;  %8198 = vmatprep.subr.bf16.mxu1 %v12342_v5  ;;  %v12394_v15 = vld [vmem:[%s15121_s8 + $0x8] sm:$0xff]   ;;  %v12395_v18 = vld [vmem:[%s15121_s8 + $0x50] sm:$0xff]  }
 0x707   :  { %v12396_v5 = vld [vmem:[%s15121_s8 + $0x10] sm:$0xff]  }
 0x709   :  { %8050 = vmatpush1.bf16.msra.mxu0 %v12337_v29  ;;  %8199 = vmatpush1.bf16.msra.mxu1 %v12340_v41  ;;  %v12397_v29 = vld [vmem:[%s15121_s8 + $0x58] sm:$0xff]  }
 0x70a   :  { %8051 = vmatprep.subr.bf16.mxu0 %v12345_v57  ;;  %8200 = vmatprep.subr.bf16.mxu1 %v12348_v25  ;;  %v12398_v41 = vld [vmem:[%s15121_s8 + $0x18] sm:$0xff]   ;;  %v12399_v57 = vld [vmem:[%s15121_s8 + $0x60] sm:$0xff]  }
 0x70b   :  { %v12400_v25 = vld [vmem:[%s15121_s8 + $0x20] sm:$0xff]  }
 0x70d   :  { %8052 = vmatpush1.bf16.msra.mxu0 %v12343_v58  ;;  %8201 = vmatpush1.bf16.msra.mxu1 %v12346_v39  ;;  %v12401_v58 = vld [vmem:[%s15121_s8 + $0x68] sm:$0xff]  }
 0x70e   :  { %8053 = vmatprep.subr.bf16.mxu0 %v12351_v63  ;;  %8202 = vmatprep.subr.bf16.mxu1 %v12354_v0  ;;  %v12402_v39 = vld [vmem:[%s15121_s8 + $0x28] sm:$0xff]  }
 0x711   :  { %8054 = vmatpush1.bf16.msra.mxu0 %v12349_v37  ;;  %8203 = vmatpush1.bf16.msra.mxu1 %v12352_v7 }
 0x712   :  { %8055 = vmatprep.subr.bf16.mxu0 %v12357_v9  ;;  %8204 = vmatprep.subr.bf16.mxu1 %v12360_v55 }
 0x715   :  { %8056 = vmatpush1.bf16.msra.mxu0 %v12355_v1  ;;  %8205 = vmatpush1.bf16.msra.mxu1 %v12358_v50 }
 0x716   :  { %8057 = vmatprep.subr.bf16.mxu0 %v12363_v16  ;;  %8206 = vmatprep.subr.bf16.mxu1 %v12366_v46 }
 0x719   :  { %8058 = vmatpush1.bf16.msra.mxu0 %v12361_v31  ;;  %8207 = vmatpush1.bf16.msra.mxu1 %v12364_v54 }
 0x71a   :  { %8341 = vmatprep.subr.bf16.mxu0 %v12369_v51  ;;  %10083 = vmatprep.subr.bf16.mxu1 %v12391_v47 }
 0x71c   :  { %8076 = vmatmul.mubr.bf16.vlgmr.msra.gmra.mrb[12].mxu0 %v7945_v17  ;;  %8225 = vmatmul.mubr.bf16.vlgmr.msra.gmra.mrb[12].mxu1 %v8094_v2 }
 0x71d   :  { %8342 = vmatpush1.bf16.msra.mxu0 %v12367_v6  ;;  %8373 = vmatprep.mubr.bf16.mxu0 %v15153_v61  ;;  %v12376_v61 = vld [vmem:[%s15119_s6 + $0x430] ss:$8 sps:$4 sm:$0xff]  }
 0x71e   :  { %8343 = vmatprep.subr.bf16.mxu0 %v12372_v8  ;;  %10084 = vmatpush3.bf16.msra.mxu1 %v12392_v4  ;;  %v8384_v4 = vld [vmem:[%s15120_s7] sm:$0x3] }
 0x71f   :  { %10085 = vmatprep.subr.bf16.mxu1 %v12393_v53 }
 0x721   :  { %8344 = vmatpush1.bf16.msra.mxu0 %v12370_v56 }
 0x722   :  { %8345 = vmatprep.subr.bf16.mxu0 %v12375_v12  ;;  %10086 = vmatpush3.bf16.msra.mxu1 %v12394_v15 }
 0x723   :  { %10087 = vmatprep.subr.bf16.mxu1 %v12395_v18 }
 0x725   :  { %8346 = vmatpush1.bf16.msra.mxu0 %v12373_v49 }
 0x726   :  { %8347 = vmatprep.subr.bf16.mxu0 %v12378_v24  ;;  %10088 = vmatpush3.bf16.msra.mxu1 %v12396_v5 }
 0x727   :  { %10089 = vmatprep.subr.bf16.mxu1 %v12397_v29 }
 0x729   :  { %8348 = vmatpush1.bf16.msra.mxu0 %v12376_v61 }
 0x72a   :  { %8349 = vmatprep.subr.bf16.mxu0 %v12381_v32  ;;  %10090 = vmatpush3.bf16.msra.mxu1 %v12398_v41 }
 0x72b   :  { %10091 = vmatprep.subr.bf16.mxu1 %v12399_v57 }
 0x72d   :  { %8350 = vmatpush1.bf16.msra.mxu0 %v12379_v22 }
 0x72e   :  { %8351 = vmatprep.subr.bf16.mxu0 %v12384_v21  ;;  %10092 = vmatpush3.bf16.msra.mxu1 %v12400_v25 }
 0x72f   :  { %10093 = vmatprep.subr.bf16.mxu1 %v12401_v58 }
 0x731   :  { %8352 = vmatpush1.bf16.msra.mxu0 %v12382_v27 }
 0x732   :  { %8353 = vmatprep.subr.bf16.mxu0 %v12387_v23  ;;  %10094 = vmatpush3.bf16.msra.mxu1 %v12402_v39 }
 0x733   :  { %10095 = vmatprep.subr.bf16.mxu1 %v12403_v40 }
 0x735   :  { %8354 = vmatpush1.bf16.msra.mxu0 %v12385_v30 }
 0x736   :  { %8355 = vmatprep.subr.bf16.mxu0 %v12390_v13  ;;  %10096 = vmatpush3.bf16.msra.mxu1 %v12404_v20 }
 0x737   :  { %10097 = vmatprep.subr.bf16.mxu1 %v12405_v59 }
 0x739   :  { %8356 = vmatpush1.bf16.msra.mxu0 %v12388_v48  ;;  %v8386_v48 = vlaneseq }
 0x73a   :  { %10098 = vmatpush3.bf16.msra.mxu1 %v12406_v33 }
 0x73c   :  { %8374 = vmatmul.mubr.bf16.vlgmr.msra.gmra.mrb[16].mxu0 %v8243_v14  ;;  %v8387_v14 = vshrl.u32 %v8386_v48, 7 }
 0x73e   :  { %v8388_v47 = vsub.s32 0, %v8387_v14  ;;  %v8392_v53 = vsub.s32 1, %v8387_v14 }
 0x740   :  { %v8389_v15 = vrot.slane %v8384_v4, %v8388_v47  ;;  %v8393_v5 = vrot.slane %v8384_v4, %v8392_v53 }
 0x78f   :  { %v7213_v11 = vpop.f32.mrb[0].mxu0  ;;  %v7334_v63 = vpop.f32.mrb[0].mxu1 }
 0x790   :  { %v7335_v0 = vadd.f32 %v7334_v63, %v7213_v11  ;;  %v7215_v45 = vpop.f32.mrb[1].mxu0  ;;  %v7336_v35 = vpop.f32.mrb[1].mxu1 }
 0x791   :  { %v7337_v37 = vadd.f32 %v7336_v35, %v7215_v45  ;;  %v7217_v7 = vpop.f32.mrb[2].mxu0  ;;  %v7338_v28 = vpop.f32.mrb[2].mxu1 }
 0x792   :  { %v7218_v9 = vpop.f32.mrb[3].mxu0  ;;  %v7339_v55 = vpop.f32.mrb[3].mxu1 }
 0x7af   :  { %v7481_v1 = vpop.f32.mrb[4].mxu0  ;;  %v7630_v50 = vpop.f32.mrb[4].mxu1 }
 0x7b0   :  { %v7488_v43 = vadd.f32 %v7481_v1, %v7335_v0  ;;  %v7483_v52 = vpop.f32.mrb[5].mxu0  ;;  %v7632_v16 = vpop.f32.mrb[5].mxu1 }
 0x7b1   :  { %v7489_v46 = vadd.f32 %v7483_v52, %v7337_v37  ;;  %v7485_v26 = vpop.f32.mrb[6].mxu0  ;;  %v7634_v38 = vpop.f32.mrb[6].mxu1  ;;  %v9617_v37 = vld [vmem:[%s15122_s9] ss:$0 sm:$0xff] }
 0x7b2   :  { %v7637_v36 = vadd.f32 %v7630_v50, %v7488_v43  ;;  %v7486_v42 = vpop.f32.mrb[7].mxu0  ;;  %v7635_v31 = vpop.f32.mrb[7].mxu1 }
 0x7b3   :  { %v7638_v54 = vadd.f32 %v7632_v16, %v7489_v46 }
 0x7cf   :  { %v7779_v51 = vpop.f32.mrb[8].mxu0  ;;  %v7928_v17 = vpop.f32.mrb[8].mxu1 }
 0x7d0   :  { %v7786_v2 = vadd.f32 %v7779_v51, %v7637_v36  ;;  %v7781_v6 = vpop.f32.mrb[9].mxu0  ;;  %v7930_v8 = vpop.f32.mrb[9].mxu1 }
 0x7d1   :  { %v7787_v56 = vadd.f32 %v7781_v6, %v7638_v54  ;;  %v7783_v12 = vpop.f32.mrb[10].mxu0  ;;  %v7932_v49 = vpop.f32.mrb[10].mxu1 }
 0x7d2   :  { %v7935_v24 = vadd.f32 %v7928_v17, %v7786_v2  ;;  %v7784_v61 = vpop.f32.mrb[11].mxu0  ;;  %v7933_v32 = vpop.f32.mrb[11].mxu1 }
 0x7d3   :  { %v7936_v22 = vadd.f32 %v7930_v8, %v7787_v56 }
 0x7ef   :  { %v8077_v34 = vpop.f32.mrb[12].mxu0  ;;  %v8226_v10 = vpop.f32.mrb[12].mxu1 }
 0x7f0   :  { %v8084_v21 = vadd.f32 %v8077_v34, %v7935_v24  ;;  %v8079_v19 = vpop.f32.mrb[13].mxu0  ;;  %v8228_v27 = vpop.f32.mrb[13].mxu1 }
 0x7f1   :  { %v8085_v44 = vadd.f32 %v8079_v19, %v7936_v22  ;;  %v8081_v23 = vpop.f32.mrb[14].mxu0  ;;  %v8230_v3 = vpop.f32.mrb[14].mxu1 }
 0x7f2   :  { %v8233_v30 = vadd.f32 %v8226_v10, %v8084_v21  ;;  %v8082_v60 = vpop.f32.mrb[15].mxu0  ;;  %v8231_v13 = vpop.f32.mrb[15].mxu1 }
 0x7f3   :  { %v8234_v62 = vadd.f32 %v8228_v27, %v8085_v44 }
 0x80f   :  { %v8375_v18 = vpop.f32.mrb[16].mxu0 }
 0x810   :  { %v8382_v29 = vadd.f32 %v8375_v18, %v8233_v30  ;;  %v8377_v41 = vpop.f32.mrb[17].mxu0 }
 0x811   :  { %v8383_v57 = vadd.f32 %v8377_v41, %v8234_v62  ;;  %v8379_v25 = vpop.f32.mrb[18].mxu0 }
 0x812   :  { %v8396_v58 = vadd.f32 %v8389_v15, %v8382_v29  ;;  %v8380_v39 = vpop.f32.mrb[19].mxu0 }
 0x813   :  { %v8397_v11 = vadd.f32 %v8393_v5, %v8383_v57 }
 0x814   :  { %v8398_v63 = vmax.f32 %v8396_v58, 0.0 }
 0x815   :  { %v8399_v0 = vmax.f32 %v8397_v11, 0.0 }
 0x816   :  { %v8400_v35 = vpack.c.bf16 %v8398_v63, %v8398_v63 }
 0x817   :  { %v8401_v45 = vpack.c.bf16 %v8399_v0, %v8399_v0 }
 0x819   :  { %8569 = vmatprep.mubr.bf16.mxu1 %v8401_v45 }
 0x81a   :  { %8570 = vmatmul.mubr.bf16.vlgmr.msra.gmra.mrb[16].mxu1 %v8400_v35 }
 0x8ed   :  { %v10099_v40 = vpop.f32.mrb[16].mxu1 }
 0x8ee   :  { %v10100_v7 = vpop.f32.mrb[17].mxu1 }
 0x8ef   :  { %v10101_v28 = vadd.f32 %v10100_v7, %v10099_v40  ;;  %v10102_v20 = vpop.f32.mrb[18].mxu1 }
 0x8f0   :  { %v10103_v9 = vpop.f32.mrb[19].mxu1 }
 0x8f1   :  { %v8572_v55 = vadd.f32 %v10101_v28, %v9617_v37 }
 0x8f3   :  { %8577 = vst [vmem:[%s15123_s10] sm:$0xff] %v8572_v55 }

</bundles_post_ra>
